<compile_context>
chip_gen: v5e
topology: v5e:2x2
jax: 0.10.0
libtpu: 0.0.40
codegen_flags: <defaults>
</compile_context>

<pallas_src>
import jax
import jax.numpy as jnp
from jax.experimental import pallas as pl
from jax.experimental.pallas import tpu as pltpu


def _round_up(v, m):
    return (v + m - 1) // m * m


def _choose_tile_rows(r_total, max_tile_rows=128):
    """Pick tile rows: multiple of 8, divides r_total, <= cap, grid >= 2 if possible."""
    if r_total <= 8:
        return r_total
    best = 8
    for tr in range(8, min(max_tile_rows, r_total // 2) + 1, 8):
        if r_total % tr == 0:
            best = tr
    return best


# ---------------------------------------------------------------------------
# Parameters
# ---------------------------------------------------------------------------

def init_qnet_params(key, nT, nM):
    """Xavier-normal-style init; weights stored torch-style as (out, in)."""
    in_dim = nT + nM + 1
    dims = [(in_dim, 3), (3, 9), (9, 18), (18, 9), (9, 1)]
    params = []
    for fan_in, fan_out in dims:
        key, wk = jax.random.split(key)
        std = (2.0 / (fan_in + fan_out)) ** 0.5
        w = std * jax.random.normal(wk, (fan_out, fan_in), dtype=jnp.float32)
        b = jnp.zeros((fan_out,), dtype=jnp.float32)
        params.append((w, b))
    return params


def pack_params_flat(params):
    """Pack all (W, b) into one flat f32 vector for SMEM scalar access.

    Layout per layer: fout*fin weights row-major (w[j, i] at w_off + j*fin + i)
    followed by fout biases (b[j] at b_off + j).
    Returns (flat_buffer, meta) with meta = ((w_off, b_off, fin, fout), ...).
    """
    pieces, meta, off = [], [], 0
    for w, b in params:
        fout, fin = w.shape
        meta.append((off, off + fin * fout, fin, fout))
        pieces.append(w.reshape(-1).astype(jnp.float32))
        pieces.append(b.reshape(-1).astype(jnp.float32))
        off += fin * fout + fout
    return jnp.concatenate(pieces), tuple(meta)


# ---------------------------------------------------------------------------
# Kernel
# ---------------------------------------------------------------------------

def make_qnet_plane_kernel(layer_meta, in_dim):
    """layer_meta: ((w_off, b_off, fin, fout), ...) into the flat SMEM buffer."""
    n_layers = len(layer_meta)

    def kernel(x_ref, wb_ref, out_ref):
        # x_ref:   (in_dim, TR, 128) f32 VMEM — one [TR,128] batch plane per feature
        # wb_ref:  (n_params,)       f32 SMEM — all weights & biases as scalars
        # out_ref: (TR, 128)         f32 VMEM — lane+sublane dense Q plane
        h = [x_ref[i] for i in range(in_dim)]          # static ref-index loads
        for li, (w_off, b_off, fin, fout) in enumerate(layer_meta):
            nxt = []
            for j in range(fout):
                acc = h[0] * wb_ref[w_off + j * fin]   # scalar * full plane (VPU)
                for i in range(1, fin):
                    acc = acc + h[i] * wb_ref[w_off + j * fin + i]
                acc = acc + wb_ref[b_off + j]          # scalar bias broadcast
                if li < n_layers - 1:                  # Tanh on all but final FC
                    acc = jnp.tanh(acc)                # EUP, full-vreg dense
                nxt.append(acc)
            h = nxt
        out_ref[...] = h[0]

    return kernel


# ---------------------------------------------------------------------------
# Wrapper
# ---------------------------------------------------------------------------

def qnet_reference(x, params):
    """Pure-JAX reference (torch semantics: y = x @ W.T + b; out shape [1, N])."""
    h = x
    for w, b in params[:-1]:
        h = jnp.tanh(h @ w.T + b)
    wf, bf = params[-1]
    q = h @ wf.T + bf
    return q[:, 0][None, :]


def qnet_forward(x, params, *, min_kernel_batch=2048, max_tile_rows=128):
    """Qnet forward. x: [N, nT+nM+1] float32 (torch layout). Returns [1, N]."""
    N, in_dim = x.shape

    # Small batches: kernel launch + pad-to-1024 overhead dwarfs the work.
    if N < min_kernel_batch:
        return qnet_reference(x, params)

    wb_flat, meta = pack_params_flat(params)
    n_params = wb_flat.shape[0]

    # Pad the batch to a multiple of one full plane-row group (8 x 128 = 1024),
    # NOT to a multiple of the tile.
    n_pad = _round_up(max(N, 1024), 1024)
    r_total = n_pad // 128                      # plane rows (multiple of 8)
    tr = _choose_tile_rows(r_total, max_tile_rows)
    grid = (r_total // tr,)

    x_pad = x if n_pad == N else jnp.pad(x, ((0, n_pad - N), (0, 0)))
    # Plane layout: x_planes[f, r, l] = x[r*128 + l, f]
    x_planes = x_pad.T.reshape(in_dim, r_total, 128)

    macs = sum(fin * fout for *_, fin, fout in meta)
    tanhs = sum(fout for *_, fout in meta[:-1])

    q_planes = pl.pallas_call(
        make_qnet_plane_kernel(meta, in_dim),
        out_shape=jax.ShapeDtypeStruct((r_total, 128), jnp.float32),
        grid=grid,
        in_specs=[
            # Batch planes: pipelined along the (sole) grid axis.
            pl.BlockSpec((in_dim, tr, 128), lambda i: (0, i, 0)),
            # Weights/biases: whole flat vector resident in SMEM.
            pl.BlockSpec(memory_space=pltpu.MemorySpace.SMEM),
        ],
        out_specs=pl.BlockSpec((tr, 128), lambda i: (i, 0)),
        compiler_params=pltpu.CompilerParams(
            # Batch axis independent -> v7x megacore splits grid steps across TCs.
            dimension_semantics=("parallel",),
        ),
        cost_estimate=pl.CostEstimate(
            flops=2 * macs * n_pad,
            transcendentals=tanhs * n_pad,
            bytes_accessed=(in_dim + 1) * 4 * n_pad + int(n_params) * 4,
        ),
    )(x_planes, wb_flat)

    # q_planes[r, l] = Q(sample r*128 + l)  -> flatten and drop the padding.
    return q_planes.reshape(-1)[:N][None, :]


# ---------------------------------------------------------------------------
# Demo / self-check
# ---------------------------------------------------------------------------

if __name__ == "__main__":
    nT, nM = 4, 3                       # input dim = nT + nM + 1 = 8
    in_dim = nT + nM + 1

    key = jax.random.PRNGKey(0)
    params = init_qnet_params(key, nT, nM)

    # Two small batches: one single grid step (N=300 -> pad 1024, grid=1) and
    # one multi-step grid (N=2200 -> pad 3072, grid=3) to exercise pipelining
    # and the padding slice-off.  min_kernel_batch=0 forces the kernel path.
    for n in (300, 2200):
        key, xk = jax.random.split(key)
        x = jax.random.normal(xk, (n, in_dim), dtype=jnp.float32)

        out = qnet_forward(x, params, min_kernel_batch=0)
        out = jax.block_until_ready(out)

        ref = qnet_reference(x, params)
        assert out.shape == (1, n), out.shape
        assert jnp.allclose(out, ref, atol=1e-5, rtol=1e-5), (
            float(jnp.max(jnp.abs(out - ref))))

    print("KERNEL_OK")
</pallas_src>

<mosaic_0001>
module attributes {stable_mosaic.version = 11 : i64} {
  func.func @kernel(%arg0: i32, %arg1: memref<8x8x128xf32, #tpu.memory_space<vmem>>, %arg2: memref<424xf32, #tpu.memory_space<smem>>, %arg3: memref<8x128xf32, #tpu.memory_space<vmem>>) attributes {dimension_semantics = [#tpu.dimension_semantics<parallel>], iteration_bounds = array<i64: 1>, scalar_prefetch = 0 : i64, scratch_operands = 0 : i64, tpu.core_type = #tpu.core_type<tc>, window_params = [{transform_indices = @transform_0, window_bounds = array<i64: 8, 8, 128>}, {transform_indices = @transform_1, window_bounds = array<i64: 424>}, {transform_indices = @transform_2, window_bounds = array<i64: 8, 128>}]} {
    %c0 = arith.constant 0 : index
    %c0_0 = arith.constant 0 : index
    %c0_1 = arith.constant 0 : index
    %0 = vector.load %arg1[%c0, %c0_0, %c0_1] : memref<8x8x128xf32, #tpu.memory_space<vmem>>, vector<1x8x128xf32>
    %1 = vector.shape_cast %0 : vector<1x8x128xf32> to vector<8x128xf32>
    %c1 = arith.constant 1 : index
    %c0_2 = arith.constant 0 : index
    %c0_3 = arith.constant 0 : index
    %2 = vector.load %arg1[%c1, %c0_2, %c0_3] : memref<8x8x128xf32, #tpu.memory_space<vmem>>, vector<1x8x128xf32>
    %3 = vector.shape_cast %2 : vector<1x8x128xf32> to vector<8x128xf32>
    %c2 = arith.constant 2 : index
    %c0_4 = arith.constant 0 : index
    %c0_5 = arith.constant 0 : index
    %4 = vector.load %arg1[%c2, %c0_4, %c0_5] : memref<8x8x128xf32, #tpu.memory_space<vmem>>, vector<1x8x128xf32>
    %5 = vector.shape_cast %4 : vector<1x8x128xf32> to vector<8x128xf32>
    %c3 = arith.constant 3 : index
    %c0_6 = arith.constant 0 : index
    %c0_7 = arith.constant 0 : index
    %6 = vector.load %arg1[%c3, %c0_6, %c0_7] : memref<8x8x128xf32, #tpu.memory_space<vmem>>, vector<1x8x128xf32>
    %7 = vector.shape_cast %6 : vector<1x8x128xf32> to vector<8x128xf32>
    %c4 = arith.constant 4 : index
    %c0_8 = arith.constant 0 : index
    %c0_9 = arith.constant 0 : index
    %8 = vector.load %arg1[%c4, %c0_8, %c0_9] : memref<8x8x128xf32, #tpu.memory_space<vmem>>, vector<1x8x128xf32>
    %9 = vector.shape_cast %8 : vector<1x8x128xf32> to vector<8x128xf32>
    %c5 = arith.constant 5 : index
    %c0_10 = arith.constant 0 : index
    %c0_11 = arith.constant 0 : index
    %10 = vector.load %arg1[%c5, %c0_10, %c0_11] : memref<8x8x128xf32, #tpu.memory_space<vmem>>, vector<1x8x128xf32>
    %11 = vector.shape_cast %10 : vector<1x8x128xf32> to vector<8x128xf32>
    %c6 = arith.constant 6 : index
    %c0_12 = arith.constant 0 : index
    %c0_13 = arith.constant 0 : index
    %12 = vector.load %arg1[%c6, %c0_12, %c0_13] : memref<8x8x128xf32, #tpu.memory_space<vmem>>, vector<1x8x128xf32>
    %13 = vector.shape_cast %12 : vector<1x8x128xf32> to vector<8x128xf32>
    %c7 = arith.constant 7 : index
    %c0_14 = arith.constant 0 : index
    %c0_15 = arith.constant 0 : index
    %14 = vector.load %arg1[%c7, %c0_14, %c0_15] : memref<8x8x128xf32, #tpu.memory_space<vmem>>, vector<1x8x128xf32>
    %15 = vector.shape_cast %14 : vector<1x8x128xf32> to vector<8x128xf32>
    %c0_16 = arith.constant 0 : index
    %16 = memref.load %arg2[%c0_16] : memref<424xf32, #tpu.memory_space<smem>>
    %17 = vector.broadcast %16 : f32 to vector<8x128xf32>
    %18 = arith.mulf %1, %17 : vector<8x128xf32>
    %c1_17 = arith.constant 1 : index
    %19 = memref.load %arg2[%c1_17] : memref<424xf32, #tpu.memory_space<smem>>
    %20 = vector.broadcast %19 : f32 to vector<8x128xf32>
    %21 = arith.mulf %3, %20 : vector<8x128xf32>
    %22 = arith.addf %18, %21 : vector<8x128xf32>
    %c2_18 = arith.constant 2 : index
    %23 = memref.load %arg2[%c2_18] : memref<424xf32, #tpu.memory_space<smem>>
    %24 = vector.broadcast %23 : f32 to vector<8x128xf32>
    %25 = arith.mulf %5, %24 : vector<8x128xf32>
    %26 = arith.addf %22, %25 : vector<8x128xf32>
    %c3_19 = arith.constant 3 : index
    %27 = memref.load %arg2[%c3_19] : memref<424xf32, #tpu.memory_space<smem>>
    %28 = vector.broadcast %27 : f32 to vector<8x128xf32>
    %29 = arith.mulf %7, %28 : vector<8x128xf32>
    %30 = arith.addf %26, %29 : vector<8x128xf32>
    %c4_20 = arith.constant 4 : index
    %31 = memref.load %arg2[%c4_20] : memref<424xf32, #tpu.memory_space<smem>>
    %32 = vector.broadcast %31 : f32 to vector<8x128xf32>
    %33 = arith.mulf %9, %32 : vector<8x128xf32>
    %34 = arith.addf %30, %33 : vector<8x128xf32>
    %c5_21 = arith.constant 5 : index
    %35 = memref.load %arg2[%c5_21] : memref<424xf32, #tpu.memory_space<smem>>
    %36 = vector.broadcast %35 : f32 to vector<8x128xf32>
    %37 = arith.mulf %11, %36 : vector<8x128xf32>
    %38 = arith.addf %34, %37 : vector<8x128xf32>
    %c6_22 = arith.constant 6 : index
    %39 = memref.load %arg2[%c6_22] : memref<424xf32, #tpu.memory_space<smem>>
    %40 = vector.broadcast %39 : f32 to vector<8x128xf32>
    %41 = arith.mulf %13, %40 : vector<8x128xf32>
    %42 = arith.addf %38, %41 : vector<8x128xf32>
    %c7_23 = arith.constant 7 : index
    %43 = memref.load %arg2[%c7_23] : memref<424xf32, #tpu.memory_space<smem>>
    %44 = vector.broadcast %43 : f32 to vector<8x128xf32>
    %45 = arith.mulf %15, %44 : vector<8x128xf32>
    %46 = arith.addf %42, %45 : vector<8x128xf32>
    %c24 = arith.constant 24 : index
    %47 = memref.load %arg2[%c24] : memref<424xf32, #tpu.memory_space<smem>>
    %48 = vector.broadcast %47 : f32 to vector<8x128xf32>
    %49 = arith.addf %46, %48 : vector<8x128xf32>
    %50 = math.tanh %49 : vector<8x128xf32>
    %c8 = arith.constant 8 : index
    %51 = memref.load %arg2[%c8] : memref<424xf32, #tpu.memory_space<smem>>
    %52 = vector.broadcast %51 : f32 to vector<8x128xf32>
    %53 = arith.mulf %1, %52 : vector<8x128xf32>
    %c9 = arith.constant 9 : index
    %54 = memref.load %arg2[%c9] : memref<424xf32, #tpu.memory_space<smem>>
    %55 = vector.broadcast %54 : f32 to vector<8x128xf32>
    %56 = arith.mulf %3, %55 : vector<8x128xf32>
    %57 = arith.addf %53, %56 : vector<8x128xf32>
    %c10 = arith.constant 10 : index
    %58 = memref.load %arg2[%c10] : memref<424xf32, #tpu.memory_space<smem>>
    %59 = vector.broadcast %58 : f32 to vector<8x128xf32>
    %60 = arith.mulf %5, %59 : vector<8x128xf32>
    %61 = arith.addf %57, %60 : vector<8x128xf32>
    %c11 = arith.constant 11 : index
    %62 = memref.load %arg2[%c11] : memref<424xf32, #tpu.memory_space<smem>>
    %63 = vector.broadcast %62 : f32 to vector<8x128xf32>
    %64 = arith.mulf %7, %63 : vector<8x128xf32>
    %65 = arith.addf %61, %64 : vector<8x128xf32>
    %c12 = arith.constant 12 : index
    %66 = memref.load %arg2[%c12] : memref<424xf32, #tpu.memory_space<smem>>
    %67 = vector.broadcast %66 : f32 to vector<8x128xf32>
    %68 = arith.mulf %9, %67 : vector<8x128xf32>
    %69 = arith.addf %65, %68 : vector<8x128xf32>
    %c13 = arith.constant 13 : index
    %70 = memref.load %arg2[%c13] : memref<424xf32, #tpu.memory_space<smem>>
    %71 = vector.broadcast %70 : f32 to vector<8x128xf32>
    %72 = arith.mulf %11, %71 : vector<8x128xf32>
    %73 = arith.addf %69, %72 : vector<8x128xf32>
    %c14 = arith.constant 14 : index
    %74 = memref.load %arg2[%c14] : memref<424xf32, #tpu.memory_space<smem>>
    %75 = vector.broadcast %74 : f32 to vector<8x128xf32>
    %76 = arith.mulf %13, %75 : vector<8x128xf32>
    %77 = arith.addf %73, %76 : vector<8x128xf32>
    %c15 = arith.constant 15 : index
    %78 = memref.load %arg2[%c15] : memref<424xf32, #tpu.memory_space<smem>>
    %79 = vector.broadcast %78 : f32 to vector<8x128xf32>
    %80 = arith.mulf %15, %79 : vector<8x128xf32>
    %81 = arith.addf %77, %80 : vector<8x128xf32>
    %c25 = arith.constant 25 : index
    %82 = memref.load %arg2[%c25] : memref<424xf32, #tpu.memory_space<smem>>
    %83 = vector.broadcast %82 : f32 to vector<8x128xf32>
    %84 = arith.addf %81, %83 : vector<8x128xf32>
    %85 = math.tanh %84 : vector<8x128xf32>
    %c16 = arith.constant 16 : index
    %86 = memref.load %arg2[%c16] : memref<424xf32, #tpu.memory_space<smem>>
    %87 = vector.broadcast %86 : f32 to vector<8x128xf32>
    %88 = arith.mulf %1, %87 : vector<8x128xf32>
    %c17 = arith.constant 17 : index
    %89 = memref.load %arg2[%c17] : memref<424xf32, #tpu.memory_space<smem>>
    %90 = vector.broadcast %89 : f32 to vector<8x128xf32>
    %91 = arith.mulf %3, %90 : vector<8x128xf32>
    %92 = arith.addf %88, %91 : vector<8x128xf32>
    %c18 = arith.constant 18 : index
    %93 = memref.load %arg2[%c18] : memref<424xf32, #tpu.memory_space<smem>>
    %94 = vector.broadcast %93 : f32 to vector<8x128xf32>
    %95 = arith.mulf %5, %94 : vector<8x128xf32>
    %96 = arith.addf %92, %95 : vector<8x128xf32>
    %c19 = arith.constant 19 : index
    %97 = memref.load %arg2[%c19] : memref<424xf32, #tpu.memory_space<smem>>
    %98 = vector.broadcast %97 : f32 to vector<8x128xf32>
    %99 = arith.mulf %7, %98 : vector<8x128xf32>
    %100 = arith.addf %96, %99 : vector<8x128xf32>
    %c20 = arith.constant 20 : index
    %101 = memref.load %arg2[%c20] : memref<424xf32, #tpu.memory_space<smem>>
    %102 = vector.broadcast %101 : f32 to vector<8x128xf32>
    %103 = arith.mulf %9, %102 : vector<8x128xf32>
    %104 = arith.addf %100, %103 : vector<8x128xf32>
    %c21 = arith.constant 21 : index
    %105 = memref.load %arg2[%c21] : memref<424xf32, #tpu.memory_space<smem>>
    %106 = vector.broadcast %105 : f32 to vector<8x128xf32>
    %107 = arith.mulf %11, %106 : vector<8x128xf32>
    %108 = arith.addf %104, %107 : vector<8x128xf32>
    %c22 = arith.constant 22 : index
    %109 = memref.load %arg2[%c22] : memref<424xf32, #tpu.memory_space<smem>>
    %110 = vector.broadcast %109 : f32 to vector<8x128xf32>
    %111 = arith.mulf %13, %110 : vector<8x128xf32>
    %112 = arith.addf %108, %111 : vector<8x128xf32>
    %c23 = arith.constant 23 : index
    %113 = memref.load %arg2[%c23] : memref<424xf32, #tpu.memory_space<smem>>
    %114 = vector.broadcast %113 : f32 to vector<8x128xf32>
    %115 = arith.mulf %15, %114 : vector<8x128xf32>
    %116 = arith.addf %112, %115 : vector<8x128xf32>
    %c26 = arith.constant 26 : index
    %117 = memref.load %arg2[%c26] : memref<424xf32, #tpu.memory_space<smem>>
    %118 = vector.broadcast %117 : f32 to vector<8x128xf32>
    %119 = arith.addf %116, %118 : vector<8x128xf32>
    %120 = math.tanh %119 : vector<8x128xf32>
    %c27 = arith.constant 27 : index
    %121 = memref.load %arg2[%c27] : memref<424xf32, #tpu.memory_space<smem>>
    %122 = vector.broadcast %121 : f32 to vector<8x128xf32>
    %123 = arith.mulf %50, %122 : vector<8x128xf32>
    %c28 = arith.constant 28 : index
    %124 = memref.load %arg2[%c28] : memref<424xf32, #tpu.memory_space<smem>>
    %125 = vector.broadcast %124 : f32 to vector<8x128xf32>
    %126 = arith.mulf %85, %125 : vector<8x128xf32>
    %127 = arith.addf %123, %126 : vector<8x128xf32>
    %c29 = arith.constant 29 : index
    %128 = memref.load %arg2[%c29] : memref<424xf32, #tpu.memory_space<smem>>
    %129 = vector.broadcast %128 : f32 to vector<8x128xf32>
    %130 = arith.mulf %120, %129 : vector<8x128xf32>
    %131 = arith.addf %127, %130 : vector<8x128xf32>
    %c54 = arith.constant 54 : index
    %132 = memref.load %arg2[%c54] : memref<424xf32, #tpu.memory_space<smem>>
    %133 = vector.broadcast %132 : f32 to vector<8x128xf32>
    %134 = arith.addf %131, %133 : vector<8x128xf32>
    %135 = math.tanh %134 : vector<8x128xf32>
    %c30 = arith.constant 30 : index
    %136 = memref.load %arg2[%c30] : memref<424xf32, #tpu.memory_space<smem>>
    %137 = vector.broadcast %136 : f32 to vector<8x128xf32>
    %138 = arith.mulf %50, %137 : vector<8x128xf32>
    %c31 = arith.constant 31 : index
    %139 = memref.load %arg2[%c31] : memref<424xf32, #tpu.memory_space<smem>>
    %140 = vector.broadcast %139 : f32 to vector<8x128xf32>
    %141 = arith.mulf %85, %140 : vector<8x128xf32>
    %142 = arith.addf %138, %141 : vector<8x128xf32>
    %c32 = arith.constant 32 : index
    %143 = memref.load %arg2[%c32] : memref<424xf32, #tpu.memory_space<smem>>
    %144 = vector.broadcast %143 : f32 to vector<8x128xf32>
    %145 = arith.mulf %120, %144 : vector<8x128xf32>
    %146 = arith.addf %142, %145 : vector<8x128xf32>
    %c55 = arith.constant 55 : index
    %147 = memref.load %arg2[%c55] : memref<424xf32, #tpu.memory_space<smem>>
    %148 = vector.broadcast %147 : f32 to vector<8x128xf32>
    %149 = arith.addf %146, %148 : vector<8x128xf32>
    %150 = math.tanh %149 : vector<8x128xf32>
    %c33 = arith.constant 33 : index
    %151 = memref.load %arg2[%c33] : memref<424xf32, #tpu.memory_space<smem>>
    %152 = vector.broadcast %151 : f32 to vector<8x128xf32>
    %153 = arith.mulf %50, %152 : vector<8x128xf32>
    %c34 = arith.constant 34 : index
    %154 = memref.load %arg2[%c34] : memref<424xf32, #tpu.memory_space<smem>>
    %155 = vector.broadcast %154 : f32 to vector<8x128xf32>
    %156 = arith.mulf %85, %155 : vector<8x128xf32>
    %157 = arith.addf %153, %156 : vector<8x128xf32>
    %c35 = arith.constant 35 : index
    %158 = memref.load %arg2[%c35] : memref<424xf32, #tpu.memory_space<smem>>
    %159 = vector.broadcast %158 : f32 to vector<8x128xf32>
    %160 = arith.mulf %120, %159 : vector<8x128xf32>
    %161 = arith.addf %157, %160 : vector<8x128xf32>
    %c56 = arith.constant 56 : index
    %162 = memref.load %arg2[%c56] : memref<424xf32, #tpu.memory_space<smem>>
    %163 = vector.broadcast %162 : f32 to vector<8x128xf32>
    %164 = arith.addf %161, %163 : vector<8x128xf32>
    %165 = math.tanh %164 : vector<8x128xf32>
    %c36 = arith.constant 36 : index
    %166 = memref.load %arg2[%c36] : memref<424xf32, #tpu.memory_space<smem>>
    %167 = vector.broadcast %166 : f32 to vector<8x128xf32>
    %168 = arith.mulf %50, %167 : vector<8x128xf32>
    %c37 = arith.constant 37 : index
    %169 = memref.load %arg2[%c37] : memref<424xf32, #tpu.memory_space<smem>>
    %170 = vector.broadcast %169 : f32 to vector<8x128xf32>
    %171 = arith.mulf %85, %170 : vector<8x128xf32>
    %172 = arith.addf %168, %171 : vector<8x128xf32>
    %c38 = arith.constant 38 : index
    %173 = memref.load %arg2[%c38] : memref<424xf32, #tpu.memory_space<smem>>
    %174 = vector.broadcast %173 : f32 to vector<8x128xf32>
    %175 = arith.mulf %120, %174 : vector<8x128xf32>
    %176 = arith.addf %172, %175 : vector<8x128xf32>
    %c57 = arith.constant 57 : index
    %177 = memref.load %arg2[%c57] : memref<424xf32, #tpu.memory_space<smem>>
    %178 = vector.broadcast %177 : f32 to vector<8x128xf32>
    %179 = arith.addf %176, %178 : vector<8x128xf32>
    %180 = math.tanh %179 : vector<8x128xf32>
    %c39 = arith.constant 39 : index
    %181 = memref.load %arg2[%c39] : memref<424xf32, #tpu.memory_space<smem>>
    %182 = vector.broadcast %181 : f32 to vector<8x128xf32>
    %183 = arith.mulf %50, %182 : vector<8x128xf32>
    %c40 = arith.constant 40 : index
    %184 = memref.load %arg2[%c40] : memref<424xf32, #tpu.memory_space<smem>>
    %185 = vector.broadcast %184 : f32 to vector<8x128xf32>
    %186 = arith.mulf %85, %185 : vector<8x128xf32>
    %187 = arith.addf %183, %186 : vector<8x128xf32>
    %c41 = arith.constant 41 : index
    %188 = memref.load %arg2[%c41] : memref<424xf32, #tpu.memory_space<smem>>
    %189 = vector.broadcast %188 : f32 to vector<8x128xf32>
    %190 = arith.mulf %120, %189 : vector<8x128xf32>
    %191 = arith.addf %187, %190 : vector<8x128xf32>
    %c58 = arith.constant 58 : index
    %192 = memref.load %arg2[%c58] : memref<424xf32, #tpu.memory_space<smem>>
    %193 = vector.broadcast %192 : f32 to vector<8x128xf32>
    %194 = arith.addf %191, %193 : vector<8x128xf32>
    %195 = math.tanh %194 : vector<8x128xf32>
    %c42 = arith.constant 42 : index
    %196 = memref.load %arg2[%c42] : memref<424xf32, #tpu.memory_space<smem>>
    %197 = vector.broadcast %196 : f32 to vector<8x128xf32>
    %198 = arith.mulf %50, %197 : vector<8x128xf32>
    %c43 = arith.constant 43 : index
    %199 = memref.load %arg2[%c43] : memref<424xf32, #tpu.memory_space<smem>>
    %200 = vector.broadcast %199 : f32 to vector<8x128xf32>
    %201 = arith.mulf %85, %200 : vector<8x128xf32>
    %202 = arith.addf %198, %201 : vector<8x128xf32>
    %c44 = arith.constant 44 : index
    %203 = memref.load %arg2[%c44] : memref<424xf32, #tpu.memory_space<smem>>
    %204 = vector.broadcast %203 : f32 to vector<8x128xf32>
    %205 = arith.mulf %120, %204 : vector<8x128xf32>
    %206 = arith.addf %202, %205 : vector<8x128xf32>
    %c59 = arith.constant 59 : index
    %207 = memref.load %arg2[%c59] : memref<424xf32, #tpu.memory_space<smem>>
    %208 = vector.broadcast %207 : f32 to vector<8x128xf32>
    %209 = arith.addf %206, %208 : vector<8x128xf32>
    %210 = math.tanh %209 : vector<8x128xf32>
    %c45 = arith.constant 45 : index
    %211 = memref.load %arg2[%c45] : memref<424xf32, #tpu.memory_space<smem>>
    %212 = vector.broadcast %211 : f32 to vector<8x128xf32>
    %213 = arith.mulf %50, %212 : vector<8x128xf32>
    %c46 = arith.constant 46 : index
    %214 = memref.load %arg2[%c46] : memref<424xf32, #tpu.memory_space<smem>>
    %215 = vector.broadcast %214 : f32 to vector<8x128xf32>
    %216 = arith.mulf %85, %215 : vector<8x128xf32>
    %217 = arith.addf %213, %216 : vector<8x128xf32>
    %c47 = arith.constant 47 : index
    %218 = memref.load %arg2[%c47] : memref<424xf32, #tpu.memory_space<smem>>
    %219 = vector.broadcast %218 : f32 to vector<8x128xf32>
    %220 = arith.mulf %120, %219 : vector<8x128xf32>
    %221 = arith.addf %217, %220 : vector<8x128xf32>
    %c60 = arith.constant 60 : index
    %222 = memref.load %arg2[%c60] : memref<424xf32, #tpu.memory_space<smem>>
    %223 = vector.broadcast %222 : f32 to vector<8x128xf32>
    %224 = arith.addf %221, %223 : vector<8x128xf32>
    %225 = math.tanh %224 : vector<8x128xf32>
    %c48 = arith.constant 48 : index
    %226 = memref.load %arg2[%c48] : memref<424xf32, #tpu.memory_space<smem>>
    %227 = vector.broadcast %226 : f32 to vector<8x128xf32>
    %228 = arith.mulf %50, %227 : vector<8x128xf32>
    %c49 = arith.constant 49 : index
    %229 = memref.load %arg2[%c49] : memref<424xf32, #tpu.memory_space<smem>>
    %230 = vector.broadcast %229 : f32 to vector<8x128xf32>
    %231 = arith.mulf %85, %230 : vector<8x128xf32>
    %232 = arith.addf %228, %231 : vector<8x128xf32>
    %c50 = arith.constant 50 : index
    %233 = memref.load %arg2[%c50] : memref<424xf32, #tpu.memory_space<smem>>
    %234 = vector.broadcast %233 : f32 to vector<8x128xf32>
    %235 = arith.mulf %120, %234 : vector<8x128xf32>
    %236 = arith.addf %232, %235 : vector<8x128xf32>
    %c61 = arith.constant 61 : index
    %237 = memref.load %arg2[%c61] : memref<424xf32, #tpu.memory_space<smem>>
    %238 = vector.broadcast %237 : f32 to vector<8x128xf32>
    %239 = arith.addf %236, %238 : vector<8x128xf32>
    %240 = math.tanh %239 : vector<8x128xf32>
    %c51 = arith.constant 51 : index
    %241 = memref.load %arg2[%c51] : memref<424xf32, #tpu.memory_space<smem>>
    %242 = vector.broadcast %241 : f32 to vector<8x128xf32>
    %243 = arith.mulf %50, %242 : vector<8x128xf32>
    %c52 = arith.constant 52 : index
    %244 = memref.load %arg2[%c52] : memref<424xf32, #tpu.memory_space<smem>>
    %245 = vector.broadcast %244 : f32 to vector<8x128xf32>
    %246 = arith.mulf %85, %245 : vector<8x128xf32>
    %247 = arith.addf %243, %246 : vector<8x128xf32>
    %c53 = arith.constant 53 : index
    %248 = memref.load %arg2[%c53] : memref<424xf32, #tpu.memory_space<smem>>
    %249 = vector.broadcast %248 : f32 to vector<8x128xf32>
    %250 = arith.mulf %120, %249 : vector<8x128xf32>
    %251 = arith.addf %247, %250 : vector<8x128xf32>
    %c62 = arith.constant 62 : index
    %252 = memref.load %arg2[%c62] : memref<424xf32, #tpu.memory_space<smem>>
    %253 = vector.broadcast %252 : f32 to vector<8x128xf32>
    %254 = arith.addf %251, %253 : vector<8x128xf32>
    %255 = math.tanh %254 : vector<8x128xf32>
    %c63 = arith.constant 63 : index
    %256 = memref.load %arg2[%c63] : memref<424xf32, #tpu.memory_space<smem>>
    %257 = vector.broadcast %256 : f32 to vector<8x128xf32>
    %258 = arith.mulf %135, %257 : vector<8x128xf32>
    %c64 = arith.constant 64 : index
    %259 = memref.load %arg2[%c64] : memref<424xf32, #tpu.memory_space<smem>>
    %260 = vector.broadcast %259 : f32 to vector<8x128xf32>
    %261 = arith.mulf %150, %260 : vector<8x128xf32>
    %262 = arith.addf %258, %261 : vector<8x128xf32>
    %c65 = arith.constant 65 : index
    %263 = memref.load %arg2[%c65] : memref<424xf32, #tpu.memory_space<smem>>
    %264 = vector.broadcast %263 : f32 to vector<8x128xf32>
    %265 = arith.mulf %165, %264 : vector<8x128xf32>
    %266 = arith.addf %262, %265 : vector<8x128xf32>
    %c66 = arith.constant 66 : index
    %267 = memref.load %arg2[%c66] : memref<424xf32, #tpu.memory_space<smem>>
    %268 = vector.broadcast %267 : f32 to vector<8x128xf32>
    %269 = arith.mulf %180, %268 : vector<8x128xf32>
    %270 = arith.addf %266, %269 : vector<8x128xf32>
    %c67 = arith.constant 67 : index
    %271 = memref.load %arg2[%c67] : memref<424xf32, #tpu.memory_space<smem>>
    %272 = vector.broadcast %271 : f32 to vector<8x128xf32>
    %273 = arith.mulf %195, %272 : vector<8x128xf32>
    %274 = arith.addf %270, %273 : vector<8x128xf32>
    %c68 = arith.constant 68 : index
    %275 = memref.load %arg2[%c68] : memref<424xf32, #tpu.memory_space<smem>>
    %276 = vector.broadcast %275 : f32 to vector<8x128xf32>
    %277 = arith.mulf %210, %276 : vector<8x128xf32>
    %278 = arith.addf %274, %277 : vector<8x128xf32>
    %c69 = arith.constant 69 : index
    %279 = memref.load %arg2[%c69] : memref<424xf32, #tpu.memory_space<smem>>
    %280 = vector.broadcast %279 : f32 to vector<8x128xf32>
    %281 = arith.mulf %225, %280 : vector<8x128xf32>
    %282 = arith.addf %278, %281 : vector<8x128xf32>
    %c70 = arith.constant 70 : index
    %283 = memref.load %arg2[%c70] : memref<424xf32, #tpu.memory_space<smem>>
    %284 = vector.broadcast %283 : f32 to vector<8x128xf32>
    %285 = arith.mulf %240, %284 : vector<8x128xf32>
    %286 = arith.addf %282, %285 : vector<8x128xf32>
    %c71 = arith.constant 71 : index
    %287 = memref.load %arg2[%c71] : memref<424xf32, #tpu.memory_space<smem>>
    %288 = vector.broadcast %287 : f32 to vector<8x128xf32>
    %289 = arith.mulf %255, %288 : vector<8x128xf32>
    %290 = arith.addf %286, %289 : vector<8x128xf32>
    %c225 = arith.constant 225 : index
    %291 = memref.load %arg2[%c225] : memref<424xf32, #tpu.memory_space<smem>>
    %292 = vector.broadcast %291 : f32 to vector<8x128xf32>
    %293 = arith.addf %290, %292 : vector<8x128xf32>
    %294 = math.tanh %293 : vector<8x128xf32>
    %c72 = arith.constant 72 : index
    %295 = memref.load %arg2[%c72] : memref<424xf32, #tpu.memory_space<smem>>
    %296 = vector.broadcast %295 : f32 to vector<8x128xf32>
    %297 = arith.mulf %135, %296 : vector<8x128xf32>
    %c73 = arith.constant 73 : index
    %298 = memref.load %arg2[%c73] : memref<424xf32, #tpu.memory_space<smem>>
    %299 = vector.broadcast %298 : f32 to vector<8x128xf32>
    %300 = arith.mulf %150, %299 : vector<8x128xf32>
    %301 = arith.addf %297, %300 : vector<8x128xf32>
    %c74 = arith.constant 74 : index
    %302 = memref.load %arg2[%c74] : memref<424xf32, #tpu.memory_space<smem>>
    %303 = vector.broadcast %302 : f32 to vector<8x128xf32>
    %304 = arith.mulf %165, %303 : vector<8x128xf32>
    %305 = arith.addf %301, %304 : vector<8x128xf32>
    %c75 = arith.constant 75 : index
    %306 = memref.load %arg2[%c75] : memref<424xf32, #tpu.memory_space<smem>>
    %307 = vector.broadcast %306 : f32 to vector<8x128xf32>
    %308 = arith.mulf %180, %307 : vector<8x128xf32>
    %309 = arith.addf %305, %308 : vector<8x128xf32>
    %c76 = arith.constant 76 : index
    %310 = memref.load %arg2[%c76] : memref<424xf32, #tpu.memory_space<smem>>
    %311 = vector.broadcast %310 : f32 to vector<8x128xf32>
    %312 = arith.mulf %195, %311 : vector<8x128xf32>
    %313 = arith.addf %309, %312 : vector<8x128xf32>
    %c77 = arith.constant 77 : index
    %314 = memref.load %arg2[%c77] : memref<424xf32, #tpu.memory_space<smem>>
    %315 = vector.broadcast %314 : f32 to vector<8x128xf32>
    %316 = arith.mulf %210, %315 : vector<8x128xf32>
    %317 = arith.addf %313, %316 : vector<8x128xf32>
    %c78 = arith.constant 78 : index
    %318 = memref.load %arg2[%c78] : memref<424xf32, #tpu.memory_space<smem>>
    %319 = vector.broadcast %318 : f32 to vector<8x128xf32>
    %320 = arith.mulf %225, %319 : vector<8x128xf32>
    %321 = arith.addf %317, %320 : vector<8x128xf32>
    %c79 = arith.constant 79 : index
    %322 = memref.load %arg2[%c79] : memref<424xf32, #tpu.memory_space<smem>>
    %323 = vector.broadcast %322 : f32 to vector<8x128xf32>
    %324 = arith.mulf %240, %323 : vector<8x128xf32>
    %325 = arith.addf %321, %324 : vector<8x128xf32>
    %c80 = arith.constant 80 : index
    %326 = memref.load %arg2[%c80] : memref<424xf32, #tpu.memory_space<smem>>
    %327 = vector.broadcast %326 : f32 to vector<8x128xf32>
    %328 = arith.mulf %255, %327 : vector<8x128xf32>
    %329 = arith.addf %325, %328 : vector<8x128xf32>
    %c226 = arith.constant 226 : index
    %330 = memref.load %arg2[%c226] : memref<424xf32, #tpu.memory_space<smem>>
    %331 = vector.broadcast %330 : f32 to vector<8x128xf32>
    %332 = arith.addf %329, %331 : vector<8x128xf32>
    %333 = math.tanh %332 : vector<8x128xf32>
    %c81 = arith.constant 81 : index
    %334 = memref.load %arg2[%c81] : memref<424xf32, #tpu.memory_space<smem>>
    %335 = vector.broadcast %334 : f32 to vector<8x128xf32>
    %336 = arith.mulf %135, %335 : vector<8x128xf32>
    %c82 = arith.constant 82 : index
    %337 = memref.load %arg2[%c82] : memref<424xf32, #tpu.memory_space<smem>>
    %338 = vector.broadcast %337 : f32 to vector<8x128xf32>
    %339 = arith.mulf %150, %338 : vector<8x128xf32>
    %340 = arith.addf %336, %339 : vector<8x128xf32>
    %c83 = arith.constant 83 : index
    %341 = memref.load %arg2[%c83] : memref<424xf32, #tpu.memory_space<smem>>
    %342 = vector.broadcast %341 : f32 to vector<8x128xf32>
    %343 = arith.mulf %165, %342 : vector<8x128xf32>
    %344 = arith.addf %340, %343 : vector<8x128xf32>
    %c84 = arith.constant 84 : index
    %345 = memref.load %arg2[%c84] : memref<424xf32, #tpu.memory_space<smem>>
    %346 = vector.broadcast %345 : f32 to vector<8x128xf32>
    %347 = arith.mulf %180, %346 : vector<8x128xf32>
    %348 = arith.addf %344, %347 : vector<8x128xf32>
    %c85 = arith.constant 85 : index
    %349 = memref.load %arg2[%c85] : memref<424xf32, #tpu.memory_space<smem>>
    %350 = vector.broadcast %349 : f32 to vector<8x128xf32>
    %351 = arith.mulf %195, %350 : vector<8x128xf32>
    %352 = arith.addf %348, %351 : vector<8x128xf32>
    %c86 = arith.constant 86 : index
    %353 = memref.load %arg2[%c86] : memref<424xf32, #tpu.memory_space<smem>>
    %354 = vector.broadcast %353 : f32 to vector<8x128xf32>
    %355 = arith.mulf %210, %354 : vector<8x128xf32>
    %356 = arith.addf %352, %355 : vector<8x128xf32>
    %c87 = arith.constant 87 : index
    %357 = memref.load %arg2[%c87] : memref<424xf32, #tpu.memory_space<smem>>
    %358 = vector.broadcast %357 : f32 to vector<8x128xf32>
    %359 = arith.mulf %225, %358 : vector<8x128xf32>
    %360 = arith.addf %356, %359 : vector<8x128xf32>
    %c88 = arith.constant 88 : index
    %361 = memref.load %arg2[%c88] : memref<424xf32, #tpu.memory_space<smem>>
    %362 = vector.broadcast %361 : f32 to vector<8x128xf32>
    %363 = arith.mulf %240, %362 : vector<8x128xf32>
    %364 = arith.addf %360, %363 : vector<8x128xf32>
    %c89 = arith.constant 89 : index
    %365 = memref.load %arg2[%c89] : memref<424xf32, #tpu.memory_space<smem>>
    %366 = vector.broadcast %365 : f32 to vector<8x128xf32>
    %367 = arith.mulf %255, %366 : vector<8x128xf32>
    %368 = arith.addf %364, %367 : vector<8x128xf32>
    %c227 = arith.constant 227 : index
    %369 = memref.load %arg2[%c227] : memref<424xf32, #tpu.memory_space<smem>>
    %370 = vector.broadcast %369 : f32 to vector<8x128xf32>
    %371 = arith.addf %368, %370 : vector<8x128xf32>
    %372 = math.tanh %371 : vector<8x128xf32>
    %c90 = arith.constant 90 : index
    %373 = memref.load %arg2[%c90] : memref<424xf32, #tpu.memory_space<smem>>
    %374 = vector.broadcast %373 : f32 to vector<8x128xf32>
    %375 = arith.mulf %135, %374 : vector<8x128xf32>
    %c91 = arith.constant 91 : index
    %376 = memref.load %arg2[%c91] : memref<424xf32, #tpu.memory_space<smem>>
    %377 = vector.broadcast %376 : f32 to vector<8x128xf32>
    %378 = arith.mulf %150, %377 : vector<8x128xf32>
    %379 = arith.addf %375, %378 : vector<8x128xf32>
    %c92 = arith.constant 92 : index
    %380 = memref.load %arg2[%c92] : memref<424xf32, #tpu.memory_space<smem>>
    %381 = vector.broadcast %380 : f32 to vector<8x128xf32>
    %382 = arith.mulf %165, %381 : vector<8x128xf32>
    %383 = arith.addf %379, %382 : vector<8x128xf32>
    %c93 = arith.constant 93 : index
    %384 = memref.load %arg2[%c93] : memref<424xf32, #tpu.memory_space<smem>>
    %385 = vector.broadcast %384 : f32 to vector<8x128xf32>
    %386 = arith.mulf %180, %385 : vector<8x128xf32>
    %387 = arith.addf %383, %386 : vector<8x128xf32>
    %c94 = arith.constant 94 : index
    %388 = memref.load %arg2[%c94] : memref<424xf32, #tpu.memory_space<smem>>
    %389 = vector.broadcast %388 : f32 to vector<8x128xf32>
    %390 = arith.mulf %195, %389 : vector<8x128xf32>
    %391 = arith.addf %387, %390 : vector<8x128xf32>
    %c95 = arith.constant 95 : index
    %392 = memref.load %arg2[%c95] : memref<424xf32, #tpu.memory_space<smem>>
    %393 = vector.broadcast %392 : f32 to vector<8x128xf32>
    %394 = arith.mulf %210, %393 : vector<8x128xf32>
    %395 = arith.addf %391, %394 : vector<8x128xf32>
    %c96 = arith.constant 96 : index
    %396 = memref.load %arg2[%c96] : memref<424xf32, #tpu.memory_space<smem>>
    %397 = vector.broadcast %396 : f32 to vector<8x128xf32>
    %398 = arith.mulf %225, %397 : vector<8x128xf32>
    %399 = arith.addf %395, %398 : vector<8x128xf32>
    %c97 = arith.constant 97 : index
    %400 = memref.load %arg2[%c97] : memref<424xf32, #tpu.memory_space<smem>>
    %401 = vector.broadcast %400 : f32 to vector<8x128xf32>
    %402 = arith.mulf %240, %401 : vector<8x128xf32>
    %403 = arith.addf %399, %402 : vector<8x128xf32>
    %c98 = arith.constant 98 : index
    %404 = memref.load %arg2[%c98] : memref<424xf32, #tpu.memory_space<smem>>
    %405 = vector.broadcast %404 : f32 to vector<8x128xf32>
    %406 = arith.mulf %255, %405 : vector<8x128xf32>
    %407 = arith.addf %403, %406 : vector<8x128xf32>
    %c228 = arith.constant 228 : index
    %408 = memref.load %arg2[%c228] : memref<424xf32, #tpu.memory_space<smem>>
    %409 = vector.broadcast %408 : f32 to vector<8x128xf32>
    %410 = arith.addf %407, %409 : vector<8x128xf32>
    %411 = math.tanh %410 : vector<8x128xf32>
    %c99 = arith.constant 99 : index
    %412 = memref.load %arg2[%c99] : memref<424xf32, #tpu.memory_space<smem>>
    %413 = vector.broadcast %412 : f32 to vector<8x128xf32>
    %414 = arith.mulf %135, %413 : vector<8x128xf32>
    %c100 = arith.constant 100 : index
    %415 = memref.load %arg2[%c100] : memref<424xf32, #tpu.memory_space<smem>>
    %416 = vector.broadcast %415 : f32 to vector<8x128xf32>
    %417 = arith.mulf %150, %416 : vector<8x128xf32>
    %418 = arith.addf %414, %417 : vector<8x128xf32>
    %c101 = arith.constant 101 : index
    %419 = memref.load %arg2[%c101] : memref<424xf32, #tpu.memory_space<smem>>
    %420 = vector.broadcast %419 : f32 to vector<8x128xf32>
    %421 = arith.mulf %165, %420 : vector<8x128xf32>
    %422 = arith.addf %418, %421 : vector<8x128xf32>
    %c102 = arith.constant 102 : index
    %423 = memref.load %arg2[%c102] : memref<424xf32, #tpu.memory_space<smem>>
    %424 = vector.broadcast %423 : f32 to vector<8x128xf32>
    %425 = arith.mulf %180, %424 : vector<8x128xf32>
    %426 = arith.addf %422, %425 : vector<8x128xf32>
    %c103 = arith.constant 103 : index
    %427 = memref.load %arg2[%c103] : memref<424xf32, #tpu.memory_space<smem>>
    %428 = vector.broadcast %427 : f32 to vector<8x128xf32>
    %429 = arith.mulf %195, %428 : vector<8x128xf32>
    %430 = arith.addf %426, %429 : vector<8x128xf32>
    %c104 = arith.constant 104 : index
    %431 = memref.load %arg2[%c104] : memref<424xf32, #tpu.memory_space<smem>>
    %432 = vector.broadcast %431 : f32 to vector<8x128xf32>
    %433 = arith.mulf %210, %432 : vector<8x128xf32>
    %434 = arith.addf %430, %433 : vector<8x128xf32>
    %c105 = arith.constant 105 : index
    %435 = memref.load %arg2[%c105] : memref<424xf32, #tpu.memory_space<smem>>
    %436 = vector.broadcast %435 : f32 to vector<8x128xf32>
    %437 = arith.mulf %225, %436 : vector<8x128xf32>
    %438 = arith.addf %434, %437 : vector<8x128xf32>
    %c106 = arith.constant 106 : index
    %439 = memref.load %arg2[%c106] : memref<424xf32, #tpu.memory_space<smem>>
    %440 = vector.broadcast %439 : f32 to vector<8x128xf32>
    %441 = arith.mulf %240, %440 : vector<8x128xf32>
    %442 = arith.addf %438, %441 : vector<8x128xf32>
    %c107 = arith.constant 107 : index
    %443 = memref.load %arg2[%c107] : memref<424xf32, #tpu.memory_space<smem>>
    %444 = vector.broadcast %443 : f32 to vector<8x128xf32>
    %445 = arith.mulf %255, %444 : vector<8x128xf32>
    %446 = arith.addf %442, %445 : vector<8x128xf32>
    %c229 = arith.constant 229 : index
    %447 = memref.load %arg2[%c229] : memref<424xf32, #tpu.memory_space<smem>>
    %448 = vector.broadcast %447 : f32 to vector<8x128xf32>
    %449 = arith.addf %446, %448 : vector<8x128xf32>
    %450 = math.tanh %449 : vector<8x128xf32>
    %c108 = arith.constant 108 : index
    %451 = memref.load %arg2[%c108] : memref<424xf32, #tpu.memory_space<smem>>
    %452 = vector.broadcast %451 : f32 to vector<8x128xf32>
    %453 = arith.mulf %135, %452 : vector<8x128xf32>
    %c109 = arith.constant 109 : index
    %454 = memref.load %arg2[%c109] : memref<424xf32, #tpu.memory_space<smem>>
    %455 = vector.broadcast %454 : f32 to vector<8x128xf32>
    %456 = arith.mulf %150, %455 : vector<8x128xf32>
    %457 = arith.addf %453, %456 : vector<8x128xf32>
    %c110 = arith.constant 110 : index
    %458 = memref.load %arg2[%c110] : memref<424xf32, #tpu.memory_space<smem>>
    %459 = vector.broadcast %458 : f32 to vector<8x128xf32>
    %460 = arith.mulf %165, %459 : vector<8x128xf32>
    %461 = arith.addf %457, %460 : vector<8x128xf32>
    %c111 = arith.constant 111 : index
    %462 = memref.load %arg2[%c111] : memref<424xf32, #tpu.memory_space<smem>>
    %463 = vector.broadcast %462 : f32 to vector<8x128xf32>
    %464 = arith.mulf %180, %463 : vector<8x128xf32>
    %465 = arith.addf %461, %464 : vector<8x128xf32>
    %c112 = arith.constant 112 : index
    %466 = memref.load %arg2[%c112] : memref<424xf32, #tpu.memory_space<smem>>
    %467 = vector.broadcast %466 : f32 to vector<8x128xf32>
    %468 = arith.mulf %195, %467 : vector<8x128xf32>
    %469 = arith.addf %465, %468 : vector<8x128xf32>
    %c113 = arith.constant 113 : index
    %470 = memref.load %arg2[%c113] : memref<424xf32, #tpu.memory_space<smem>>
    %471 = vector.broadcast %470 : f32 to vector<8x128xf32>
    %472 = arith.mulf %210, %471 : vector<8x128xf32>
    %473 = arith.addf %469, %472 : vector<8x128xf32>
    %c114 = arith.constant 114 : index
    %474 = memref.load %arg2[%c114] : memref<424xf32, #tpu.memory_space<smem>>
    %475 = vector.broadcast %474 : f32 to vector<8x128xf32>
    %476 = arith.mulf %225, %475 : vector<8x128xf32>
    %477 = arith.addf %473, %476 : vector<8x128xf32>
    %c115 = arith.constant 115 : index
    %478 = memref.load %arg2[%c115] : memref<424xf32, #tpu.memory_space<smem>>
    %479 = vector.broadcast %478 : f32 to vector<8x128xf32>
    %480 = arith.mulf %240, %479 : vector<8x128xf32>
    %481 = arith.addf %477, %480 : vector<8x128xf32>
    %c116 = arith.constant 116 : index
    %482 = memref.load %arg2[%c116] : memref<424xf32, #tpu.memory_space<smem>>
    %483 = vector.broadcast %482 : f32 to vector<8x128xf32>
    %484 = arith.mulf %255, %483 : vector<8x128xf32>
    %485 = arith.addf %481, %484 : vector<8x128xf32>
    %c230 = arith.constant 230 : index
    %486 = memref.load %arg2[%c230] : memref<424xf32, #tpu.memory_space<smem>>
    %487 = vector.broadcast %486 : f32 to vector<8x128xf32>
    %488 = arith.addf %485, %487 : vector<8x128xf32>
    %489 = math.tanh %488 : vector<8x128xf32>
    %c117 = arith.constant 117 : index
    %490 = memref.load %arg2[%c117] : memref<424xf32, #tpu.memory_space<smem>>
    %491 = vector.broadcast %490 : f32 to vector<8x128xf32>
    %492 = arith.mulf %135, %491 : vector<8x128xf32>
    %c118 = arith.constant 118 : index
    %493 = memref.load %arg2[%c118] : memref<424xf32, #tpu.memory_space<smem>>
    %494 = vector.broadcast %493 : f32 to vector<8x128xf32>
    %495 = arith.mulf %150, %494 : vector<8x128xf32>
    %496 = arith.addf %492, %495 : vector<8x128xf32>
    %c119 = arith.constant 119 : index
    %497 = memref.load %arg2[%c119] : memref<424xf32, #tpu.memory_space<smem>>
    %498 = vector.broadcast %497 : f32 to vector<8x128xf32>
    %499 = arith.mulf %165, %498 : vector<8x128xf32>
    %500 = arith.addf %496, %499 : vector<8x128xf32>
    %c120 = arith.constant 120 : index
    %501 = memref.load %arg2[%c120] : memref<424xf32, #tpu.memory_space<smem>>
    %502 = vector.broadcast %501 : f32 to vector<8x128xf32>
    %503 = arith.mulf %180, %502 : vector<8x128xf32>
    %504 = arith.addf %500, %503 : vector<8x128xf32>
    %c121 = arith.constant 121 : index
    %505 = memref.load %arg2[%c121] : memref<424xf32, #tpu.memory_space<smem>>
    %506 = vector.broadcast %505 : f32 to vector<8x128xf32>
    %507 = arith.mulf %195, %506 : vector<8x128xf32>
    %508 = arith.addf %504, %507 : vector<8x128xf32>
    %c122 = arith.constant 122 : index
    %509 = memref.load %arg2[%c122] : memref<424xf32, #tpu.memory_space<smem>>
    %510 = vector.broadcast %509 : f32 to vector<8x128xf32>
    %511 = arith.mulf %210, %510 : vector<8x128xf32>
    %512 = arith.addf %508, %511 : vector<8x128xf32>
    %c123 = arith.constant 123 : index
    %513 = memref.load %arg2[%c123] : memref<424xf32, #tpu.memory_space<smem>>
    %514 = vector.broadcast %513 : f32 to vector<8x128xf32>
    %515 = arith.mulf %225, %514 : vector<8x128xf32>
    %516 = arith.addf %512, %515 : vector<8x128xf32>
    %c124 = arith.constant 124 : index
    %517 = memref.load %arg2[%c124] : memref<424xf32, #tpu.memory_space<smem>>
    %518 = vector.broadcast %517 : f32 to vector<8x128xf32>
    %519 = arith.mulf %240, %518 : vector<8x128xf32>
    %520 = arith.addf %516, %519 : vector<8x128xf32>
    %c125 = arith.constant 125 : index
    %521 = memref.load %arg2[%c125] : memref<424xf32, #tpu.memory_space<smem>>
    %522 = vector.broadcast %521 : f32 to vector<8x128xf32>
    %523 = arith.mulf %255, %522 : vector<8x128xf32>
    %524 = arith.addf %520, %523 : vector<8x128xf32>
    %c231 = arith.constant 231 : index
    %525 = memref.load %arg2[%c231] : memref<424xf32, #tpu.memory_space<smem>>
    %526 = vector.broadcast %525 : f32 to vector<8x128xf32>
    %527 = arith.addf %524, %526 : vector<8x128xf32>
    %528 = math.tanh %527 : vector<8x128xf32>
    %c126 = arith.constant 126 : index
    %529 = memref.load %arg2[%c126] : memref<424xf32, #tpu.memory_space<smem>>
    %530 = vector.broadcast %529 : f32 to vector<8x128xf32>
    %531 = arith.mulf %135, %530 : vector<8x128xf32>
    %c127 = arith.constant 127 : index
    %532 = memref.load %arg2[%c127] : memref<424xf32, #tpu.memory_space<smem>>
    %533 = vector.broadcast %532 : f32 to vector<8x128xf32>
    %534 = arith.mulf %150, %533 : vector<8x128xf32>
    %535 = arith.addf %531, %534 : vector<8x128xf32>
    %c128 = arith.constant 128 : index
    %536 = memref.load %arg2[%c128] : memref<424xf32, #tpu.memory_space<smem>>
    %537 = vector.broadcast %536 : f32 to vector<8x128xf32>
    %538 = arith.mulf %165, %537 : vector<8x128xf32>
    %539 = arith.addf %535, %538 : vector<8x128xf32>
    %c129 = arith.constant 129 : index
    %540 = memref.load %arg2[%c129] : memref<424xf32, #tpu.memory_space<smem>>
    %541 = vector.broadcast %540 : f32 to vector<8x128xf32>
    %542 = arith.mulf %180, %541 : vector<8x128xf32>
    %543 = arith.addf %539, %542 : vector<8x128xf32>
    %c130 = arith.constant 130 : index
    %544 = memref.load %arg2[%c130] : memref<424xf32, #tpu.memory_space<smem>>
    %545 = vector.broadcast %544 : f32 to vector<8x128xf32>
    %546 = arith.mulf %195, %545 : vector<8x128xf32>
    %547 = arith.addf %543, %546 : vector<8x128xf32>
    %c131 = arith.constant 131 : index
    %548 = memref.load %arg2[%c131] : memref<424xf32, #tpu.memory_space<smem>>
    %549 = vector.broadcast %548 : f32 to vector<8x128xf32>
    %550 = arith.mulf %210, %549 : vector<8x128xf32>
    %551 = arith.addf %547, %550 : vector<8x128xf32>
    %c132 = arith.constant 132 : index
    %552 = memref.load %arg2[%c132] : memref<424xf32, #tpu.memory_space<smem>>
    %553 = vector.broadcast %552 : f32 to vector<8x128xf32>
    %554 = arith.mulf %225, %553 : vector<8x128xf32>
    %555 = arith.addf %551, %554 : vector<8x128xf32>
    %c133 = arith.constant 133 : index
    %556 = memref.load %arg2[%c133] : memref<424xf32, #tpu.memory_space<smem>>
    %557 = vector.broadcast %556 : f32 to vector<8x128xf32>
    %558 = arith.mulf %240, %557 : vector<8x128xf32>
    %559 = arith.addf %555, %558 : vector<8x128xf32>
    %c134 = arith.constant 134 : index
    %560 = memref.load %arg2[%c134] : memref<424xf32, #tpu.memory_space<smem>>
    %561 = vector.broadcast %560 : f32 to vector<8x128xf32>
    %562 = arith.mulf %255, %561 : vector<8x128xf32>
    %563 = arith.addf %559, %562 : vector<8x128xf32>
    %c232 = arith.constant 232 : index
    %564 = memref.load %arg2[%c232] : memref<424xf32, #tpu.memory_space<smem>>
    %565 = vector.broadcast %564 : f32 to vector<8x128xf32>
    %566 = arith.addf %563, %565 : vector<8x128xf32>
    %567 = math.tanh %566 : vector<8x128xf32>
    %c135 = arith.constant 135 : index
    %568 = memref.load %arg2[%c135] : memref<424xf32, #tpu.memory_space<smem>>
    %569 = vector.broadcast %568 : f32 to vector<8x128xf32>
    %570 = arith.mulf %135, %569 : vector<8x128xf32>
    %c136 = arith.constant 136 : index
    %571 = memref.load %arg2[%c136] : memref<424xf32, #tpu.memory_space<smem>>
    %572 = vector.broadcast %571 : f32 to vector<8x128xf32>
    %573 = arith.mulf %150, %572 : vector<8x128xf32>
    %574 = arith.addf %570, %573 : vector<8x128xf32>
    %c137 = arith.constant 137 : index
    %575 = memref.load %arg2[%c137] : memref<424xf32, #tpu.memory_space<smem>>
    %576 = vector.broadcast %575 : f32 to vector<8x128xf32>
    %577 = arith.mulf %165, %576 : vector<8x128xf32>
    %578 = arith.addf %574, %577 : vector<8x128xf32>
    %c138 = arith.constant 138 : index
    %579 = memref.load %arg2[%c138] : memref<424xf32, #tpu.memory_space<smem>>
    %580 = vector.broadcast %579 : f32 to vector<8x128xf32>
    %581 = arith.mulf %180, %580 : vector<8x128xf32>
    %582 = arith.addf %578, %581 : vector<8x128xf32>
    %c139 = arith.constant 139 : index
    %583 = memref.load %arg2[%c139] : memref<424xf32, #tpu.memory_space<smem>>
    %584 = vector.broadcast %583 : f32 to vector<8x128xf32>
    %585 = arith.mulf %195, %584 : vector<8x128xf32>
    %586 = arith.addf %582, %585 : vector<8x128xf32>
    %c140 = arith.constant 140 : index
    %587 = memref.load %arg2[%c140] : memref<424xf32, #tpu.memory_space<smem>>
    %588 = vector.broadcast %587 : f32 to vector<8x128xf32>
    %589 = arith.mulf %210, %588 : vector<8x128xf32>
    %590 = arith.addf %586, %589 : vector<8x128xf32>
    %c141 = arith.constant 141 : index
    %591 = memref.load %arg2[%c141] : memref<424xf32, #tpu.memory_space<smem>>
    %592 = vector.broadcast %591 : f32 to vector<8x128xf32>
    %593 = arith.mulf %225, %592 : vector<8x128xf32>
    %594 = arith.addf %590, %593 : vector<8x128xf32>
    %c142 = arith.constant 142 : index
    %595 = memref.load %arg2[%c142] : memref<424xf32, #tpu.memory_space<smem>>
    %596 = vector.broadcast %595 : f32 to vector<8x128xf32>
    %597 = arith.mulf %240, %596 : vector<8x128xf32>
    %598 = arith.addf %594, %597 : vector<8x128xf32>
    %c143 = arith.constant 143 : index
    %599 = memref.load %arg2[%c143] : memref<424xf32, #tpu.memory_space<smem>>
    %600 = vector.broadcast %599 : f32 to vector<8x128xf32>
    %601 = arith.mulf %255, %600 : vector<8x128xf32>
    %602 = arith.addf %598, %601 : vector<8x128xf32>
    %c233 = arith.constant 233 : index
    %603 = memref.load %arg2[%c233] : memref<424xf32, #tpu.memory_space<smem>>
    %604 = vector.broadcast %603 : f32 to vector<8x128xf32>
    %605 = arith.addf %602, %604 : vector<8x128xf32>
    %606 = math.tanh %605 : vector<8x128xf32>
    %c144 = arith.constant 144 : index
    %607 = memref.load %arg2[%c144] : memref<424xf32, #tpu.memory_space<smem>>
    %608 = vector.broadcast %607 : f32 to vector<8x128xf32>
    %609 = arith.mulf %135, %608 : vector<8x128xf32>
    %c145 = arith.constant 145 : index
    %610 = memref.load %arg2[%c145] : memref<424xf32, #tpu.memory_space<smem>>
    %611 = vector.broadcast %610 : f32 to vector<8x128xf32>
    %612 = arith.mulf %150, %611 : vector<8x128xf32>
    %613 = arith.addf %609, %612 : vector<8x128xf32>
    %c146 = arith.constant 146 : index
    %614 = memref.load %arg2[%c146] : memref<424xf32, #tpu.memory_space<smem>>
    %615 = vector.broadcast %614 : f32 to vector<8x128xf32>
    %616 = arith.mulf %165, %615 : vector<8x128xf32>
    %617 = arith.addf %613, %616 : vector<8x128xf32>
    %c147 = arith.constant 147 : index
    %618 = memref.load %arg2[%c147] : memref<424xf32, #tpu.memory_space<smem>>
    %619 = vector.broadcast %618 : f32 to vector<8x128xf32>
    %620 = arith.mulf %180, %619 : vector<8x128xf32>
    %621 = arith.addf %617, %620 : vector<8x128xf32>
    %c148 = arith.constant 148 : index
    %622 = memref.load %arg2[%c148] : memref<424xf32, #tpu.memory_space<smem>>
    %623 = vector.broadcast %622 : f32 to vector<8x128xf32>
    %624 = arith.mulf %195, %623 : vector<8x128xf32>
    %625 = arith.addf %621, %624 : vector<8x128xf32>
    %c149 = arith.constant 149 : index
    %626 = memref.load %arg2[%c149] : memref<424xf32, #tpu.memory_space<smem>>
    %627 = vector.broadcast %626 : f32 to vector<8x128xf32>
    %628 = arith.mulf %210, %627 : vector<8x128xf32>
    %629 = arith.addf %625, %628 : vector<8x128xf32>
    %c150 = arith.constant 150 : index
    %630 = memref.load %arg2[%c150] : memref<424xf32, #tpu.memory_space<smem>>
    %631 = vector.broadcast %630 : f32 to vector<8x128xf32>
    %632 = arith.mulf %225, %631 : vector<8x128xf32>
    %633 = arith.addf %629, %632 : vector<8x128xf32>
    %c151 = arith.constant 151 : index
    %634 = memref.load %arg2[%c151] : memref<424xf32, #tpu.memory_space<smem>>
    %635 = vector.broadcast %634 : f32 to vector<8x128xf32>
    %636 = arith.mulf %240, %635 : vector<8x128xf32>
    %637 = arith.addf %633, %636 : vector<8x128xf32>
    %c152 = arith.constant 152 : index
    %638 = memref.load %arg2[%c152] : memref<424xf32, #tpu.memory_space<smem>>
    %639 = vector.broadcast %638 : f32 to vector<8x128xf32>
    %640 = arith.mulf %255, %639 : vector<8x128xf32>
    %641 = arith.addf %637, %640 : vector<8x128xf32>
    %c234 = arith.constant 234 : index
    %642 = memref.load %arg2[%c234] : memref<424xf32, #tpu.memory_space<smem>>
    %643 = vector.broadcast %642 : f32 to vector<8x128xf32>
    %644 = arith.addf %641, %643 : vector<8x128xf32>
    %645 = math.tanh %644 : vector<8x128xf32>
    %c153 = arith.constant 153 : index
    %646 = memref.load %arg2[%c153] : memref<424xf32, #tpu.memory_space<smem>>
    %647 = vector.broadcast %646 : f32 to vector<8x128xf32>
    %648 = arith.mulf %135, %647 : vector<8x128xf32>
    %c154 = arith.constant 154 : index
    %649 = memref.load %arg2[%c154] : memref<424xf32, #tpu.memory_space<smem>>
    %650 = vector.broadcast %649 : f32 to vector<8x128xf32>
    %651 = arith.mulf %150, %650 : vector<8x128xf32>
    %652 = arith.addf %648, %651 : vector<8x128xf32>
    %c155 = arith.constant 155 : index
    %653 = memref.load %arg2[%c155] : memref<424xf32, #tpu.memory_space<smem>>
    %654 = vector.broadcast %653 : f32 to vector<8x128xf32>
    %655 = arith.mulf %165, %654 : vector<8x128xf32>
    %656 = arith.addf %652, %655 : vector<8x128xf32>
    %c156 = arith.constant 156 : index
    %657 = memref.load %arg2[%c156] : memref<424xf32, #tpu.memory_space<smem>>
    %658 = vector.broadcast %657 : f32 to vector<8x128xf32>
    %659 = arith.mulf %180, %658 : vector<8x128xf32>
    %660 = arith.addf %656, %659 : vector<8x128xf32>
    %c157 = arith.constant 157 : index
    %661 = memref.load %arg2[%c157] : memref<424xf32, #tpu.memory_space<smem>>
    %662 = vector.broadcast %661 : f32 to vector<8x128xf32>
    %663 = arith.mulf %195, %662 : vector<8x128xf32>
    %664 = arith.addf %660, %663 : vector<8x128xf32>
    %c158 = arith.constant 158 : index
    %665 = memref.load %arg2[%c158] : memref<424xf32, #tpu.memory_space<smem>>
    %666 = vector.broadcast %665 : f32 to vector<8x128xf32>
    %667 = arith.mulf %210, %666 : vector<8x128xf32>
    %668 = arith.addf %664, %667 : vector<8x128xf32>
    %c159 = arith.constant 159 : index
    %669 = memref.load %arg2[%c159] : memref<424xf32, #tpu.memory_space<smem>>
    %670 = vector.broadcast %669 : f32 to vector<8x128xf32>
    %671 = arith.mulf %225, %670 : vector<8x128xf32>
    %672 = arith.addf %668, %671 : vector<8x128xf32>
    %c160 = arith.constant 160 : index
    %673 = memref.load %arg2[%c160] : memref<424xf32, #tpu.memory_space<smem>>
    %674 = vector.broadcast %673 : f32 to vector<8x128xf32>
    %675 = arith.mulf %240, %674 : vector<8x128xf32>
    %676 = arith.addf %672, %675 : vector<8x128xf32>
    %c161 = arith.constant 161 : index
    %677 = memref.load %arg2[%c161] : memref<424xf32, #tpu.memory_space<smem>>
    %678 = vector.broadcast %677 : f32 to vector<8x128xf32>
    %679 = arith.mulf %255, %678 : vector<8x128xf32>
    %680 = arith.addf %676, %679 : vector<8x128xf32>
    %c235 = arith.constant 235 : index
    %681 = memref.load %arg2[%c235] : memref<424xf32, #tpu.memory_space<smem>>
    %682 = vector.broadcast %681 : f32 to vector<8x128xf32>
    %683 = arith.addf %680, %682 : vector<8x128xf32>
    %684 = math.tanh %683 : vector<8x128xf32>
    %c162 = arith.constant 162 : index
    %685 = memref.load %arg2[%c162] : memref<424xf32, #tpu.memory_space<smem>>
    %686 = vector.broadcast %685 : f32 to vector<8x128xf32>
    %687 = arith.mulf %135, %686 : vector<8x128xf32>
    %c163 = arith.constant 163 : index
    %688 = memref.load %arg2[%c163] : memref<424xf32, #tpu.memory_space<smem>>
    %689 = vector.broadcast %688 : f32 to vector<8x128xf32>
    %690 = arith.mulf %150, %689 : vector<8x128xf32>
    %691 = arith.addf %687, %690 : vector<8x128xf32>
    %c164 = arith.constant 164 : index
    %692 = memref.load %arg2[%c164] : memref<424xf32, #tpu.memory_space<smem>>
    %693 = vector.broadcast %692 : f32 to vector<8x128xf32>
    %694 = arith.mulf %165, %693 : vector<8x128xf32>
    %695 = arith.addf %691, %694 : vector<8x128xf32>
    %c165 = arith.constant 165 : index
    %696 = memref.load %arg2[%c165] : memref<424xf32, #tpu.memory_space<smem>>
    %697 = vector.broadcast %696 : f32 to vector<8x128xf32>
    %698 = arith.mulf %180, %697 : vector<8x128xf32>
    %699 = arith.addf %695, %698 : vector<8x128xf32>
    %c166 = arith.constant 166 : index
    %700 = memref.load %arg2[%c166] : memref<424xf32, #tpu.memory_space<smem>>
    %701 = vector.broadcast %700 : f32 to vector<8x128xf32>
    %702 = arith.mulf %195, %701 : vector<8x128xf32>
    %703 = arith.addf %699, %702 : vector<8x128xf32>
    %c167 = arith.constant 167 : index
    %704 = memref.load %arg2[%c167] : memref<424xf32, #tpu.memory_space<smem>>
    %705 = vector.broadcast %704 : f32 to vector<8x128xf32>
    %706 = arith.mulf %210, %705 : vector<8x128xf32>
    %707 = arith.addf %703, %706 : vector<8x128xf32>
    %c168 = arith.constant 168 : index
    %708 = memref.load %arg2[%c168] : memref<424xf32, #tpu.memory_space<smem>>
    %709 = vector.broadcast %708 : f32 to vector<8x128xf32>
    %710 = arith.mulf %225, %709 : vector<8x128xf32>
    %711 = arith.addf %707, %710 : vector<8x128xf32>
    %c169 = arith.constant 169 : index
    %712 = memref.load %arg2[%c169] : memref<424xf32, #tpu.memory_space<smem>>
    %713 = vector.broadcast %712 : f32 to vector<8x128xf32>
    %714 = arith.mulf %240, %713 : vector<8x128xf32>
    %715 = arith.addf %711, %714 : vector<8x128xf32>
    %c170 = arith.constant 170 : index
    %716 = memref.load %arg2[%c170] : memref<424xf32, #tpu.memory_space<smem>>
    %717 = vector.broadcast %716 : f32 to vector<8x128xf32>
    %718 = arith.mulf %255, %717 : vector<8x128xf32>
    %719 = arith.addf %715, %718 : vector<8x128xf32>
    %c236 = arith.constant 236 : index
    %720 = memref.load %arg2[%c236] : memref<424xf32, #tpu.memory_space<smem>>
    %721 = vector.broadcast %720 : f32 to vector<8x128xf32>
    %722 = arith.addf %719, %721 : vector<8x128xf32>
    %723 = math.tanh %722 : vector<8x128xf32>
    %c171 = arith.constant 171 : index
    %724 = memref.load %arg2[%c171] : memref<424xf32, #tpu.memory_space<smem>>
    %725 = vector.broadcast %724 : f32 to vector<8x128xf32>
    %726 = arith.mulf %135, %725 : vector<8x128xf32>
    %c172 = arith.constant 172 : index
    %727 = memref.load %arg2[%c172] : memref<424xf32, #tpu.memory_space<smem>>
    %728 = vector.broadcast %727 : f32 to vector<8x128xf32>
    %729 = arith.mulf %150, %728 : vector<8x128xf32>
    %730 = arith.addf %726, %729 : vector<8x128xf32>
    %c173 = arith.constant 173 : index
    %731 = memref.load %arg2[%c173] : memref<424xf32, #tpu.memory_space<smem>>
    %732 = vector.broadcast %731 : f32 to vector<8x128xf32>
    %733 = arith.mulf %165, %732 : vector<8x128xf32>
    %734 = arith.addf %730, %733 : vector<8x128xf32>
    %c174 = arith.constant 174 : index
    %735 = memref.load %arg2[%c174] : memref<424xf32, #tpu.memory_space<smem>>
    %736 = vector.broadcast %735 : f32 to vector<8x128xf32>
    %737 = arith.mulf %180, %736 : vector<8x128xf32>
    %738 = arith.addf %734, %737 : vector<8x128xf32>
    %c175 = arith.constant 175 : index
    %739 = memref.load %arg2[%c175] : memref<424xf32, #tpu.memory_space<smem>>
    %740 = vector.broadcast %739 : f32 to vector<8x128xf32>
    %741 = arith.mulf %195, %740 : vector<8x128xf32>
    %742 = arith.addf %738, %741 : vector<8x128xf32>
    %c176 = arith.constant 176 : index
    %743 = memref.load %arg2[%c176] : memref<424xf32, #tpu.memory_space<smem>>
    %744 = vector.broadcast %743 : f32 to vector<8x128xf32>
    %745 = arith.mulf %210, %744 : vector<8x128xf32>
    %746 = arith.addf %742, %745 : vector<8x128xf32>
    %c177 = arith.constant 177 : index
    %747 = memref.load %arg2[%c177] : memref<424xf32, #tpu.memory_space<smem>>
    %748 = vector.broadcast %747 : f32 to vector<8x128xf32>
    %749 = arith.mulf %225, %748 : vector<8x128xf32>
    %750 = arith.addf %746, %749 : vector<8x128xf32>
    %c178 = arith.constant 178 : index
    %751 = memref.load %arg2[%c178] : memref<424xf32, #tpu.memory_space<smem>>
    %752 = vector.broadcast %751 : f32 to vector<8x128xf32>
    %753 = arith.mulf %240, %752 : vector<8x128xf32>
    %754 = arith.addf %750, %753 : vector<8x128xf32>
    %c179 = arith.constant 179 : index
    %755 = memref.load %arg2[%c179] : memref<424xf32, #tpu.memory_space<smem>>
    %756 = vector.broadcast %755 : f32 to vector<8x128xf32>
    %757 = arith.mulf %255, %756 : vector<8x128xf32>
    %758 = arith.addf %754, %757 : vector<8x128xf32>
    %c237 = arith.constant 237 : index
    %759 = memref.load %arg2[%c237] : memref<424xf32, #tpu.memory_space<smem>>
    %760 = vector.broadcast %759 : f32 to vector<8x128xf32>
    %761 = arith.addf %758, %760 : vector<8x128xf32>
    %762 = math.tanh %761 : vector<8x128xf32>
    %c180 = arith.constant 180 : index
    %763 = memref.load %arg2[%c180] : memref<424xf32, #tpu.memory_space<smem>>
    %764 = vector.broadcast %763 : f32 to vector<8x128xf32>
    %765 = arith.mulf %135, %764 : vector<8x128xf32>
    %c181 = arith.constant 181 : index
    %766 = memref.load %arg2[%c181] : memref<424xf32, #tpu.memory_space<smem>>
    %767 = vector.broadcast %766 : f32 to vector<8x128xf32>
    %768 = arith.mulf %150, %767 : vector<8x128xf32>
    %769 = arith.addf %765, %768 : vector<8x128xf32>
    %c182 = arith.constant 182 : index
    %770 = memref.load %arg2[%c182] : memref<424xf32, #tpu.memory_space<smem>>
    %771 = vector.broadcast %770 : f32 to vector<8x128xf32>
    %772 = arith.mulf %165, %771 : vector<8x128xf32>
    %773 = arith.addf %769, %772 : vector<8x128xf32>
    %c183 = arith.constant 183 : index
    %774 = memref.load %arg2[%c183] : memref<424xf32, #tpu.memory_space<smem>>
    %775 = vector.broadcast %774 : f32 to vector<8x128xf32>
    %776 = arith.mulf %180, %775 : vector<8x128xf32>
    %777 = arith.addf %773, %776 : vector<8x128xf32>
    %c184 = arith.constant 184 : index
    %778 = memref.load %arg2[%c184] : memref<424xf32, #tpu.memory_space<smem>>
    %779 = vector.broadcast %778 : f32 to vector<8x128xf32>
    %780 = arith.mulf %195, %779 : vector<8x128xf32>
    %781 = arith.addf %777, %780 : vector<8x128xf32>
    %c185 = arith.constant 185 : index
    %782 = memref.load %arg2[%c185] : memref<424xf32, #tpu.memory_space<smem>>
    %783 = vector.broadcast %782 : f32 to vector<8x128xf32>
    %784 = arith.mulf %210, %783 : vector<8x128xf32>
    %785 = arith.addf %781, %784 : vector<8x128xf32>
    %c186 = arith.constant 186 : index
    %786 = memref.load %arg2[%c186] : memref<424xf32, #tpu.memory_space<smem>>
    %787 = vector.broadcast %786 : f32 to vector<8x128xf32>
    %788 = arith.mulf %225, %787 : vector<8x128xf32>
    %789 = arith.addf %785, %788 : vector<8x128xf32>
    %c187 = arith.constant 187 : index
    %790 = memref.load %arg2[%c187] : memref<424xf32, #tpu.memory_space<smem>>
    %791 = vector.broadcast %790 : f32 to vector<8x128xf32>
    %792 = arith.mulf %240, %791 : vector<8x128xf32>
    %793 = arith.addf %789, %792 : vector<8x128xf32>
    %c188 = arith.constant 188 : index
    %794 = memref.load %arg2[%c188] : memref<424xf32, #tpu.memory_space<smem>>
    %795 = vector.broadcast %794 : f32 to vector<8x128xf32>
    %796 = arith.mulf %255, %795 : vector<8x128xf32>
    %797 = arith.addf %793, %796 : vector<8x128xf32>
    %c238 = arith.constant 238 : index
    %798 = memref.load %arg2[%c238] : memref<424xf32, #tpu.memory_space<smem>>
    %799 = vector.broadcast %798 : f32 to vector<8x128xf32>
    %800 = arith.addf %797, %799 : vector<8x128xf32>
    %801 = math.tanh %800 : vector<8x128xf32>
    %c189 = arith.constant 189 : index
    %802 = memref.load %arg2[%c189] : memref<424xf32, #tpu.memory_space<smem>>
    %803 = vector.broadcast %802 : f32 to vector<8x128xf32>
    %804 = arith.mulf %135, %803 : vector<8x128xf32>
    %c190 = arith.constant 190 : index
    %805 = memref.load %arg2[%c190] : memref<424xf32, #tpu.memory_space<smem>>
    %806 = vector.broadcast %805 : f32 to vector<8x128xf32>
    %807 = arith.mulf %150, %806 : vector<8x128xf32>
    %808 = arith.addf %804, %807 : vector<8x128xf32>
    %c191 = arith.constant 191 : index
    %809 = memref.load %arg2[%c191] : memref<424xf32, #tpu.memory_space<smem>>
    %810 = vector.broadcast %809 : f32 to vector<8x128xf32>
    %811 = arith.mulf %165, %810 : vector<8x128xf32>
    %812 = arith.addf %808, %811 : vector<8x128xf32>
    %c192 = arith.constant 192 : index
    %813 = memref.load %arg2[%c192] : memref<424xf32, #tpu.memory_space<smem>>
    %814 = vector.broadcast %813 : f32 to vector<8x128xf32>
    %815 = arith.mulf %180, %814 : vector<8x128xf32>
    %816 = arith.addf %812, %815 : vector<8x128xf32>
    %c193 = arith.constant 193 : index
    %817 = memref.load %arg2[%c193] : memref<424xf32, #tpu.memory_space<smem>>
    %818 = vector.broadcast %817 : f32 to vector<8x128xf32>
    %819 = arith.mulf %195, %818 : vector<8x128xf32>
    %820 = arith.addf %816, %819 : vector<8x128xf32>
    %c194 = arith.constant 194 : index
    %821 = memref.load %arg2[%c194] : memref<424xf32, #tpu.memory_space<smem>>
    %822 = vector.broadcast %821 : f32 to vector<8x128xf32>
    %823 = arith.mulf %210, %822 : vector<8x128xf32>
    %824 = arith.addf %820, %823 : vector<8x128xf32>
    %c195 = arith.constant 195 : index
    %825 = memref.load %arg2[%c195] : memref<424xf32, #tpu.memory_space<smem>>
    %826 = vector.broadcast %825 : f32 to vector<8x128xf32>
    %827 = arith.mulf %225, %826 : vector<8x128xf32>
    %828 = arith.addf %824, %827 : vector<8x128xf32>
    %c196 = arith.constant 196 : index
    %829 = memref.load %arg2[%c196] : memref<424xf32, #tpu.memory_space<smem>>
    %830 = vector.broadcast %829 : f32 to vector<8x128xf32>
    %831 = arith.mulf %240, %830 : vector<8x128xf32>
    %832 = arith.addf %828, %831 : vector<8x128xf32>
    %c197 = arith.constant 197 : index
    %833 = memref.load %arg2[%c197] : memref<424xf32, #tpu.memory_space<smem>>
    %834 = vector.broadcast %833 : f32 to vector<8x128xf32>
    %835 = arith.mulf %255, %834 : vector<8x128xf32>
    %836 = arith.addf %832, %835 : vector<8x128xf32>
    %c239 = arith.constant 239 : index
    %837 = memref.load %arg2[%c239] : memref<424xf32, #tpu.memory_space<smem>>
    %838 = vector.broadcast %837 : f32 to vector<8x128xf32>
    %839 = arith.addf %836, %838 : vector<8x128xf32>
    %840 = math.tanh %839 : vector<8x128xf32>
    %c198 = arith.constant 198 : index
    %841 = memref.load %arg2[%c198] : memref<424xf32, #tpu.memory_space<smem>>
    %842 = vector.broadcast %841 : f32 to vector<8x128xf32>
    %843 = arith.mulf %135, %842 : vector<8x128xf32>
    %c199 = arith.constant 199 : index
    %844 = memref.load %arg2[%c199] : memref<424xf32, #tpu.memory_space<smem>>
    %845 = vector.broadcast %844 : f32 to vector<8x128xf32>
    %846 = arith.mulf %150, %845 : vector<8x128xf32>
    %847 = arith.addf %843, %846 : vector<8x128xf32>
    %c200 = arith.constant 200 : index
    %848 = memref.load %arg2[%c200] : memref<424xf32, #tpu.memory_space<smem>>
    %849 = vector.broadcast %848 : f32 to vector<8x128xf32>
    %850 = arith.mulf %165, %849 : vector<8x128xf32>
    %851 = arith.addf %847, %850 : vector<8x128xf32>
    %c201 = arith.constant 201 : index
    %852 = memref.load %arg2[%c201] : memref<424xf32, #tpu.memory_space<smem>>
    %853 = vector.broadcast %852 : f32 to vector<8x128xf32>
    %854 = arith.mulf %180, %853 : vector<8x128xf32>
    %855 = arith.addf %851, %854 : vector<8x128xf32>
    %c202 = arith.constant 202 : index
    %856 = memref.load %arg2[%c202] : memref<424xf32, #tpu.memory_space<smem>>
    %857 = vector.broadcast %856 : f32 to vector<8x128xf32>
    %858 = arith.mulf %195, %857 : vector<8x128xf32>
    %859 = arith.addf %855, %858 : vector<8x128xf32>
    %c203 = arith.constant 203 : index
    %860 = memref.load %arg2[%c203] : memref<424xf32, #tpu.memory_space<smem>>
    %861 = vector.broadcast %860 : f32 to vector<8x128xf32>
    %862 = arith.mulf %210, %861 : vector<8x128xf32>
    %863 = arith.addf %859, %862 : vector<8x128xf32>
    %c204 = arith.constant 204 : index
    %864 = memref.load %arg2[%c204] : memref<424xf32, #tpu.memory_space<smem>>
    %865 = vector.broadcast %864 : f32 to vector<8x128xf32>
    %866 = arith.mulf %225, %865 : vector<8x128xf32>
    %867 = arith.addf %863, %866 : vector<8x128xf32>
    %c205 = arith.constant 205 : index
    %868 = memref.load %arg2[%c205] : memref<424xf32, #tpu.memory_space<smem>>
    %869 = vector.broadcast %868 : f32 to vector<8x128xf32>
    %870 = arith.mulf %240, %869 : vector<8x128xf32>
    %871 = arith.addf %867, %870 : vector<8x128xf32>
    %c206 = arith.constant 206 : index
    %872 = memref.load %arg2[%c206] : memref<424xf32, #tpu.memory_space<smem>>
    %873 = vector.broadcast %872 : f32 to vector<8x128xf32>
    %874 = arith.mulf %255, %873 : vector<8x128xf32>
    %875 = arith.addf %871, %874 : vector<8x128xf32>
    %c240 = arith.constant 240 : index
    %876 = memref.load %arg2[%c240] : memref<424xf32, #tpu.memory_space<smem>>
    %877 = vector.broadcast %876 : f32 to vector<8x128xf32>
    %878 = arith.addf %875, %877 : vector<8x128xf32>
    %879 = math.tanh %878 : vector<8x128xf32>
    %c207 = arith.constant 207 : index
    %880 = memref.load %arg2[%c207] : memref<424xf32, #tpu.memory_space<smem>>
    %881 = vector.broadcast %880 : f32 to vector<8x128xf32>
    %882 = arith.mulf %135, %881 : vector<8x128xf32>
    %c208 = arith.constant 208 : index
    %883 = memref.load %arg2[%c208] : memref<424xf32, #tpu.memory_space<smem>>
    %884 = vector.broadcast %883 : f32 to vector<8x128xf32>
    %885 = arith.mulf %150, %884 : vector<8x128xf32>
    %886 = arith.addf %882, %885 : vector<8x128xf32>
    %c209 = arith.constant 209 : index
    %887 = memref.load %arg2[%c209] : memref<424xf32, #tpu.memory_space<smem>>
    %888 = vector.broadcast %887 : f32 to vector<8x128xf32>
    %889 = arith.mulf %165, %888 : vector<8x128xf32>
    %890 = arith.addf %886, %889 : vector<8x128xf32>
    %c210 = arith.constant 210 : index
    %891 = memref.load %arg2[%c210] : memref<424xf32, #tpu.memory_space<smem>>
    %892 = vector.broadcast %891 : f32 to vector<8x128xf32>
    %893 = arith.mulf %180, %892 : vector<8x128xf32>
    %894 = arith.addf %890, %893 : vector<8x128xf32>
    %c211 = arith.constant 211 : index
    %895 = memref.load %arg2[%c211] : memref<424xf32, #tpu.memory_space<smem>>
    %896 = vector.broadcast %895 : f32 to vector<8x128xf32>
    %897 = arith.mulf %195, %896 : vector<8x128xf32>
    %898 = arith.addf %894, %897 : vector<8x128xf32>
    %c212 = arith.constant 212 : index
    %899 = memref.load %arg2[%c212] : memref<424xf32, #tpu.memory_space<smem>>
    %900 = vector.broadcast %899 : f32 to vector<8x128xf32>
    %901 = arith.mulf %210, %900 : vector<8x128xf32>
    %902 = arith.addf %898, %901 : vector<8x128xf32>
    %c213 = arith.constant 213 : index
    %903 = memref.load %arg2[%c213] : memref<424xf32, #tpu.memory_space<smem>>
    %904 = vector.broadcast %903 : f32 to vector<8x128xf32>
    %905 = arith.mulf %225, %904 : vector<8x128xf32>
    %906 = arith.addf %902, %905 : vector<8x128xf32>
    %c214 = arith.constant 214 : index
    %907 = memref.load %arg2[%c214] : memref<424xf32, #tpu.memory_space<smem>>
    %908 = vector.broadcast %907 : f32 to vector<8x128xf32>
    %909 = arith.mulf %240, %908 : vector<8x128xf32>
    %910 = arith.addf %906, %909 : vector<8x128xf32>
    %c215 = arith.constant 215 : index
    %911 = memref.load %arg2[%c215] : memref<424xf32, #tpu.memory_space<smem>>
    %912 = vector.broadcast %911 : f32 to vector<8x128xf32>
    %913 = arith.mulf %255, %912 : vector<8x128xf32>
    %914 = arith.addf %910, %913 : vector<8x128xf32>
    %c241 = arith.constant 241 : index
    %915 = memref.load %arg2[%c241] : memref<424xf32, #tpu.memory_space<smem>>
    %916 = vector.broadcast %915 : f32 to vector<8x128xf32>
    %917 = arith.addf %914, %916 : vector<8x128xf32>
    %918 = math.tanh %917 : vector<8x128xf32>
    %c216 = arith.constant 216 : index
    %919 = memref.load %arg2[%c216] : memref<424xf32, #tpu.memory_space<smem>>
    %920 = vector.broadcast %919 : f32 to vector<8x128xf32>
    %921 = arith.mulf %135, %920 : vector<8x128xf32>
    %c217 = arith.constant 217 : index
    %922 = memref.load %arg2[%c217] : memref<424xf32, #tpu.memory_space<smem>>
    %923 = vector.broadcast %922 : f32 to vector<8x128xf32>
    %924 = arith.mulf %150, %923 : vector<8x128xf32>
    %925 = arith.addf %921, %924 : vector<8x128xf32>
    %c218 = arith.constant 218 : index
    %926 = memref.load %arg2[%c218] : memref<424xf32, #tpu.memory_space<smem>>
    %927 = vector.broadcast %926 : f32 to vector<8x128xf32>
    %928 = arith.mulf %165, %927 : vector<8x128xf32>
    %929 = arith.addf %925, %928 : vector<8x128xf32>
    %c219 = arith.constant 219 : index
    %930 = memref.load %arg2[%c219] : memref<424xf32, #tpu.memory_space<smem>>
    %931 = vector.broadcast %930 : f32 to vector<8x128xf32>
    %932 = arith.mulf %180, %931 : vector<8x128xf32>
    %933 = arith.addf %929, %932 : vector<8x128xf32>
    %c220 = arith.constant 220 : index
    %934 = memref.load %arg2[%c220] : memref<424xf32, #tpu.memory_space<smem>>
    %935 = vector.broadcast %934 : f32 to vector<8x128xf32>
    %936 = arith.mulf %195, %935 : vector<8x128xf32>
    %937 = arith.addf %933, %936 : vector<8x128xf32>
    %c221 = arith.constant 221 : index
    %938 = memref.load %arg2[%c221] : memref<424xf32, #tpu.memory_space<smem>>
    %939 = vector.broadcast %938 : f32 to vector<8x128xf32>
    %940 = arith.mulf %210, %939 : vector<8x128xf32>
    %941 = arith.addf %937, %940 : vector<8x128xf32>
    %c222 = arith.constant 222 : index
    %942 = memref.load %arg2[%c222] : memref<424xf32, #tpu.memory_space<smem>>
    %943 = vector.broadcast %942 : f32 to vector<8x128xf32>
    %944 = arith.mulf %225, %943 : vector<8x128xf32>
    %945 = arith.addf %941, %944 : vector<8x128xf32>
    %c223 = arith.constant 223 : index
    %946 = memref.load %arg2[%c223] : memref<424xf32, #tpu.memory_space<smem>>
    %947 = vector.broadcast %946 : f32 to vector<8x128xf32>
    %948 = arith.mulf %240, %947 : vector<8x128xf32>
    %949 = arith.addf %945, %948 : vector<8x128xf32>
    %c224 = arith.constant 224 : index
    %950 = memref.load %arg2[%c224] : memref<424xf32, #tpu.memory_space<smem>>
    %951 = vector.broadcast %950 : f32 to vector<8x128xf32>
    %952 = arith.mulf %255, %951 : vector<8x128xf32>
    %953 = arith.addf %949, %952 : vector<8x128xf32>
    %c242 = arith.constant 242 : index
    %954 = memref.load %arg2[%c242] : memref<424xf32, #tpu.memory_space<smem>>
    %955 = vector.broadcast %954 : f32 to vector<8x128xf32>
    %956 = arith.addf %953, %955 : vector<8x128xf32>
    %957 = math.tanh %956 : vector<8x128xf32>
    %c243 = arith.constant 243 : index
    %958 = memref.load %arg2[%c243] : memref<424xf32, #tpu.memory_space<smem>>
    %959 = vector.broadcast %958 : f32 to vector<8x128xf32>
    %960 = arith.mulf %294, %959 : vector<8x128xf32>
    %c244 = arith.constant 244 : index
    %961 = memref.load %arg2[%c244] : memref<424xf32, #tpu.memory_space<smem>>
    %962 = vector.broadcast %961 : f32 to vector<8x128xf32>
    %963 = arith.mulf %333, %962 : vector<8x128xf32>
    %964 = arith.addf %960, %963 : vector<8x128xf32>
    %c245 = arith.constant 245 : index
    %965 = memref.load %arg2[%c245] : memref<424xf32, #tpu.memory_space<smem>>
    %966 = vector.broadcast %965 : f32 to vector<8x128xf32>
    %967 = arith.mulf %372, %966 : vector<8x128xf32>
    %968 = arith.addf %964, %967 : vector<8x128xf32>
    %c246 = arith.constant 246 : index
    %969 = memref.load %arg2[%c246] : memref<424xf32, #tpu.memory_space<smem>>
    %970 = vector.broadcast %969 : f32 to vector<8x128xf32>
    %971 = arith.mulf %411, %970 : vector<8x128xf32>
    %972 = arith.addf %968, %971 : vector<8x128xf32>
    %c247 = arith.constant 247 : index
    %973 = memref.load %arg2[%c247] : memref<424xf32, #tpu.memory_space<smem>>
    %974 = vector.broadcast %973 : f32 to vector<8x128xf32>
    %975 = arith.mulf %450, %974 : vector<8x128xf32>
    %976 = arith.addf %972, %975 : vector<8x128xf32>
    %c248 = arith.constant 248 : index
    %977 = memref.load %arg2[%c248] : memref<424xf32, #tpu.memory_space<smem>>
    %978 = vector.broadcast %977 : f32 to vector<8x128xf32>
    %979 = arith.mulf %489, %978 : vector<8x128xf32>
    %980 = arith.addf %976, %979 : vector<8x128xf32>
    %c249 = arith.constant 249 : index
    %981 = memref.load %arg2[%c249] : memref<424xf32, #tpu.memory_space<smem>>
    %982 = vector.broadcast %981 : f32 to vector<8x128xf32>
    %983 = arith.mulf %528, %982 : vector<8x128xf32>
    %984 = arith.addf %980, %983 : vector<8x128xf32>
    %c250 = arith.constant 250 : index
    %985 = memref.load %arg2[%c250] : memref<424xf32, #tpu.memory_space<smem>>
    %986 = vector.broadcast %985 : f32 to vector<8x128xf32>
    %987 = arith.mulf %567, %986 : vector<8x128xf32>
    %988 = arith.addf %984, %987 : vector<8x128xf32>
    %c251 = arith.constant 251 : index
    %989 = memref.load %arg2[%c251] : memref<424xf32, #tpu.memory_space<smem>>
    %990 = vector.broadcast %989 : f32 to vector<8x128xf32>
    %991 = arith.mulf %606, %990 : vector<8x128xf32>
    %992 = arith.addf %988, %991 : vector<8x128xf32>
    %c252 = arith.constant 252 : index
    %993 = memref.load %arg2[%c252] : memref<424xf32, #tpu.memory_space<smem>>
    %994 = vector.broadcast %993 : f32 to vector<8x128xf32>
    %995 = arith.mulf %645, %994 : vector<8x128xf32>
    %996 = arith.addf %992, %995 : vector<8x128xf32>
    %c253 = arith.constant 253 : index
    %997 = memref.load %arg2[%c253] : memref<424xf32, #tpu.memory_space<smem>>
    %998 = vector.broadcast %997 : f32 to vector<8x128xf32>
    %999 = arith.mulf %684, %998 : vector<8x128xf32>
    %1000 = arith.addf %996, %999 : vector<8x128xf32>
    %c254 = arith.constant 254 : index
    %1001 = memref.load %arg2[%c254] : memref<424xf32, #tpu.memory_space<smem>>
    %1002 = vector.broadcast %1001 : f32 to vector<8x128xf32>
    %1003 = arith.mulf %723, %1002 : vector<8x128xf32>
    %1004 = arith.addf %1000, %1003 : vector<8x128xf32>
    %c255 = arith.constant 255 : index
    %1005 = memref.load %arg2[%c255] : memref<424xf32, #tpu.memory_space<smem>>
    %1006 = vector.broadcast %1005 : f32 to vector<8x128xf32>
    %1007 = arith.mulf %762, %1006 : vector<8x128xf32>
    %1008 = arith.addf %1004, %1007 : vector<8x128xf32>
    %c256 = arith.constant 256 : index
    %1009 = memref.load %arg2[%c256] : memref<424xf32, #tpu.memory_space<smem>>
    %1010 = vector.broadcast %1009 : f32 to vector<8x128xf32>
    %1011 = arith.mulf %801, %1010 : vector<8x128xf32>
    %1012 = arith.addf %1008, %1011 : vector<8x128xf32>
    %c257 = arith.constant 257 : index
    %1013 = memref.load %arg2[%c257] : memref<424xf32, #tpu.memory_space<smem>>
    %1014 = vector.broadcast %1013 : f32 to vector<8x128xf32>
    %1015 = arith.mulf %840, %1014 : vector<8x128xf32>
    %1016 = arith.addf %1012, %1015 : vector<8x128xf32>
    %c258 = arith.constant 258 : index
    %1017 = memref.load %arg2[%c258] : memref<424xf32, #tpu.memory_space<smem>>
    %1018 = vector.broadcast %1017 : f32 to vector<8x128xf32>
    %1019 = arith.mulf %879, %1018 : vector<8x128xf32>
    %1020 = arith.addf %1016, %1019 : vector<8x128xf32>
    %c259 = arith.constant 259 : index
    %1021 = memref.load %arg2[%c259] : memref<424xf32, #tpu.memory_space<smem>>
    %1022 = vector.broadcast %1021 : f32 to vector<8x128xf32>
    %1023 = arith.mulf %918, %1022 : vector<8x128xf32>
    %1024 = arith.addf %1020, %1023 : vector<8x128xf32>
    %c260 = arith.constant 260 : index
    %1025 = memref.load %arg2[%c260] : memref<424xf32, #tpu.memory_space<smem>>
    %1026 = vector.broadcast %1025 : f32 to vector<8x128xf32>
    %1027 = arith.mulf %957, %1026 : vector<8x128xf32>
    %1028 = arith.addf %1024, %1027 : vector<8x128xf32>
    %c405 = arith.constant 405 : index
    %1029 = memref.load %arg2[%c405] : memref<424xf32, #tpu.memory_space<smem>>
    %1030 = vector.broadcast %1029 : f32 to vector<8x128xf32>
    %1031 = arith.addf %1028, %1030 : vector<8x128xf32>
    %1032 = math.tanh %1031 : vector<8x128xf32>
    %c261 = arith.constant 261 : index
    %1033 = memref.load %arg2[%c261] : memref<424xf32, #tpu.memory_space<smem>>
    %1034 = vector.broadcast %1033 : f32 to vector<8x128xf32>
    %1035 = arith.mulf %294, %1034 : vector<8x128xf32>
    %c262 = arith.constant 262 : index
    %1036 = memref.load %arg2[%c262] : memref<424xf32, #tpu.memory_space<smem>>
    %1037 = vector.broadcast %1036 : f32 to vector<8x128xf32>
    %1038 = arith.mulf %333, %1037 : vector<8x128xf32>
    %1039 = arith.addf %1035, %1038 : vector<8x128xf32>
    %c263 = arith.constant 263 : index
    %1040 = memref.load %arg2[%c263] : memref<424xf32, #tpu.memory_space<smem>>
    %1041 = vector.broadcast %1040 : f32 to vector<8x128xf32>
    %1042 = arith.mulf %372, %1041 : vector<8x128xf32>
    %1043 = arith.addf %1039, %1042 : vector<8x128xf32>
    %c264 = arith.constant 264 : index
    %1044 = memref.load %arg2[%c264] : memref<424xf32, #tpu.memory_space<smem>>
    %1045 = vector.broadcast %1044 : f32 to vector<8x128xf32>
    %1046 = arith.mulf %411, %1045 : vector<8x128xf32>
    %1047 = arith.addf %1043, %1046 : vector<8x128xf32>
    %c265 = arith.constant 265 : index
    %1048 = memref.load %arg2[%c265] : memref<424xf32, #tpu.memory_space<smem>>
    %1049 = vector.broadcast %1048 : f32 to vector<8x128xf32>
    %1050 = arith.mulf %450, %1049 : vector<8x128xf32>
    %1051 = arith.addf %1047, %1050 : vector<8x128xf32>
    %c266 = arith.constant 266 : index
    %1052 = memref.load %arg2[%c266] : memref<424xf32, #tpu.memory_space<smem>>
    %1053 = vector.broadcast %1052 : f32 to vector<8x128xf32>
    %1054 = arith.mulf %489, %1053 : vector<8x128xf32>
    %1055 = arith.addf %1051, %1054 : vector<8x128xf32>
    %c267 = arith.constant 267 : index
    %1056 = memref.load %arg2[%c267] : memref<424xf32, #tpu.memory_space<smem>>
    %1057 = vector.broadcast %1056 : f32 to vector<8x128xf32>
    %1058 = arith.mulf %528, %1057 : vector<8x128xf32>
    %1059 = arith.addf %1055, %1058 : vector<8x128xf32>
    %c268 = arith.constant 268 : index
    %1060 = memref.load %arg2[%c268] : memref<424xf32, #tpu.memory_space<smem>>
    %1061 = vector.broadcast %1060 : f32 to vector<8x128xf32>
    %1062 = arith.mulf %567, %1061 : vector<8x128xf32>
    %1063 = arith.addf %1059, %1062 : vector<8x128xf32>
    %c269 = arith.constant 269 : index
    %1064 = memref.load %arg2[%c269] : memref<424xf32, #tpu.memory_space<smem>>
    %1065 = vector.broadcast %1064 : f32 to vector<8x128xf32>
    %1066 = arith.mulf %606, %1065 : vector<8x128xf32>
    %1067 = arith.addf %1063, %1066 : vector<8x128xf32>
    %c270 = arith.constant 270 : index
    %1068 = memref.load %arg2[%c270] : memref<424xf32, #tpu.memory_space<smem>>
    %1069 = vector.broadcast %1068 : f32 to vector<8x128xf32>
    %1070 = arith.mulf %645, %1069 : vector<8x128xf32>
    %1071 = arith.addf %1067, %1070 : vector<8x128xf32>
    %c271 = arith.constant 271 : index
    %1072 = memref.load %arg2[%c271] : memref<424xf32, #tpu.memory_space<smem>>
    %1073 = vector.broadcast %1072 : f32 to vector<8x128xf32>
    %1074 = arith.mulf %684, %1073 : vector<8x128xf32>
    %1075 = arith.addf %1071, %1074 : vector<8x128xf32>
    %c272 = arith.constant 272 : index
    %1076 = memref.load %arg2[%c272] : memref<424xf32, #tpu.memory_space<smem>>
    %1077 = vector.broadcast %1076 : f32 to vector<8x128xf32>
    %1078 = arith.mulf %723, %1077 : vector<8x128xf32>
    %1079 = arith.addf %1075, %1078 : vector<8x128xf32>
    %c273 = arith.constant 273 : index
    %1080 = memref.load %arg2[%c273] : memref<424xf32, #tpu.memory_space<smem>>
    %1081 = vector.broadcast %1080 : f32 to vector<8x128xf32>
    %1082 = arith.mulf %762, %1081 : vector<8x128xf32>
    %1083 = arith.addf %1079, %1082 : vector<8x128xf32>
    %c274 = arith.constant 274 : index
    %1084 = memref.load %arg2[%c274] : memref<424xf32, #tpu.memory_space<smem>>
    %1085 = vector.broadcast %1084 : f32 to vector<8x128xf32>
    %1086 = arith.mulf %801, %1085 : vector<8x128xf32>
    %1087 = arith.addf %1083, %1086 : vector<8x128xf32>
    %c275 = arith.constant 275 : index
    %1088 = memref.load %arg2[%c275] : memref<424xf32, #tpu.memory_space<smem>>
    %1089 = vector.broadcast %1088 : f32 to vector<8x128xf32>
    %1090 = arith.mulf %840, %1089 : vector<8x128xf32>
    %1091 = arith.addf %1087, %1090 : vector<8x128xf32>
    %c276 = arith.constant 276 : index
    %1092 = memref.load %arg2[%c276] : memref<424xf32, #tpu.memory_space<smem>>
    %1093 = vector.broadcast %1092 : f32 to vector<8x128xf32>
    %1094 = arith.mulf %879, %1093 : vector<8x128xf32>
    %1095 = arith.addf %1091, %1094 : vector<8x128xf32>
    %c277 = arith.constant 277 : index
    %1096 = memref.load %arg2[%c277] : memref<424xf32, #tpu.memory_space<smem>>
    %1097 = vector.broadcast %1096 : f32 to vector<8x128xf32>
    %1098 = arith.mulf %918, %1097 : vector<8x128xf32>
    %1099 = arith.addf %1095, %1098 : vector<8x128xf32>
    %c278 = arith.constant 278 : index
    %1100 = memref.load %arg2[%c278] : memref<424xf32, #tpu.memory_space<smem>>
    %1101 = vector.broadcast %1100 : f32 to vector<8x128xf32>
    %1102 = arith.mulf %957, %1101 : vector<8x128xf32>
    %1103 = arith.addf %1099, %1102 : vector<8x128xf32>
    %c406 = arith.constant 406 : index
    %1104 = memref.load %arg2[%c406] : memref<424xf32, #tpu.memory_space<smem>>
    %1105 = vector.broadcast %1104 : f32 to vector<8x128xf32>
    %1106 = arith.addf %1103, %1105 : vector<8x128xf32>
    %1107 = math.tanh %1106 : vector<8x128xf32>
    %c279 = arith.constant 279 : index
    %1108 = memref.load %arg2[%c279] : memref<424xf32, #tpu.memory_space<smem>>
    %1109 = vector.broadcast %1108 : f32 to vector<8x128xf32>
    %1110 = arith.mulf %294, %1109 : vector<8x128xf32>
    %c280 = arith.constant 280 : index
    %1111 = memref.load %arg2[%c280] : memref<424xf32, #tpu.memory_space<smem>>
    %1112 = vector.broadcast %1111 : f32 to vector<8x128xf32>
    %1113 = arith.mulf %333, %1112 : vector<8x128xf32>
    %1114 = arith.addf %1110, %1113 : vector<8x128xf32>
    %c281 = arith.constant 281 : index
    %1115 = memref.load %arg2[%c281] : memref<424xf32, #tpu.memory_space<smem>>
    %1116 = vector.broadcast %1115 : f32 to vector<8x128xf32>
    %1117 = arith.mulf %372, %1116 : vector<8x128xf32>
    %1118 = arith.addf %1114, %1117 : vector<8x128xf32>
    %c282 = arith.constant 282 : index
    %1119 = memref.load %arg2[%c282] : memref<424xf32, #tpu.memory_space<smem>>
    %1120 = vector.broadcast %1119 : f32 to vector<8x128xf32>
    %1121 = arith.mulf %411, %1120 : vector<8x128xf32>
    %1122 = arith.addf %1118, %1121 : vector<8x128xf32>
    %c283 = arith.constant 283 : index
    %1123 = memref.load %arg2[%c283] : memref<424xf32, #tpu.memory_space<smem>>
    %1124 = vector.broadcast %1123 : f32 to vector<8x128xf32>
    %1125 = arith.mulf %450, %1124 : vector<8x128xf32>
    %1126 = arith.addf %1122, %1125 : vector<8x128xf32>
    %c284 = arith.constant 284 : index
    %1127 = memref.load %arg2[%c284] : memref<424xf32, #tpu.memory_space<smem>>
    %1128 = vector.broadcast %1127 : f32 to vector<8x128xf32>
    %1129 = arith.mulf %489, %1128 : vector<8x128xf32>
    %1130 = arith.addf %1126, %1129 : vector<8x128xf32>
    %c285 = arith.constant 285 : index
    %1131 = memref.load %arg2[%c285] : memref<424xf32, #tpu.memory_space<smem>>
    %1132 = vector.broadcast %1131 : f32 to vector<8x128xf32>
    %1133 = arith.mulf %528, %1132 : vector<8x128xf32>
    %1134 = arith.addf %1130, %1133 : vector<8x128xf32>
    %c286 = arith.constant 286 : index
    %1135 = memref.load %arg2[%c286] : memref<424xf32, #tpu.memory_space<smem>>
    %1136 = vector.broadcast %1135 : f32 to vector<8x128xf32>
    %1137 = arith.mulf %567, %1136 : vector<8x128xf32>
    %1138 = arith.addf %1134, %1137 : vector<8x128xf32>
    %c287 = arith.constant 287 : index
    %1139 = memref.load %arg2[%c287] : memref<424xf32, #tpu.memory_space<smem>>
    %1140 = vector.broadcast %1139 : f32 to vector<8x128xf32>
    %1141 = arith.mulf %606, %1140 : vector<8x128xf32>
    %1142 = arith.addf %1138, %1141 : vector<8x128xf32>
    %c288 = arith.constant 288 : index
    %1143 = memref.load %arg2[%c288] : memref<424xf32, #tpu.memory_space<smem>>
    %1144 = vector.broadcast %1143 : f32 to vector<8x128xf32>
    %1145 = arith.mulf %645, %1144 : vector<8x128xf32>
    %1146 = arith.addf %1142, %1145 : vector<8x128xf32>
    %c289 = arith.constant 289 : index
    %1147 = memref.load %arg2[%c289] : memref<424xf32, #tpu.memory_space<smem>>
    %1148 = vector.broadcast %1147 : f32 to vector<8x128xf32>
    %1149 = arith.mulf %684, %1148 : vector<8x128xf32>
    %1150 = arith.addf %1146, %1149 : vector<8x128xf32>
    %c290 = arith.constant 290 : index
    %1151 = memref.load %arg2[%c290] : memref<424xf32, #tpu.memory_space<smem>>
    %1152 = vector.broadcast %1151 : f32 to vector<8x128xf32>
    %1153 = arith.mulf %723, %1152 : vector<8x128xf32>
    %1154 = arith.addf %1150, %1153 : vector<8x128xf32>
    %c291 = arith.constant 291 : index
    %1155 = memref.load %arg2[%c291] : memref<424xf32, #tpu.memory_space<smem>>
    %1156 = vector.broadcast %1155 : f32 to vector<8x128xf32>
    %1157 = arith.mulf %762, %1156 : vector<8x128xf32>
    %1158 = arith.addf %1154, %1157 : vector<8x128xf32>
    %c292 = arith.constant 292 : index
    %1159 = memref.load %arg2[%c292] : memref<424xf32, #tpu.memory_space<smem>>
    %1160 = vector.broadcast %1159 : f32 to vector<8x128xf32>
    %1161 = arith.mulf %801, %1160 : vector<8x128xf32>
    %1162 = arith.addf %1158, %1161 : vector<8x128xf32>
    %c293 = arith.constant 293 : index
    %1163 = memref.load %arg2[%c293] : memref<424xf32, #tpu.memory_space<smem>>
    %1164 = vector.broadcast %1163 : f32 to vector<8x128xf32>
    %1165 = arith.mulf %840, %1164 : vector<8x128xf32>
    %1166 = arith.addf %1162, %1165 : vector<8x128xf32>
    %c294 = arith.constant 294 : index
    %1167 = memref.load %arg2[%c294] : memref<424xf32, #tpu.memory_space<smem>>
    %1168 = vector.broadcast %1167 : f32 to vector<8x128xf32>
    %1169 = arith.mulf %879, %1168 : vector<8x128xf32>
    %1170 = arith.addf %1166, %1169 : vector<8x128xf32>
    %c295 = arith.constant 295 : index
    %1171 = memref.load %arg2[%c295] : memref<424xf32, #tpu.memory_space<smem>>
    %1172 = vector.broadcast %1171 : f32 to vector<8x128xf32>
    %1173 = arith.mulf %918, %1172 : vector<8x128xf32>
    %1174 = arith.addf %1170, %1173 : vector<8x128xf32>
    %c296 = arith.constant 296 : index
    %1175 = memref.load %arg2[%c296] : memref<424xf32, #tpu.memory_space<smem>>
    %1176 = vector.broadcast %1175 : f32 to vector<8x128xf32>
    %1177 = arith.mulf %957, %1176 : vector<8x128xf32>
    %1178 = arith.addf %1174, %1177 : vector<8x128xf32>
    %c407 = arith.constant 407 : index
    %1179 = memref.load %arg2[%c407] : memref<424xf32, #tpu.memory_space<smem>>
    %1180 = vector.broadcast %1179 : f32 to vector<8x128xf32>
    %1181 = arith.addf %1178, %1180 : vector<8x128xf32>
    %1182 = math.tanh %1181 : vector<8x128xf32>
    %c297 = arith.constant 297 : index
    %1183 = memref.load %arg2[%c297] : memref<424xf32, #tpu.memory_space<smem>>
    %1184 = vector.broadcast %1183 : f32 to vector<8x128xf32>
    %1185 = arith.mulf %294, %1184 : vector<8x128xf32>
    %c298 = arith.constant 298 : index
    %1186 = memref.load %arg2[%c298] : memref<424xf32, #tpu.memory_space<smem>>
    %1187 = vector.broadcast %1186 : f32 to vector<8x128xf32>
    %1188 = arith.mulf %333, %1187 : vector<8x128xf32>
    %1189 = arith.addf %1185, %1188 : vector<8x128xf32>
    %c299 = arith.constant 299 : index
    %1190 = memref.load %arg2[%c299] : memref<424xf32, #tpu.memory_space<smem>>
    %1191 = vector.broadcast %1190 : f32 to vector<8x128xf32>
    %1192 = arith.mulf %372, %1191 : vector<8x128xf32>
    %1193 = arith.addf %1189, %1192 : vector<8x128xf32>
    %c300 = arith.constant 300 : index
    %1194 = memref.load %arg2[%c300] : memref<424xf32, #tpu.memory_space<smem>>
    %1195 = vector.broadcast %1194 : f32 to vector<8x128xf32>
    %1196 = arith.mulf %411, %1195 : vector<8x128xf32>
    %1197 = arith.addf %1193, %1196 : vector<8x128xf32>
    %c301 = arith.constant 301 : index
    %1198 = memref.load %arg2[%c301] : memref<424xf32, #tpu.memory_space<smem>>
    %1199 = vector.broadcast %1198 : f32 to vector<8x128xf32>
    %1200 = arith.mulf %450, %1199 : vector<8x128xf32>
    %1201 = arith.addf %1197, %1200 : vector<8x128xf32>
    %c302 = arith.constant 302 : index
    %1202 = memref.load %arg2[%c302] : memref<424xf32, #tpu.memory_space<smem>>
    %1203 = vector.broadcast %1202 : f32 to vector<8x128xf32>
    %1204 = arith.mulf %489, %1203 : vector<8x128xf32>
    %1205 = arith.addf %1201, %1204 : vector<8x128xf32>
    %c303 = arith.constant 303 : index
    %1206 = memref.load %arg2[%c303] : memref<424xf32, #tpu.memory_space<smem>>
    %1207 = vector.broadcast %1206 : f32 to vector<8x128xf32>
    %1208 = arith.mulf %528, %1207 : vector<8x128xf32>
    %1209 = arith.addf %1205, %1208 : vector<8x128xf32>
    %c304 = arith.constant 304 : index
    %1210 = memref.load %arg2[%c304] : memref<424xf32, #tpu.memory_space<smem>>
    %1211 = vector.broadcast %1210 : f32 to vector<8x128xf32>
    %1212 = arith.mulf %567, %1211 : vector<8x128xf32>
    %1213 = arith.addf %1209, %1212 : vector<8x128xf32>
    %c305 = arith.constant 305 : index
    %1214 = memref.load %arg2[%c305] : memref<424xf32, #tpu.memory_space<smem>>
    %1215 = vector.broadcast %1214 : f32 to vector<8x128xf32>
    %1216 = arith.mulf %606, %1215 : vector<8x128xf32>
    %1217 = arith.addf %1213, %1216 : vector<8x128xf32>
    %c306 = arith.constant 306 : index
    %1218 = memref.load %arg2[%c306] : memref<424xf32, #tpu.memory_space<smem>>
    %1219 = vector.broadcast %1218 : f32 to vector<8x128xf32>
    %1220 = arith.mulf %645, %1219 : vector<8x128xf32>
    %1221 = arith.addf %1217, %1220 : vector<8x128xf32>
    %c307 = arith.constant 307 : index
    %1222 = memref.load %arg2[%c307] : memref<424xf32, #tpu.memory_space<smem>>
    %1223 = vector.broadcast %1222 : f32 to vector<8x128xf32>
    %1224 = arith.mulf %684, %1223 : vector<8x128xf32>
    %1225 = arith.addf %1221, %1224 : vector<8x128xf32>
    %c308 = arith.constant 308 : index
    %1226 = memref.load %arg2[%c308] : memref<424xf32, #tpu.memory_space<smem>>
    %1227 = vector.broadcast %1226 : f32 to vector<8x128xf32>
    %1228 = arith.mulf %723, %1227 : vector<8x128xf32>
    %1229 = arith.addf %1225, %1228 : vector<8x128xf32>
    %c309 = arith.constant 309 : index
    %1230 = memref.load %arg2[%c309] : memref<424xf32, #tpu.memory_space<smem>>
    %1231 = vector.broadcast %1230 : f32 to vector<8x128xf32>
    %1232 = arith.mulf %762, %1231 : vector<8x128xf32>
    %1233 = arith.addf %1229, %1232 : vector<8x128xf32>
    %c310 = arith.constant 310 : index
    %1234 = memref.load %arg2[%c310] : memref<424xf32, #tpu.memory_space<smem>>
    %1235 = vector.broadcast %1234 : f32 to vector<8x128xf32>
    %1236 = arith.mulf %801, %1235 : vector<8x128xf32>
    %1237 = arith.addf %1233, %1236 : vector<8x128xf32>
    %c311 = arith.constant 311 : index
    %1238 = memref.load %arg2[%c311] : memref<424xf32, #tpu.memory_space<smem>>
    %1239 = vector.broadcast %1238 : f32 to vector<8x128xf32>
    %1240 = arith.mulf %840, %1239 : vector<8x128xf32>
    %1241 = arith.addf %1237, %1240 : vector<8x128xf32>
    %c312 = arith.constant 312 : index
    %1242 = memref.load %arg2[%c312] : memref<424xf32, #tpu.memory_space<smem>>
    %1243 = vector.broadcast %1242 : f32 to vector<8x128xf32>
    %1244 = arith.mulf %879, %1243 : vector<8x128xf32>
    %1245 = arith.addf %1241, %1244 : vector<8x128xf32>
    %c313 = arith.constant 313 : index
    %1246 = memref.load %arg2[%c313] : memref<424xf32, #tpu.memory_space<smem>>
    %1247 = vector.broadcast %1246 : f32 to vector<8x128xf32>
    %1248 = arith.mulf %918, %1247 : vector<8x128xf32>
    %1249 = arith.addf %1245, %1248 : vector<8x128xf32>
    %c314 = arith.constant 314 : index
    %1250 = memref.load %arg2[%c314] : memref<424xf32, #tpu.memory_space<smem>>
    %1251 = vector.broadcast %1250 : f32 to vector<8x128xf32>
    %1252 = arith.mulf %957, %1251 : vector<8x128xf32>
    %1253 = arith.addf %1249, %1252 : vector<8x128xf32>
    %c408 = arith.constant 408 : index
    %1254 = memref.load %arg2[%c408] : memref<424xf32, #tpu.memory_space<smem>>
    %1255 = vector.broadcast %1254 : f32 to vector<8x128xf32>
    %1256 = arith.addf %1253, %1255 : vector<8x128xf32>
    %1257 = math.tanh %1256 : vector<8x128xf32>
    %c315 = arith.constant 315 : index
    %1258 = memref.load %arg2[%c315] : memref<424xf32, #tpu.memory_space<smem>>
    %1259 = vector.broadcast %1258 : f32 to vector<8x128xf32>
    %1260 = arith.mulf %294, %1259 : vector<8x128xf32>
    %c316 = arith.constant 316 : index
    %1261 = memref.load %arg2[%c316] : memref<424xf32, #tpu.memory_space<smem>>
    %1262 = vector.broadcast %1261 : f32 to vector<8x128xf32>
    %1263 = arith.mulf %333, %1262 : vector<8x128xf32>
    %1264 = arith.addf %1260, %1263 : vector<8x128xf32>
    %c317 = arith.constant 317 : index
    %1265 = memref.load %arg2[%c317] : memref<424xf32, #tpu.memory_space<smem>>
    %1266 = vector.broadcast %1265 : f32 to vector<8x128xf32>
    %1267 = arith.mulf %372, %1266 : vector<8x128xf32>
    %1268 = arith.addf %1264, %1267 : vector<8x128xf32>
    %c318 = arith.constant 318 : index
    %1269 = memref.load %arg2[%c318] : memref<424xf32, #tpu.memory_space<smem>>
    %1270 = vector.broadcast %1269 : f32 to vector<8x128xf32>
    %1271 = arith.mulf %411, %1270 : vector<8x128xf32>
    %1272 = arith.addf %1268, %1271 : vector<8x128xf32>
    %c319 = arith.constant 319 : index
    %1273 = memref.load %arg2[%c319] : memref<424xf32, #tpu.memory_space<smem>>
    %1274 = vector.broadcast %1273 : f32 to vector<8x128xf32>
    %1275 = arith.mulf %450, %1274 : vector<8x128xf32>
    %1276 = arith.addf %1272, %1275 : vector<8x128xf32>
    %c320 = arith.constant 320 : index
    %1277 = memref.load %arg2[%c320] : memref<424xf32, #tpu.memory_space<smem>>
    %1278 = vector.broadcast %1277 : f32 to vector<8x128xf32>
    %1279 = arith.mulf %489, %1278 : vector<8x128xf32>
    %1280 = arith.addf %1276, %1279 : vector<8x128xf32>
    %c321 = arith.constant 321 : index
    %1281 = memref.load %arg2[%c321] : memref<424xf32, #tpu.memory_space<smem>>
    %1282 = vector.broadcast %1281 : f32 to vector<8x128xf32>
    %1283 = arith.mulf %528, %1282 : vector<8x128xf32>
    %1284 = arith.addf %1280, %1283 : vector<8x128xf32>
    %c322 = arith.constant 322 : index
    %1285 = memref.load %arg2[%c322] : memref<424xf32, #tpu.memory_space<smem>>
    %1286 = vector.broadcast %1285 : f32 to vector<8x128xf32>
    %1287 = arith.mulf %567, %1286 : vector<8x128xf32>
    %1288 = arith.addf %1284, %1287 : vector<8x128xf32>
    %c323 = arith.constant 323 : index
    %1289 = memref.load %arg2[%c323] : memref<424xf32, #tpu.memory_space<smem>>
    %1290 = vector.broadcast %1289 : f32 to vector<8x128xf32>
    %1291 = arith.mulf %606, %1290 : vector<8x128xf32>
    %1292 = arith.addf %1288, %1291 : vector<8x128xf32>
    %c324 = arith.constant 324 : index
    %1293 = memref.load %arg2[%c324] : memref<424xf32, #tpu.memory_space<smem>>
    %1294 = vector.broadcast %1293 : f32 to vector<8x128xf32>
    %1295 = arith.mulf %645, %1294 : vector<8x128xf32>
    %1296 = arith.addf %1292, %1295 : vector<8x128xf32>
    %c325 = arith.constant 325 : index
    %1297 = memref.load %arg2[%c325] : memref<424xf32, #tpu.memory_space<smem>>
    %1298 = vector.broadcast %1297 : f32 to vector<8x128xf32>
    %1299 = arith.mulf %684, %1298 : vector<8x128xf32>
    %1300 = arith.addf %1296, %1299 : vector<8x128xf32>
    %c326 = arith.constant 326 : index
    %1301 = memref.load %arg2[%c326] : memref<424xf32, #tpu.memory_space<smem>>
    %1302 = vector.broadcast %1301 : f32 to vector<8x128xf32>
    %1303 = arith.mulf %723, %1302 : vector<8x128xf32>
    %1304 = arith.addf %1300, %1303 : vector<8x128xf32>
    %c327 = arith.constant 327 : index
    %1305 = memref.load %arg2[%c327] : memref<424xf32, #tpu.memory_space<smem>>
    %1306 = vector.broadcast %1305 : f32 to vector<8x128xf32>
    %1307 = arith.mulf %762, %1306 : vector<8x128xf32>
    %1308 = arith.addf %1304, %1307 : vector<8x128xf32>
    %c328 = arith.constant 328 : index
    %1309 = memref.load %arg2[%c328] : memref<424xf32, #tpu.memory_space<smem>>
    %1310 = vector.broadcast %1309 : f32 to vector<8x128xf32>
    %1311 = arith.mulf %801, %1310 : vector<8x128xf32>
    %1312 = arith.addf %1308, %1311 : vector<8x128xf32>
    %c329 = arith.constant 329 : index
    %1313 = memref.load %arg2[%c329] : memref<424xf32, #tpu.memory_space<smem>>
    %1314 = vector.broadcast %1313 : f32 to vector<8x128xf32>
    %1315 = arith.mulf %840, %1314 : vector<8x128xf32>
    %1316 = arith.addf %1312, %1315 : vector<8x128xf32>
    %c330 = arith.constant 330 : index
    %1317 = memref.load %arg2[%c330] : memref<424xf32, #tpu.memory_space<smem>>
    %1318 = vector.broadcast %1317 : f32 to vector<8x128xf32>
    %1319 = arith.mulf %879, %1318 : vector<8x128xf32>
    %1320 = arith.addf %1316, %1319 : vector<8x128xf32>
    %c331 = arith.constant 331 : index
    %1321 = memref.load %arg2[%c331] : memref<424xf32, #tpu.memory_space<smem>>
    %1322 = vector.broadcast %1321 : f32 to vector<8x128xf32>
    %1323 = arith.mulf %918, %1322 : vector<8x128xf32>
    %1324 = arith.addf %1320, %1323 : vector<8x128xf32>
    %c332 = arith.constant 332 : index
    %1325 = memref.load %arg2[%c332] : memref<424xf32, #tpu.memory_space<smem>>
    %1326 = vector.broadcast %1325 : f32 to vector<8x128xf32>
    %1327 = arith.mulf %957, %1326 : vector<8x128xf32>
    %1328 = arith.addf %1324, %1327 : vector<8x128xf32>
    %c409 = arith.constant 409 : index
    %1329 = memref.load %arg2[%c409] : memref<424xf32, #tpu.memory_space<smem>>
    %1330 = vector.broadcast %1329 : f32 to vector<8x128xf32>
    %1331 = arith.addf %1328, %1330 : vector<8x128xf32>
    %1332 = math.tanh %1331 : vector<8x128xf32>
    %c333 = arith.constant 333 : index
    %1333 = memref.load %arg2[%c333] : memref<424xf32, #tpu.memory_space<smem>>
    %1334 = vector.broadcast %1333 : f32 to vector<8x128xf32>
    %1335 = arith.mulf %294, %1334 : vector<8x128xf32>
    %c334 = arith.constant 334 : index
    %1336 = memref.load %arg2[%c334] : memref<424xf32, #tpu.memory_space<smem>>
    %1337 = vector.broadcast %1336 : f32 to vector<8x128xf32>
    %1338 = arith.mulf %333, %1337 : vector<8x128xf32>
    %1339 = arith.addf %1335, %1338 : vector<8x128xf32>
    %c335 = arith.constant 335 : index
    %1340 = memref.load %arg2[%c335] : memref<424xf32, #tpu.memory_space<smem>>
    %1341 = vector.broadcast %1340 : f32 to vector<8x128xf32>
    %1342 = arith.mulf %372, %1341 : vector<8x128xf32>
    %1343 = arith.addf %1339, %1342 : vector<8x128xf32>
    %c336 = arith.constant 336 : index
    %1344 = memref.load %arg2[%c336] : memref<424xf32, #tpu.memory_space<smem>>
    %1345 = vector.broadcast %1344 : f32 to vector<8x128xf32>
    %1346 = arith.mulf %411, %1345 : vector<8x128xf32>
    %1347 = arith.addf %1343, %1346 : vector<8x128xf32>
    %c337 = arith.constant 337 : index
    %1348 = memref.load %arg2[%c337] : memref<424xf32, #tpu.memory_space<smem>>
    %1349 = vector.broadcast %1348 : f32 to vector<8x128xf32>
    %1350 = arith.mulf %450, %1349 : vector<8x128xf32>
    %1351 = arith.addf %1347, %1350 : vector<8x128xf32>
    %c338 = arith.constant 338 : index
    %1352 = memref.load %arg2[%c338] : memref<424xf32, #tpu.memory_space<smem>>
    %1353 = vector.broadcast %1352 : f32 to vector<8x128xf32>
    %1354 = arith.mulf %489, %1353 : vector<8x128xf32>
    %1355 = arith.addf %1351, %1354 : vector<8x128xf32>
    %c339 = arith.constant 339 : index
    %1356 = memref.load %arg2[%c339] : memref<424xf32, #tpu.memory_space<smem>>
    %1357 = vector.broadcast %1356 : f32 to vector<8x128xf32>
    %1358 = arith.mulf %528, %1357 : vector<8x128xf32>
    %1359 = arith.addf %1355, %1358 : vector<8x128xf32>
    %c340 = arith.constant 340 : index
    %1360 = memref.load %arg2[%c340] : memref<424xf32, #tpu.memory_space<smem>>
    %1361 = vector.broadcast %1360 : f32 to vector<8x128xf32>
    %1362 = arith.mulf %567, %1361 : vector<8x128xf32>
    %1363 = arith.addf %1359, %1362 : vector<8x128xf32>
    %c341 = arith.constant 341 : index
    %1364 = memref.load %arg2[%c341] : memref<424xf32, #tpu.memory_space<smem>>
    %1365 = vector.broadcast %1364 : f32 to vector<8x128xf32>
    %1366 = arith.mulf %606, %1365 : vector<8x128xf32>
    %1367 = arith.addf %1363, %1366 : vector<8x128xf32>
    %c342 = arith.constant 342 : index
    %1368 = memref.load %arg2[%c342] : memref<424xf32, #tpu.memory_space<smem>>
    %1369 = vector.broadcast %1368 : f32 to vector<8x128xf32>
    %1370 = arith.mulf %645, %1369 : vector<8x128xf32>
    %1371 = arith.addf %1367, %1370 : vector<8x128xf32>
    %c343 = arith.constant 343 : index
    %1372 = memref.load %arg2[%c343] : memref<424xf32, #tpu.memory_space<smem>>
    %1373 = vector.broadcast %1372 : f32 to vector<8x128xf32>
    %1374 = arith.mulf %684, %1373 : vector<8x128xf32>
    %1375 = arith.addf %1371, %1374 : vector<8x128xf32>
    %c344 = arith.constant 344 : index
    %1376 = memref.load %arg2[%c344] : memref<424xf32, #tpu.memory_space<smem>>
    %1377 = vector.broadcast %1376 : f32 to vector<8x128xf32>
    %1378 = arith.mulf %723, %1377 : vector<8x128xf32>
    %1379 = arith.addf %1375, %1378 : vector<8x128xf32>
    %c345 = arith.constant 345 : index
    %1380 = memref.load %arg2[%c345] : memref<424xf32, #tpu.memory_space<smem>>
    %1381 = vector.broadcast %1380 : f32 to vector<8x128xf32>
    %1382 = arith.mulf %762, %1381 : vector<8x128xf32>
    %1383 = arith.addf %1379, %1382 : vector<8x128xf32>
    %c346 = arith.constant 346 : index
    %1384 = memref.load %arg2[%c346] : memref<424xf32, #tpu.memory_space<smem>>
    %1385 = vector.broadcast %1384 : f32 to vector<8x128xf32>
    %1386 = arith.mulf %801, %1385 : vector<8x128xf32>
    %1387 = arith.addf %1383, %1386 : vector<8x128xf32>
    %c347 = arith.constant 347 : index
    %1388 = memref.load %arg2[%c347] : memref<424xf32, #tpu.memory_space<smem>>
    %1389 = vector.broadcast %1388 : f32 to vector<8x128xf32>
    %1390 = arith.mulf %840, %1389 : vector<8x128xf32>
    %1391 = arith.addf %1387, %1390 : vector<8x128xf32>
    %c348 = arith.constant 348 : index
    %1392 = memref.load %arg2[%c348] : memref<424xf32, #tpu.memory_space<smem>>
    %1393 = vector.broadcast %1392 : f32 to vector<8x128xf32>
    %1394 = arith.mulf %879, %1393 : vector<8x128xf32>
    %1395 = arith.addf %1391, %1394 : vector<8x128xf32>
    %c349 = arith.constant 349 : index
    %1396 = memref.load %arg2[%c349] : memref<424xf32, #tpu.memory_space<smem>>
    %1397 = vector.broadcast %1396 : f32 to vector<8x128xf32>
    %1398 = arith.mulf %918, %1397 : vector<8x128xf32>
    %1399 = arith.addf %1395, %1398 : vector<8x128xf32>
    %c350 = arith.constant 350 : index
    %1400 = memref.load %arg2[%c350] : memref<424xf32, #tpu.memory_space<smem>>
    %1401 = vector.broadcast %1400 : f32 to vector<8x128xf32>
    %1402 = arith.mulf %957, %1401 : vector<8x128xf32>
    %1403 = arith.addf %1399, %1402 : vector<8x128xf32>
    %c410 = arith.constant 410 : index
    %1404 = memref.load %arg2[%c410] : memref<424xf32, #tpu.memory_space<smem>>
    %1405 = vector.broadcast %1404 : f32 to vector<8x128xf32>
    %1406 = arith.addf %1403, %1405 : vector<8x128xf32>
    %1407 = math.tanh %1406 : vector<8x128xf32>
    %c351 = arith.constant 351 : index
    %1408 = memref.load %arg2[%c351] : memref<424xf32, #tpu.memory_space<smem>>
    %1409 = vector.broadcast %1408 : f32 to vector<8x128xf32>
    %1410 = arith.mulf %294, %1409 : vector<8x128xf32>
    %c352 = arith.constant 352 : index
    %1411 = memref.load %arg2[%c352] : memref<424xf32, #tpu.memory_space<smem>>
    %1412 = vector.broadcast %1411 : f32 to vector<8x128xf32>
    %1413 = arith.mulf %333, %1412 : vector<8x128xf32>
    %1414 = arith.addf %1410, %1413 : vector<8x128xf32>
    %c353 = arith.constant 353 : index
    %1415 = memref.load %arg2[%c353] : memref<424xf32, #tpu.memory_space<smem>>
    %1416 = vector.broadcast %1415 : f32 to vector<8x128xf32>
    %1417 = arith.mulf %372, %1416 : vector<8x128xf32>
    %1418 = arith.addf %1414, %1417 : vector<8x128xf32>
    %c354 = arith.constant 354 : index
    %1419 = memref.load %arg2[%c354] : memref<424xf32, #tpu.memory_space<smem>>
    %1420 = vector.broadcast %1419 : f32 to vector<8x128xf32>
    %1421 = arith.mulf %411, %1420 : vector<8x128xf32>
    %1422 = arith.addf %1418, %1421 : vector<8x128xf32>
    %c355 = arith.constant 355 : index
    %1423 = memref.load %arg2[%c355] : memref<424xf32, #tpu.memory_space<smem>>
    %1424 = vector.broadcast %1423 : f32 to vector<8x128xf32>
    %1425 = arith.mulf %450, %1424 : vector<8x128xf32>
    %1426 = arith.addf %1422, %1425 : vector<8x128xf32>
    %c356 = arith.constant 356 : index
    %1427 = memref.load %arg2[%c356] : memref<424xf32, #tpu.memory_space<smem>>
    %1428 = vector.broadcast %1427 : f32 to vector<8x128xf32>
    %1429 = arith.mulf %489, %1428 : vector<8x128xf32>
    %1430 = arith.addf %1426, %1429 : vector<8x128xf32>
    %c357 = arith.constant 357 : index
    %1431 = memref.load %arg2[%c357] : memref<424xf32, #tpu.memory_space<smem>>
    %1432 = vector.broadcast %1431 : f32 to vector<8x128xf32>
    %1433 = arith.mulf %528, %1432 : vector<8x128xf32>
    %1434 = arith.addf %1430, %1433 : vector<8x128xf32>
    %c358 = arith.constant 358 : index
    %1435 = memref.load %arg2[%c358] : memref<424xf32, #tpu.memory_space<smem>>
    %1436 = vector.broadcast %1435 : f32 to vector<8x128xf32>
    %1437 = arith.mulf %567, %1436 : vector<8x128xf32>
    %1438 = arith.addf %1434, %1437 : vector<8x128xf32>
    %c359 = arith.constant 359 : index
    %1439 = memref.load %arg2[%c359] : memref<424xf32, #tpu.memory_space<smem>>
    %1440 = vector.broadcast %1439 : f32 to vector<8x128xf32>
    %1441 = arith.mulf %606, %1440 : vector<8x128xf32>
    %1442 = arith.addf %1438, %1441 : vector<8x128xf32>
    %c360 = arith.constant 360 : index
    %1443 = memref.load %arg2[%c360] : memref<424xf32, #tpu.memory_space<smem>>
    %1444 = vector.broadcast %1443 : f32 to vector<8x128xf32>
    %1445 = arith.mulf %645, %1444 : vector<8x128xf32>
    %1446 = arith.addf %1442, %1445 : vector<8x128xf32>
    %c361 = arith.constant 361 : index
    %1447 = memref.load %arg2[%c361] : memref<424xf32, #tpu.memory_space<smem>>
    %1448 = vector.broadcast %1447 : f32 to vector<8x128xf32>
    %1449 = arith.mulf %684, %1448 : vector<8x128xf32>
    %1450 = arith.addf %1446, %1449 : vector<8x128xf32>
    %c362 = arith.constant 362 : index
    %1451 = memref.load %arg2[%c362] : memref<424xf32, #tpu.memory_space<smem>>
    %1452 = vector.broadcast %1451 : f32 to vector<8x128xf32>
    %1453 = arith.mulf %723, %1452 : vector<8x128xf32>
    %1454 = arith.addf %1450, %1453 : vector<8x128xf32>
    %c363 = arith.constant 363 : index
    %1455 = memref.load %arg2[%c363] : memref<424xf32, #tpu.memory_space<smem>>
    %1456 = vector.broadcast %1455 : f32 to vector<8x128xf32>
    %1457 = arith.mulf %762, %1456 : vector<8x128xf32>
    %1458 = arith.addf %1454, %1457 : vector<8x128xf32>
    %c364 = arith.constant 364 : index
    %1459 = memref.load %arg2[%c364] : memref<424xf32, #tpu.memory_space<smem>>
    %1460 = vector.broadcast %1459 : f32 to vector<8x128xf32>
    %1461 = arith.mulf %801, %1460 : vector<8x128xf32>
    %1462 = arith.addf %1458, %1461 : vector<8x128xf32>
    %c365 = arith.constant 365 : index
    %1463 = memref.load %arg2[%c365] : memref<424xf32, #tpu.memory_space<smem>>
    %1464 = vector.broadcast %1463 : f32 to vector<8x128xf32>
    %1465 = arith.mulf %840, %1464 : vector<8x128xf32>
    %1466 = arith.addf %1462, %1465 : vector<8x128xf32>
    %c366 = arith.constant 366 : index
    %1467 = memref.load %arg2[%c366] : memref<424xf32, #tpu.memory_space<smem>>
    %1468 = vector.broadcast %1467 : f32 to vector<8x128xf32>
    %1469 = arith.mulf %879, %1468 : vector<8x128xf32>
    %1470 = arith.addf %1466, %1469 : vector<8x128xf32>
    %c367 = arith.constant 367 : index
    %1471 = memref.load %arg2[%c367] : memref<424xf32, #tpu.memory_space<smem>>
    %1472 = vector.broadcast %1471 : f32 to vector<8x128xf32>
    %1473 = arith.mulf %918, %1472 : vector<8x128xf32>
    %1474 = arith.addf %1470, %1473 : vector<8x128xf32>
    %c368 = arith.constant 368 : index
    %1475 = memref.load %arg2[%c368] : memref<424xf32, #tpu.memory_space<smem>>
    %1476 = vector.broadcast %1475 : f32 to vector<8x128xf32>
    %1477 = arith.mulf %957, %1476 : vector<8x128xf32>
    %1478 = arith.addf %1474, %1477 : vector<8x128xf32>
    %c411 = arith.constant 411 : index
    %1479 = memref.load %arg2[%c411] : memref<424xf32, #tpu.memory_space<smem>>
    %1480 = vector.broadcast %1479 : f32 to vector<8x128xf32>
    %1481 = arith.addf %1478, %1480 : vector<8x128xf32>
    %1482 = math.tanh %1481 : vector<8x128xf32>
    %c369 = arith.constant 369 : index
    %1483 = memref.load %arg2[%c369] : memref<424xf32, #tpu.memory_space<smem>>
    %1484 = vector.broadcast %1483 : f32 to vector<8x128xf32>
    %1485 = arith.mulf %294, %1484 : vector<8x128xf32>
    %c370 = arith.constant 370 : index
    %1486 = memref.load %arg2[%c370] : memref<424xf32, #tpu.memory_space<smem>>
    %1487 = vector.broadcast %1486 : f32 to vector<8x128xf32>
    %1488 = arith.mulf %333, %1487 : vector<8x128xf32>
    %1489 = arith.addf %1485, %1488 : vector<8x128xf32>
    %c371 = arith.constant 371 : index
    %1490 = memref.load %arg2[%c371] : memref<424xf32, #tpu.memory_space<smem>>
    %1491 = vector.broadcast %1490 : f32 to vector<8x128xf32>
    %1492 = arith.mulf %372, %1491 : vector<8x128xf32>
    %1493 = arith.addf %1489, %1492 : vector<8x128xf32>
    %c372 = arith.constant 372 : index
    %1494 = memref.load %arg2[%c372] : memref<424xf32, #tpu.memory_space<smem>>
    %1495 = vector.broadcast %1494 : f32 to vector<8x128xf32>
    %1496 = arith.mulf %411, %1495 : vector<8x128xf32>
    %1497 = arith.addf %1493, %1496 : vector<8x128xf32>
    %c373 = arith.constant 373 : index
    %1498 = memref.load %arg2[%c373] : memref<424xf32, #tpu.memory_space<smem>>
    %1499 = vector.broadcast %1498 : f32 to vector<8x128xf32>
    %1500 = arith.mulf %450, %1499 : vector<8x128xf32>
    %1501 = arith.addf %1497, %1500 : vector<8x128xf32>
    %c374 = arith.constant 374 : index
    %1502 = memref.load %arg2[%c374] : memref<424xf32, #tpu.memory_space<smem>>
    %1503 = vector.broadcast %1502 : f32 to vector<8x128xf32>
    %1504 = arith.mulf %489, %1503 : vector<8x128xf32>
    %1505 = arith.addf %1501, %1504 : vector<8x128xf32>
    %c375 = arith.constant 375 : index
    %1506 = memref.load %arg2[%c375] : memref<424xf32, #tpu.memory_space<smem>>
    %1507 = vector.broadcast %1506 : f32 to vector<8x128xf32>
    %1508 = arith.mulf %528, %1507 : vector<8x128xf32>
    %1509 = arith.addf %1505, %1508 : vector<8x128xf32>
    %c376 = arith.constant 376 : index
    %1510 = memref.load %arg2[%c376] : memref<424xf32, #tpu.memory_space<smem>>
    %1511 = vector.broadcast %1510 : f32 to vector<8x128xf32>
    %1512 = arith.mulf %567, %1511 : vector<8x128xf32>
    %1513 = arith.addf %1509, %1512 : vector<8x128xf32>
    %c377 = arith.constant 377 : index
    %1514 = memref.load %arg2[%c377] : memref<424xf32, #tpu.memory_space<smem>>
    %1515 = vector.broadcast %1514 : f32 to vector<8x128xf32>
    %1516 = arith.mulf %606, %1515 : vector<8x128xf32>
    %1517 = arith.addf %1513, %1516 : vector<8x128xf32>
    %c378 = arith.constant 378 : index
    %1518 = memref.load %arg2[%c378] : memref<424xf32, #tpu.memory_space<smem>>
    %1519 = vector.broadcast %1518 : f32 to vector<8x128xf32>
    %1520 = arith.mulf %645, %1519 : vector<8x128xf32>
    %1521 = arith.addf %1517, %1520 : vector<8x128xf32>
    %c379 = arith.constant 379 : index
    %1522 = memref.load %arg2[%c379] : memref<424xf32, #tpu.memory_space<smem>>
    %1523 = vector.broadcast %1522 : f32 to vector<8x128xf32>
    %1524 = arith.mulf %684, %1523 : vector<8x128xf32>
    %1525 = arith.addf %1521, %1524 : vector<8x128xf32>
    %c380 = arith.constant 380 : index
    %1526 = memref.load %arg2[%c380] : memref<424xf32, #tpu.memory_space<smem>>
    %1527 = vector.broadcast %1526 : f32 to vector<8x128xf32>
    %1528 = arith.mulf %723, %1527 : vector<8x128xf32>
    %1529 = arith.addf %1525, %1528 : vector<8x128xf32>
    %c381 = arith.constant 381 : index
    %1530 = memref.load %arg2[%c381] : memref<424xf32, #tpu.memory_space<smem>>
    %1531 = vector.broadcast %1530 : f32 to vector<8x128xf32>
    %1532 = arith.mulf %762, %1531 : vector<8x128xf32>
    %1533 = arith.addf %1529, %1532 : vector<8x128xf32>
    %c382 = arith.constant 382 : index
    %1534 = memref.load %arg2[%c382] : memref<424xf32, #tpu.memory_space<smem>>
    %1535 = vector.broadcast %1534 : f32 to vector<8x128xf32>
    %1536 = arith.mulf %801, %1535 : vector<8x128xf32>
    %1537 = arith.addf %1533, %1536 : vector<8x128xf32>
    %c383 = arith.constant 383 : index
    %1538 = memref.load %arg2[%c383] : memref<424xf32, #tpu.memory_space<smem>>
    %1539 = vector.broadcast %1538 : f32 to vector<8x128xf32>
    %1540 = arith.mulf %840, %1539 : vector<8x128xf32>
    %1541 = arith.addf %1537, %1540 : vector<8x128xf32>
    %c384 = arith.constant 384 : index
    %1542 = memref.load %arg2[%c384] : memref<424xf32, #tpu.memory_space<smem>>
    %1543 = vector.broadcast %1542 : f32 to vector<8x128xf32>
    %1544 = arith.mulf %879, %1543 : vector<8x128xf32>
    %1545 = arith.addf %1541, %1544 : vector<8x128xf32>
    %c385 = arith.constant 385 : index
    %1546 = memref.load %arg2[%c385] : memref<424xf32, #tpu.memory_space<smem>>
    %1547 = vector.broadcast %1546 : f32 to vector<8x128xf32>
    %1548 = arith.mulf %918, %1547 : vector<8x128xf32>
    %1549 = arith.addf %1545, %1548 : vector<8x128xf32>
    %c386 = arith.constant 386 : index
    %1550 = memref.load %arg2[%c386] : memref<424xf32, #tpu.memory_space<smem>>
    %1551 = vector.broadcast %1550 : f32 to vector<8x128xf32>
    %1552 = arith.mulf %957, %1551 : vector<8x128xf32>
    %1553 = arith.addf %1549, %1552 : vector<8x128xf32>
    %c412 = arith.constant 412 : index
    %1554 = memref.load %arg2[%c412] : memref<424xf32, #tpu.memory_space<smem>>
    %1555 = vector.broadcast %1554 : f32 to vector<8x128xf32>
    %1556 = arith.addf %1553, %1555 : vector<8x128xf32>
    %1557 = math.tanh %1556 : vector<8x128xf32>
    %c387 = arith.constant 387 : index
    %1558 = memref.load %arg2[%c387] : memref<424xf32, #tpu.memory_space<smem>>
    %1559 = vector.broadcast %1558 : f32 to vector<8x128xf32>
    %1560 = arith.mulf %294, %1559 : vector<8x128xf32>
    %c388 = arith.constant 388 : index
    %1561 = memref.load %arg2[%c388] : memref<424xf32, #tpu.memory_space<smem>>
    %1562 = vector.broadcast %1561 : f32 to vector<8x128xf32>
    %1563 = arith.mulf %333, %1562 : vector<8x128xf32>
    %1564 = arith.addf %1560, %1563 : vector<8x128xf32>
    %c389 = arith.constant 389 : index
    %1565 = memref.load %arg2[%c389] : memref<424xf32, #tpu.memory_space<smem>>
    %1566 = vector.broadcast %1565 : f32 to vector<8x128xf32>
    %1567 = arith.mulf %372, %1566 : vector<8x128xf32>
    %1568 = arith.addf %1564, %1567 : vector<8x128xf32>
    %c390 = arith.constant 390 : index
    %1569 = memref.load %arg2[%c390] : memref<424xf32, #tpu.memory_space<smem>>
    %1570 = vector.broadcast %1569 : f32 to vector<8x128xf32>
    %1571 = arith.mulf %411, %1570 : vector<8x128xf32>
    %1572 = arith.addf %1568, %1571 : vector<8x128xf32>
    %c391 = arith.constant 391 : index
    %1573 = memref.load %arg2[%c391] : memref<424xf32, #tpu.memory_space<smem>>
    %1574 = vector.broadcast %1573 : f32 to vector<8x128xf32>
    %1575 = arith.mulf %450, %1574 : vector<8x128xf32>
    %1576 = arith.addf %1572, %1575 : vector<8x128xf32>
    %c392 = arith.constant 392 : index
    %1577 = memref.load %arg2[%c392] : memref<424xf32, #tpu.memory_space<smem>>
    %1578 = vector.broadcast %1577 : f32 to vector<8x128xf32>
    %1579 = arith.mulf %489, %1578 : vector<8x128xf32>
    %1580 = arith.addf %1576, %1579 : vector<8x128xf32>
    %c393 = arith.constant 393 : index
    %1581 = memref.load %arg2[%c393] : memref<424xf32, #tpu.memory_space<smem>>
    %1582 = vector.broadcast %1581 : f32 to vector<8x128xf32>
    %1583 = arith.mulf %528, %1582 : vector<8x128xf32>
    %1584 = arith.addf %1580, %1583 : vector<8x128xf32>
    %c394 = arith.constant 394 : index
    %1585 = memref.load %arg2[%c394] : memref<424xf32, #tpu.memory_space<smem>>
    %1586 = vector.broadcast %1585 : f32 to vector<8x128xf32>
    %1587 = arith.mulf %567, %1586 : vector<8x128xf32>
    %1588 = arith.addf %1584, %1587 : vector<8x128xf32>
    %c395 = arith.constant 395 : index
    %1589 = memref.load %arg2[%c395] : memref<424xf32, #tpu.memory_space<smem>>
    %1590 = vector.broadcast %1589 : f32 to vector<8x128xf32>
    %1591 = arith.mulf %606, %1590 : vector<8x128xf32>
    %1592 = arith.addf %1588, %1591 : vector<8x128xf32>
    %c396 = arith.constant 396 : index
    %1593 = memref.load %arg2[%c396] : memref<424xf32, #tpu.memory_space<smem>>
    %1594 = vector.broadcast %1593 : f32 to vector<8x128xf32>
    %1595 = arith.mulf %645, %1594 : vector<8x128xf32>
    %1596 = arith.addf %1592, %1595 : vector<8x128xf32>
    %c397 = arith.constant 397 : index
    %1597 = memref.load %arg2[%c397] : memref<424xf32, #tpu.memory_space<smem>>
    %1598 = vector.broadcast %1597 : f32 to vector<8x128xf32>
    %1599 = arith.mulf %684, %1598 : vector<8x128xf32>
    %1600 = arith.addf %1596, %1599 : vector<8x128xf32>
    %c398 = arith.constant 398 : index
    %1601 = memref.load %arg2[%c398] : memref<424xf32, #tpu.memory_space<smem>>
    %1602 = vector.broadcast %1601 : f32 to vector<8x128xf32>
    %1603 = arith.mulf %723, %1602 : vector<8x128xf32>
    %1604 = arith.addf %1600, %1603 : vector<8x128xf32>
    %c399 = arith.constant 399 : index
    %1605 = memref.load %arg2[%c399] : memref<424xf32, #tpu.memory_space<smem>>
    %1606 = vector.broadcast %1605 : f32 to vector<8x128xf32>
    %1607 = arith.mulf %762, %1606 : vector<8x128xf32>
    %1608 = arith.addf %1604, %1607 : vector<8x128xf32>
    %c400 = arith.constant 400 : index
    %1609 = memref.load %arg2[%c400] : memref<424xf32, #tpu.memory_space<smem>>
    %1610 = vector.broadcast %1609 : f32 to vector<8x128xf32>
    %1611 = arith.mulf %801, %1610 : vector<8x128xf32>
    %1612 = arith.addf %1608, %1611 : vector<8x128xf32>
    %c401 = arith.constant 401 : index
    %1613 = memref.load %arg2[%c401] : memref<424xf32, #tpu.memory_space<smem>>
    %1614 = vector.broadcast %1613 : f32 to vector<8x128xf32>
    %1615 = arith.mulf %840, %1614 : vector<8x128xf32>
    %1616 = arith.addf %1612, %1615 : vector<8x128xf32>
    %c402 = arith.constant 402 : index
    %1617 = memref.load %arg2[%c402] : memref<424xf32, #tpu.memory_space<smem>>
    %1618 = vector.broadcast %1617 : f32 to vector<8x128xf32>
    %1619 = arith.mulf %879, %1618 : vector<8x128xf32>
    %1620 = arith.addf %1616, %1619 : vector<8x128xf32>
    %c403 = arith.constant 403 : index
    %1621 = memref.load %arg2[%c403] : memref<424xf32, #tpu.memory_space<smem>>
    %1622 = vector.broadcast %1621 : f32 to vector<8x128xf32>
    %1623 = arith.mulf %918, %1622 : vector<8x128xf32>
    %1624 = arith.addf %1620, %1623 : vector<8x128xf32>
    %c404 = arith.constant 404 : index
    %1625 = memref.load %arg2[%c404] : memref<424xf32, #tpu.memory_space<smem>>
    %1626 = vector.broadcast %1625 : f32 to vector<8x128xf32>
    %1627 = arith.mulf %957, %1626 : vector<8x128xf32>
    %1628 = arith.addf %1624, %1627 : vector<8x128xf32>
    %c413 = arith.constant 413 : index
    %1629 = memref.load %arg2[%c413] : memref<424xf32, #tpu.memory_space<smem>>
    %1630 = vector.broadcast %1629 : f32 to vector<8x128xf32>
    %1631 = arith.addf %1628, %1630 : vector<8x128xf32>
    %1632 = math.tanh %1631 : vector<8x128xf32>
    %c414 = arith.constant 414 : index
    %1633 = memref.load %arg2[%c414] : memref<424xf32, #tpu.memory_space<smem>>
    %1634 = vector.broadcast %1633 : f32 to vector<8x128xf32>
    %1635 = arith.mulf %1032, %1634 : vector<8x128xf32>
    %c415 = arith.constant 415 : index
    %1636 = memref.load %arg2[%c415] : memref<424xf32, #tpu.memory_space<smem>>
    %1637 = vector.broadcast %1636 : f32 to vector<8x128xf32>
    %1638 = arith.mulf %1107, %1637 : vector<8x128xf32>
    %1639 = arith.addf %1635, %1638 : vector<8x128xf32>
    %c416 = arith.constant 416 : index
    %1640 = memref.load %arg2[%c416] : memref<424xf32, #tpu.memory_space<smem>>
    %1641 = vector.broadcast %1640 : f32 to vector<8x128xf32>
    %1642 = arith.mulf %1182, %1641 : vector<8x128xf32>
    %1643 = arith.addf %1639, %1642 : vector<8x128xf32>
    %c417 = arith.constant 417 : index
    %1644 = memref.load %arg2[%c417] : memref<424xf32, #tpu.memory_space<smem>>
    %1645 = vector.broadcast %1644 : f32 to vector<8x128xf32>
    %1646 = arith.mulf %1257, %1645 : vector<8x128xf32>
    %1647 = arith.addf %1643, %1646 : vector<8x128xf32>
    %c418 = arith.constant 418 : index
    %1648 = memref.load %arg2[%c418] : memref<424xf32, #tpu.memory_space<smem>>
    %1649 = vector.broadcast %1648 : f32 to vector<8x128xf32>
    %1650 = arith.mulf %1332, %1649 : vector<8x128xf32>
    %1651 = arith.addf %1647, %1650 : vector<8x128xf32>
    %c419 = arith.constant 419 : index
    %1652 = memref.load %arg2[%c419] : memref<424xf32, #tpu.memory_space<smem>>
    %1653 = vector.broadcast %1652 : f32 to vector<8x128xf32>
    %1654 = arith.mulf %1407, %1653 : vector<8x128xf32>
    %1655 = arith.addf %1651, %1654 : vector<8x128xf32>
    %c420 = arith.constant 420 : index
    %1656 = memref.load %arg2[%c420] : memref<424xf32, #tpu.memory_space<smem>>
    %1657 = vector.broadcast %1656 : f32 to vector<8x128xf32>
    %1658 = arith.mulf %1482, %1657 : vector<8x128xf32>
    %1659 = arith.addf %1655, %1658 : vector<8x128xf32>
    %c421 = arith.constant 421 : index
    %1660 = memref.load %arg2[%c421] : memref<424xf32, #tpu.memory_space<smem>>
    %1661 = vector.broadcast %1660 : f32 to vector<8x128xf32>
    %1662 = arith.mulf %1557, %1661 : vector<8x128xf32>
    %1663 = arith.addf %1659, %1662 : vector<8x128xf32>
    %c422 = arith.constant 422 : index
    %1664 = memref.load %arg2[%c422] : memref<424xf32, #tpu.memory_space<smem>>
    %1665 = vector.broadcast %1664 : f32 to vector<8x128xf32>
    %1666 = arith.mulf %1632, %1665 : vector<8x128xf32>
    %1667 = arith.addf %1663, %1666 : vector<8x128xf32>
    %c423 = arith.constant 423 : index
    %1668 = memref.load %arg2[%c423] : memref<424xf32, #tpu.memory_space<smem>>
    %1669 = vector.broadcast %1668 : f32 to vector<8x128xf32>
    %1670 = arith.addf %1667, %1669 : vector<8x128xf32>
    %c0_24 = arith.constant 0 : index
    %c0_25 = arith.constant 0 : index
    %1671 = vector.load %arg3[%c0_24, %c0_25] : memref<8x128xf32, #tpu.memory_space<vmem>>, vector<8x128xf32>
    tpu.vector_store %arg3[%c0_24, %c0_25], %1670 {strides = array<i32>} : memref<8x128xf32, #tpu.memory_space<vmem>>, vector<8x128xf32>,
    return
  }
  func.func @transform_0(%arg0: i32) -> (i32, i32, i32) {
    %c0_i32 = arith.constant 0 : i32
    %c0_i32_0 = arith.constant 0 : i32
    %c0_i32_1 = arith.constant 0 : i32
    return %c0_i32, %arg0, %c0_i32_0 : i32, i32, i32
  }
  func.func @transform_1(%arg0: i32) -> i32 {
    %c0_i32 = arith.constant 0 : i32
    %c0_i32_0 = arith.constant 0 : i32
    return %c0_i32 : i32
  }
  func.func @transform_2(%arg0: i32) -> (i32, i32) {
    %c0_i32 = arith.constant 0 : i32
    %c0_i32_0 = arith.constant 0 : i32
    return %arg0, %c0_i32 : i32, i32
  }
}

</mosaic_0001>

<bundles_post_ra>
// kernel: tpu_custom_call.1
= control target key start
LH: loop header
LB: loop body
LE: loop exit
PB: predicated region body
PF: predicated region fallthrough
CT: control target
= control target key end

     0   :  { %s4070_s0 = inlined_call_operand.hbm [shape: f32[8,8,128], index: 0, kind: input, shape index: {}]   ;;  %s4071_s1 = inlined_call_operand.hbm [shape: f32[424], index: 1, kind: input, shape index: {}]   ;;  %s4072_s2 = inlined_call_operand.hbm [shape: f32[8,128], index: 2, kind: output, shape index: {}]  }
   0x1   :  { %4079 = sst [smem:[#allocation82_spill]] %s4072_s2 }
   0x2   :  { %7 = vsyncpa [#allocation3], 0 }
   0x3   :  { %8 = vsyncpa [#allocation5], 0 }
   0x4   :  { %9 = vsyncpa [#allocation4], 0  ;;  %s14_s11 = sshll.u32 %s4070_s0, 4  ;;  %s2302_s12 = smov [#allocation2]   ;;  %s15_s11 = int_to_ptr.hbm [resolvable:$true] %s14_s11 }
   0x5   :  { %s16_s13 = sshll.u32 %s2302_s12, 4  ;;  %s28_s16 = sshll.u32 %s4071_s1, 4  ;;  %s17_s13 = int_to_ptr.vmem [resolvable:$true] %s16_s13  ;;  %s29_s16 = int_to_ptr.hbm [resolvable:$true] %s28_s16 }
   0x6   :  { %s2303_s17 = smov 128   ;;  %s2304_s18 = smov 8  }
   0x7   :  { %22 = dma.hbm_to_vmem [thread:$0]  %s15_s11, 1024, %s17_s13, [#allocation3], %s2303_s17, %s2303_s17, %s2304_s18  }
   0x8   :  { %s2305_s19 = smov [#allocation6]  }
   0x9   :  { %31 = dma.hbm_to_smem %s29_s16, 64, %s2305_s19, [#allocation5]  }
   0xa   :  { %2296 = dma.done.wait [#allocation3], 1024  }
   0xb   :  { %2297 = vsyncadd [#allocation3], 4294966272 }
   0xc   :  { %2298 = dma.done.wait [#allocation5], 64  }
   0xd   :  { %2299 = vsyncadd [#allocation5], 4294967232 }
   0xe   :  { %40 = sfence }
   0xf   :  { %s2328_s0 = sld [smem:[#allocation6]]  ;;  %v41_v0 = vld [vmem:[#allocation2] sm:$0xff]  ;;  %v43_v1 = vld [vmem:[#allocation2 + $0x8] sm:$0xff]  ;;  %v45_v8 = vld [vmem:[#allocation2 + $0x10] sm:$0xff] }
  0x10   :  { %s2330_s20 = sld [smem:[#allocation6 + $0x1]]  ;;  %v47_v18 = vld [vmem:[#allocation2 + $0x18] sm:$0xff]  ;;  %v49_v28 = vld [vmem:[#allocation2 + $0x20] sm:$0xff]  ;;  %v51_v38 = vld [vmem:[#allocation2 + $0x28] sm:$0xff] }
  0x11   :  { %s2332_s21 = sld [smem:[#allocation6 + $0x2]]  ;;  %v53_v48 = vld [vmem:[#allocation2 + $0x30] sm:$0xff]  ;;  %v55_v58 = vld [vmem:[#allocation2 + $0x38] sm:$0xff] }
  0x12   :  { %s2334_s22 = sld [smem:[#allocation6 + $0x3]] }
  0x13   :  { %s2336_s1 = sld [smem:[#allocation6 + $0x4]] }
  0x14   :  { %s2338_s23 = sld [smem:[#allocation6 + $0x5]] }
  0x15   :  { %s2340_s24 = sld [smem:[#allocation6 + $0x6]]  ;;  %v57_v2 = vstv %s2328_s0 }
  0x16   :  { %s2342_s25 = sld [smem:[#allocation6 + $0x7]]  ;;  %v60_v3 = vstv %s2330_s20  ;;  %v58_v6 = vmul.f32 %v57_v2, %v41_v0 }
  0x17   :  { %s2344_s26 = sld [smem:[#allocation6 + $0x18]]  ;;  %v61_v7 = vmul.f32 %v60_v3, %v43_v1  ;;  %v64_v9 = vstv %s2332_s21 }
  0x18   :  { %s2346_s27 = sld [smem:[#allocation6 + $0x8]]  ;;  %v65_v16 = vmul.f32 %v64_v9, %v45_v8  ;;  %v68_v17 = vstv %s2334_s22 }
  0x19   :  { %s2348_s28 = sld [smem:[#allocation6 + $0x9]]  ;;  %v62_v15 = vadd.f32 %v61_v7, %v58_v6  ;;  %v69_v26 = vmul.f32 %v68_v17, %v47_v18  ;;  %v72_v27 = vstv %s2336_s1 }
  0x1a   :  { %s2350_s29 = sld [smem:[#allocation6 + $0xa]]  ;;  %v73_v36 = vmul.f32 %v72_v27, %v49_v28  ;;  %v76_v37 = vstv %s2338_s23 }
  0x1b   :  { %s2352_s30 = sld [smem:[#allocation6 + $0xb]]  ;;  %v66_v25 = vadd.f32 %v65_v16, %v62_v15  ;;  %v77_v46 = vmul.f32 %v76_v37, %v51_v38  ;;  %v80_v47 = vstv %s2340_s24 }
  0x1c   :  { %4080 = sst [smem:[#allocation11_spill]] %s2342_s25  ;;  %v81_v56 = vmul.f32 %v80_v47, %v53_v48 }
  0x1d   :  { %4081 = sst [smem:[#allocation12_spill]] %s2344_s26  ;;  %v70_v35 = vadd.f32 %v69_v26, %v66_v25 }
  0x1e   :  { %s2354_s3 = sld [smem:[#allocation6 + $0xc]]  ;;  %v92_v4 = vstv %s2346_s27 }
  0x1f   :  { %s2356_s4 = sld [smem:[#allocation6 + $0xd]]  ;;  %v95_v5 = vstv %s2348_s28  ;;  %v93_v10 = vmul.f32 %v92_v4, %v41_v0  ;;  %v74_v45 = vadd.f32 %v73_v36, %v70_v35 }
  0x20   :  { %s2358_s5 = sld [smem:[#allocation6 + $0xe]]  ;;  %v96_v11 = vmul.f32 %v95_v5, %v43_v1  ;;  %v99_v12 = vstv %s2350_s29 }
  0x21   :  { %s2360_s6 = sld [smem:[#allocation6 + $0xf]]  ;;  %v100_v20 = vmul.f32 %v99_v12, %v45_v8  ;;  %v103_v23 = vstv %s2352_s30  ;;  %v78_v55 = vadd.f32 %v77_v46, %v74_v45 }
  0x22   :  { %s2362_s7 = sld [smem:[#allocation6 + $0x19]]  ;;  %v97_v19 = vadd.f32 %v96_v11, %v93_v10  ;;  %v104_v30 = vmul.f32 %v103_v23, %v47_v18 }
  0x23   :  { %s2364_s8 = sld [smem:[#allocation6 + $0x10]] }
  0x24   :  { %s2366_s9 = sld [smem:[#allocation6 + $0x11]]  ;;  %v101_v29 = vadd.f32 %v100_v20, %v97_v19  ;;  %v107_v33 = vstv %s2354_s3 }
  0x25   :  { %s2368_s10 = sld [smem:[#allocation6 + $0x12]]  ;;  %v108_v40 = vmul.f32 %v107_v33, %v49_v28  ;;  %v111_v43 = vstv %s2356_s4 }
  0x26   :  { %s2370_s11 = sld [smem:[#allocation6 + $0x13]]  ;;  %v105_v39 = vadd.f32 %v104_v30, %v101_v29  ;;  %v112_v50 = vmul.f32 %v111_v43, %v51_v38  ;;  %v115_v53 = vstv %s2358_s5 }
  0x27   :  { %4082 = sst [smem:[#allocation13_spill]] %s2360_s6  ;;  %v116_v60 = vmul.f32 %v115_v53, %v53_v48 }
  0x28   :  { %4083 = sst [smem:[#allocation14_spill]] %s2362_s7  ;;  %v109_v49 = vadd.f32 %v108_v40, %v105_v39 }
  0x29   :  { %s2372_s12 = sld [smem:[#allocation6 + $0x14]]  ;;  %v127_v13 = vstv %s2364_s8 }
  0x2a   :  { %s2374_s13 = sld [smem:[#allocation6 + $0x15]]  ;;  %v130_v14 = vstv %s2366_s9  ;;  %v128_v21 = vmul.f32 %v127_v13, %v41_v0  ;;  %v113_v59 = vadd.f32 %v112_v50, %v109_v49 }
  0x2b   :  { %s2376_s14 = sld [smem:[#allocation6 + $0x16]]  ;;  %v131_v22 = vmul.f32 %v130_v14, %v43_v1  ;;  %v134_v24 = vstv %s2368_s10  ;;  %v82_v1 = vadd.f32 %v81_v56, %v78_v55 }
  0x2c   :  { %s2378_s15 = sld [smem:[#allocation6 + $0x17]]  ;;  %v135_v32 = vmul.f32 %v134_v24, %v45_v8  ;;  %v138_v34 = vstv %s2370_s11  ;;  %v117_v3 = vadd.f32 %v116_v60, %v113_v59 }
  0x2d   :  { %s2380_s16 = sld [smem:[#allocation6 + $0x1a]]  ;;  %v132_v31 = vadd.f32 %v131_v22, %v128_v21  ;;  %v139_v42 = vmul.f32 %v138_v34, %v47_v18 }
  0x2e   :  { %s2382_s17 = sld [smem:[#allocation6 + $0x1b]] }
  0x2f   :  { %s2384_s18 = sld [smem:[#allocation6 + $0x1c]]  ;;  %v136_v41 = vadd.f32 %v135_v32, %v132_v31  ;;  %v142_v44 = vstv %s2372_s12 }
  0x30   :  { %s2386_s19 = sld [smem:[#allocation6 + $0x1d]]  ;;  %v143_v52 = vmul.f32 %v142_v44, %v49_v28  ;;  %v146_v54 = vstv %s2374_s13 }
  0x31   :  { %4084 = sst [smem:[#allocation15_spill]] %s2376_s14  ;;  %v140_v51 = vadd.f32 %v139_v42, %v136_v41  ;;  %v147_v62 = vmul.f32 %v146_v54, %v51_v38 }
  0x32   :  { %4085 = sst [smem:[#allocation16_spill]] %s2378_s15 }
  0x33   :  { %4086 = sst [smem:[#allocation17_spill]] %s2380_s16  ;;  %v144_v61 = vadd.f32 %v143_v52, %v140_v51 }
  0x34   :  { %4087 = sst [smem:[#allocation18_spill]] %s2382_s17 }
  0x35   :  { %4088 = sst [smem:[#allocation19_spill]] %s2384_s18  ;;  %v148_v5 = vadd.f32 %v147_v62, %v144_v61 }
  0x36   :  { %4089 = sst [smem:[#allocation20_spill]] %s2386_s19 }
  0x37   :  { %s2388_s2 = sld [smem:[#allocation6 + $0x36]] }
  0x38   :  { %s2390_s7 = sld [smem:[#allocation6 + $0x1e]] }
  0x39   :  { %s2392_s26 = sld [smem:[#allocation6 + $0x1f]] }
  0x3a   :  { %s2394_s6 = sld [smem:[#allocation6 + $0x20]] }
  0x3b   :  { %s2396_s25 = sld [smem:[#allocation6 + $0x37]] }
  0x3c   :  { %s2398_s14 = sld [smem:[#allocation6 + $0x21]] }
  0x3d   :  { %4090 = sst [smem:[#allocation21_spill]] %s2388_s2 }
  0x3e   :  { %4091 = sst [smem:[#allocation22_spill]] %s2390_s7 }
  0x3f   :  { %4092 = sst [smem:[#allocation23_spill]] %s2392_s26 }
  0x40   :  { %4093 = sst [smem:[#allocation24_spill]] %s2394_s6 }
  0x41   :  { %4094 = sst [smem:[#allocation25_spill]] %s2396_s25 }
  0x42   :  { %4095 = sst [smem:[#allocation26_spill]] %s2398_s14 }
  0x43   :  { %s2400_s15 = sld [smem:[#allocation6 + $0x22]] }
  0x44   :  { %s2402_s16 = sld [smem:[#allocation6 + $0x23]] }
  0x45   :  { %s2404_s17 = sld [smem:[#allocation6 + $0x38]] }
  0x46   :  { %s2406_s18 = sld [smem:[#allocation6 + $0x24]] }
  0x47   :  { %s2408_s19 = sld [smem:[#allocation6 + $0x25]] }
  0x48   :  { %s2410_s2 = sld [smem:[#allocation6 + $0x26]] }
  0x49   :  { %4096 = sst [smem:[#allocation27_spill]] %s2400_s15 }
  0x4a   :  { %4097 = sst [smem:[#allocation28_spill]] %s2402_s16 }
  0x4b   :  { %4098 = sst [smem:[#allocation29_spill]] %s2404_s17 }
  0x4c   :  { %4099 = sst [smem:[#allocation30_spill]] %s2406_s18 }
  0x4d   :  { %4100 = sst [smem:[#allocation31_spill]] %s2408_s19 }
  0x4e   :  { %4101 = sst [smem:[#allocation32_spill]] %s2410_s2 }
  0x4f   :  { %s2412_s7 = sld [smem:[#allocation6 + $0x39]] }
  0x50   :  { %s2414_s26 = sld [smem:[#allocation6 + $0x27]] }
  0x51   :  { %s2416_s6 = sld [smem:[#allocation6 + $0x28]] }
  0x52   :  { %s2418_s25 = sld [smem:[#allocation6 + $0x29]] }
  0x53   :  { %s2420_s14 = sld [smem:[#allocation6 + $0x3a]] }
  0x54   :  { %s2422_s15 = sld [smem:[#allocation6 + $0x2a]] }
  0x55   :  { %4102 = sst [smem:[#allocation33_spill]] %s2412_s7 }
  0x56   :  { %4103 = sst [smem:[#allocation34_spill]] %s2414_s26 }
  0x57   :  { %4104 = sst [smem:[#allocation35_spill]] %s2416_s6 }
  0x58   :  { %4105 = sst [smem:[#allocation36_spill]] %s2418_s25 }
  0x59   :  { %4106 = sst [smem:[#allocation37_spill]] %s2420_s14 }
  0x5a   :  { %4107 = sst [smem:[#allocation38_spill]] %s2422_s15 }
  0x5b   :  { %s2424_s16 = sld [smem:[#allocation6 + $0x2b]] }
  0x5c   :  { %s2426_s17 = sld [smem:[#allocation6 + $0x2c]] }
  0x5d   :  { %s2428_s18 = sld [smem:[#allocation6 + $0x3b]] }
  0x5e   :  { %s2430_s19 = sld [smem:[#allocation6 + $0x2d]] }
  0x5f   :  { %s2432_s2 = sld [smem:[#allocation6 + $0x2e]] }
  0x60   :  { %s2434_s7 = sld [smem:[#allocation6 + $0x2f]] }
  0x61   :  { %4108 = sst [smem:[#allocation39_spill]] %s2424_s16 }
  0x62   :  { %4109 = sst [smem:[#allocation40_spill]] %s2426_s17 }
  0x63   :  { %4110 = sst [smem:[#allocation41_spill]] %s2428_s18 }
  0x64   :  { %s2436_s26 = sld [smem:[#allocation6 + $0x3c]] }
  0x65   :  { %4111 = sst [smem:[#allocation42_spill]] %s2432_s2 }
  0x66   :  { %4112 = sst [smem:[#allocation43_spill]] %s2434_s7 }
  0x67   :  { %s2438_s6 = sld [smem:[#allocation6 + $0x30]] }
  0x68   :  { %s2440_s25 = sld [smem:[#allocation6 + $0x31]] }
  0x69   :  { %s2442_s14 = sld [smem:[#allocation6 + $0x32]] }
  0x6a   :  { %4113 = sst [smem:[#allocation44_spill]] %s2436_s26 }
  0x6b   :  { %s2444_s15 = sld [smem:[#allocation6 + $0x3d]] }
  0x6c   :  { %s2446_s16 = sld [smem:[#allocation6 + $0x33]] }
  0x6d   :  { %4114 = sst [smem:[#allocation45_spill]] %s2438_s6 }
  0x6e   :  { %4115 = sst [smem:[#allocation46_spill]] %s2440_s25 }
  0x6f   :  { %4116 = sst [smem:[#allocation47_spill]] %s2442_s14 }
  0x70   :  { %s2448_s17 = sld [smem:[#allocation6 + $0x34]] }
  0x71   :  { %4117 = sst [smem:[#allocation48_spill]] %s2444_s15 }
  0x72   :  { %4118 = sst [smem:[#allocation49_spill]] %s2446_s16 }
  0x73   :  { %s2450_s18 = sld [smem:[#allocation6 + $0x35]] }
  0x74   :  { %s2452_s2 = sld [smem:[#allocation6 + $0x3e]] }
  0x75   :  { %s2454_s7 = sld [smem:[#allocation6 + $0x3f]] }
  0x76   :  { %4119 = sst [smem:[#allocation50_spill]] %s2448_s17 }
  0x77   :  { %s2456_s26 = sld [smem:[#allocation6 + $0x40]] }
  0x78   :  { %s2458_s25 = sld [smem:[#allocation6 + $0x41]] }
  0x79   :  { %4120 = sst [smem:[#allocation51_spill]] %s2450_s18 }
  0x7a   :  { %4121 = sst [smem:[#allocation52_spill]] %s2452_s2 }
  0x7b   :  { %4122 = sst [smem:[#allocation53_spill]] %s2454_s7 }
  0x7c   :  { %s2460_s14 = sld [smem:[#allocation6 + $0x42]] }
  0x7d   :  { %s2462_s15 = sld [smem:[#allocation6 + $0x43]] }
  0x7e   :  { %s2464_s16 = sld [smem:[#allocation6 + $0x44]] }
  0x7f   :  { %s2466_s17 = sld [smem:[#allocation6 + $0x45]] }
  0x80   :  { %s2468_s18 = sld [smem:[#allocation6 + $0x46]] }
  0x81   :  { %s2470_s6 = sld [smem:[#allocation6 + $0x47]] }
  0x82   :  { %s2472_s2 = sld [smem:[#allocation6 + $0xe1]] }
  0x83   :  { %4123 = sst [smem:[#allocation54_spill]] %s2462_s15 }
  0x84   :  { %s2474_s7 = sld [smem:[#allocation6 + $0x48]] }
  0x85   :  { %4124 = sst [smem:[#allocation55_spill]] %s2466_s17 }
  0x86   :  { %4125 = sst [smem:[#allocation56_spill]] %s2468_s18 }
  0x87   :  { %4126 = sst [smem:[#allocation57_spill]] %s2470_s6 }
  0x88   :  { %4127 = sst [smem:[#allocation58_spill]] %s2472_s2 }
  0x89   :  { %s2478_s15 = sld [smem:[#allocation6 + $0x49]] }
  0x8a   :  { %s2482_s17 = sld [smem:[#allocation6 + $0x4a]] }
  0x8b   :  { %s2484_s18 = sld [smem:[#allocation6 + $0x4b]] }
  0x8c   :  { %s2486_s2 = sld [smem:[#allocation6 + $0x4c]] }
  0x8d   :  { %s2489_s0 = sld [smem:[#allocation6 + $0x4d]] }
  0x8e   :  { %s2494_s20 = sld [smem:[#allocation6 + $0x4e]] }
  0x8f   :  { %s2496_s27 = sld [smem:[#allocation6 + $0x4f]] }
  0x90   :  { %s2499_s28 = sld [smem:[#allocation6 + $0x50]] }
  0x91   :  { %s2501_s21 = sld [smem:[#allocation6 + $0xe2]] }
  0x92   :  { %s2505_s29 = sld [smem:[#allocation6 + $0x51]] }
  0x93   :  { %s2507_s8 = sld [smem:[#allocation6 + $0x52]] }
  0x94   :  { %s2510_s22 = sld [smem:[#allocation6 + $0x53]] }
  0x95   :  { %4128 = sst [smem:[#allocation59_spill]] %s2496_s27 }
  0x96   :  { %4129 = sst [smem:[#allocation60_spill]] %s2499_s28 }
  0x97   :  { %4130 = sst [smem:[#allocation61_spill]] %s2501_s21 }
  0x98   :  { %s2512_s9 = sld [smem:[#allocation6 + $0x54]] }
  0x99   :  { %s2516_s30 = sld [smem:[#allocation6 + $0x55]] }
  0x9a   :  { %s2518_s10 = sld [smem:[#allocation6 + $0x56]] }
  0x9b   :  { %s2521_s1 = sld [smem:[#allocation6 + $0x57]] }
  0x9c   :  { %s2523_s21 = sld [smem:[#allocation6 + $0x58]] }
  0x9d   :  { %s2527_s3 = sld [smem:[#allocation6 + $0x59]] }
  0x9e   :  { %s2529_s11 = sld [smem:[#allocation6 + $0xe3]] }
  0x9f   :  { %s4136_s28 = sld [smem:[#allocation11_spill]] }
  0xa0   :  { %4131 = sst [smem:[#allocation62_spill]] %s2518_s10 }
  0xa1   :  { %4132 = sst [smem:[#allocation63_spill]] %s2521_s1 }
  0xa2   :  { %4133 = sst [smem:[#allocation64_spill]] %s2523_s21 }
  0xa3   :  { %4134 = sst [smem:[#allocation65_spill]] %s2527_s3 }
  0xa4   :  { %4135 = sst [smem:[#allocation66_spill]] %s2529_s11 }
  0xa5   :  { %s2532_s23 = sld [smem:[#allocation6 + $0x5a]]  ;;  %v84_v57 = vstv %s4136_s28 }
  0xa6   :  { %s4138_s1 = sld [smem:[#allocation13_spill]]  ;;  %v85_v2 = vmul.f32 %v84_v57, %v55_v58 }
  0xa7   :  { %s2534_s21 = sld [smem:[#allocation6 + $0x5b]] }
  0xa8   :  { %s4140_s4 = sld [smem:[#allocation15_spill]]  ;;  %v86_v8 = vadd.f32 %v85_v2, %v82_v1 }
  0xa9   :  { %s2538_s12 = sld [smem:[#allocation6 + $0x5c]] }
  0xaa   :  { %s2540_s11 = sld [smem:[#allocation6 + $0x5d]] }
  0xab   :  { %4137 = sst [smem:[#allocation11_spill]] %s2532_s23 }
  0xac   :  { %s2543_s24 = sld [smem:[#allocation6 + $0x5e]]  ;;  %v119_v63 = vstv %s4138_s1 }
  0xad   :  { %4139 = sst [smem:[#allocation13_spill]] %s2534_s21  ;;  %v120_v4 = vmul.f32 %v119_v63, %v55_v58 }
  0xae   :  { %s4144_s3 = sld [smem:[#allocation16_spill]]  ;;  %v150_v0 = vstv %s4140_s4 }
  0xaf   :  { %4141 = sst [smem:[#allocation15_spill]] %s2538_s12  ;;  %v151_v6 = vmul.f32 %v150_v0, %v53_v48  ;;  %v121_v10 = vadd.f32 %v120_v4, %v117_v3 }
  0xb0   :  { %4142 = sst [smem:[#allocation67_spill]] %s2540_s11 }
  0xb1   :  { %s2545_s23 = sld [smem:[#allocation6 + $0x5f]]  ;;  %v152_v11 = vadd.f32 %v151_v6, %v148_v5 }
  0xb2   :  { %4143 = sst [smem:[#allocation68_spill]] %s2543_s24 }
  0xb3   :  { %s4146_s5 = sld [smem:[#allocation12_spill]] }
  0xb4   :  { %s2549_s13 = sld [smem:[#allocation6 + $0x60]]  ;;  %v154_v7 = vstv %s4144_s3 }
  0xb5   :  { %s2551_s12 = sld [smem:[#allocation6 + $0x61]]  ;;  %v155_v12 = vmul.f32 %v154_v7, %v55_v58 }
  0xb6   :  { %s2553_s28 = sld [smem:[#allocation6 + $0x62]] }
  0xb7   :  { %4145 = sst [smem:[#allocation16_spill]] %s2545_s23  ;;  %v156_v16 = vadd.f32 %v155_v12, %v152_v11 }
  0xb8   :  { %s4150_s24 = sld [smem:[#allocation14_spill]] }
  0xb9   :  { %s2555_s11 = sld [smem:[#allocation6 + $0xe4]]  ;;  %v88_v9 = vstv %s4146_s5 }
  0xba   :  { %4147 = sst [smem:[#allocation12_spill]] %s2549_s13  ;;  %v89_v14 = vadd.f32 %v88_v9, %v86_v8  ;;  %v252_v8 = vstv %s2430_s19 }
  0xbb   :  { %4148 = sst [smem:[#allocation69_spill]] %s2551_s12 }
  0xbc   :  { %4149 = sst [smem:[#allocation70_spill]] %s2553_s28  ;;  %2158 = vtanh.f32 %v89_v14 }
  0xbd   :  { %s2558_s23 = sld [smem:[#allocation6 + $0x63]] }
  0xbe   :  { %s2560_s1 = sld [smem:[#allocation6 + $0x64]]  ;;  %v123_v13 = vstv %s4150_s24 }
  0xbf   :  { %4151 = sst [smem:[#allocation14_spill]] %s2555_s11  ;;  %v124_v15 = vadd.f32 %v123_v13, %v121_v10 }
  0xc0   :  { %s4154_s4 = sld [smem:[#allocation17_spill]] }
  0xc1   :  { %s2562_s13 = sld [smem:[#allocation6 + $0x65]]  ;;  %2160 = vtanh.f32 %v124_v15 }
  0xc2   :  { %s2565_s28 = sld [smem:[#allocation6 + $0x66]]  ;;  %v2593_v19 = vpop.eup %2158 }
  0xc3   :  { %4152 = sst [smem:[#allocation71_spill]] %s2558_s23  ;;  %v253_v15 = vmul.f32 %v2593_v19, %v252_v8 }
  0xc4   :  { %4153 = sst [smem:[#allocation72_spill]] %s2560_s1 }
  0xc5   :  { %s2568_s12 = sld [smem:[#allocation6 + $0x67]] }
  0xc6   :  { %s2570_s21 = sld [smem:[#allocation6 + $0x68]]  ;;  %v158_v17 = vstv %s4154_s4 }
  0xc7   :  { %4155 = sst [smem:[#allocation17_spill]] %s2562_s13  ;;  %v159_v18 = vadd.f32 %v158_v17, %v156_v16  ;;  %v2597_v20 = vpop.eup %2160 }
  0xc8   :  { %4156 = sst [smem:[#allocation73_spill]] %s2565_s28 }
  0xc9   :  { %s2572_s3 = sld [smem:[#allocation6 + $0x69]]  ;;  %2162 = vtanh.f32 %v159_v18 }
  0xca   :  { %s2574_s11 = sld [smem:[#allocation6 + $0x6a]] }
  0xcb   :  { %4157 = sst [smem:[#allocation74_spill]] %s2568_s12 }
  0xcc   :  { %4158 = sst [smem:[#allocation75_spill]] %s2570_s21 }
  0xcd   :  { %s4161_s13 = sld [smem:[#allocation18_spill]] }
  0xce   :  { %s2577_s5 = sld [smem:[#allocation6 + $0x6b]] }
  0xcf   :  { %4159 = sst [smem:[#allocation76_spill]] %s2572_s3  ;;  %v2615_v29 = vpop.eup %2162 }
  0xd0   :  { %4160 = sst [smem:[#allocation77_spill]] %s2574_s11 }
  0xd1   :  { %s4163_s1 = sld [smem:[#allocation19_spill]] }
  0xd2   :  { %s2579_s23 = sld [smem:[#allocation6 + $0xe5]] }
  0xd3   :  { %s4165_s24 = sld [smem:[#allocation22_spill]]  ;;  %v162_v21 = vstv %s4161_s13 }
  0xd4   :  { %4162 = sst [smem:[#allocation18_spill]] %s2577_s5  ;;  %v163_v25 = vmul.f32 %v2593_v19, %v162_v21 }
  0xd5   :  { %s2581_s28 = sld [smem:[#allocation6 + $0x6c]] }
  0xd6   :  { %s4167_s12 = sld [smem:[#allocation23_spill]] }
  0xd7   :  { %s2583_s21 = sld [smem:[#allocation6 + $0x6d]]  ;;  %v165_v22 = vstv %s4163_s1 }
  0xd8   :  { %4164 = sst [smem:[#allocation19_spill]] %s2579_s23  ;;  %v166_v26 = vmul.f32 %v2597_v20, %v165_v22 }
  0xd9   :  { %s2585_s3 = sld [smem:[#allocation6 + $0x6e]]  ;;  %v177_v23 = vstv %s4165_s24 }
  0xda   :  { %s2587_s10 = sld [smem:[#allocation6 + $0x6f]]  ;;  %v178_v31 = vmul.f32 %v2593_v19, %v177_v23  ;;  %v167_v36 = vadd.f32 %v166_v26, %v163_v25 }
  0xdb   :  { %4166 = sst [smem:[#allocation22_spill]] %s2581_s28 }
  0xdc   :  { %s4171_s4 = sld [smem:[#allocation26_spill]]  ;;  %v180_v24 = vstv %s4167_s12 }
  0xdd   :  { %4168 = sst [smem:[#allocation23_spill]] %s2583_s21  ;;  %v181_v32 = vmul.f32 %v2597_v20, %v180_v24 }
  0xde   :  { %s2589_s11 = sld [smem:[#allocation6 + $0x70]] }
  0xdf   :  { %4169 = sst [smem:[#allocation78_spill]] %s2585_s3  ;;  %v182_v40 = vadd.f32 %v181_v32, %v178_v31 }
  0xe0   :  { %4170 = sst [smem:[#allocation79_spill]] %s2587_s10 }
  0xe1   :  { %s4173_s5 = sld [smem:[#allocation27_spill]] }
  0xe2   :  { %s2591_s27 = sld [smem:[#allocation6 + $0x71]]  ;;  %v192_v27 = vstv %s4171_s4 }
  0xe3   :  { %s4175_s23 = sld [smem:[#allocation20_spill]]  ;;  %v193_v34 = vmul.f32 %v2593_v19, %v192_v27  ;;  %v300_v27 = vstv %s2456_s26 }
  0xe4   :  { %4172 = sst [smem:[#allocation26_spill]] %s2589_s11 }
  0xe5   :  { %s2595_s28 = sld [smem:[#allocation6 + $0x72]] }
  0xe6   :  { %s4177_s21 = sld [smem:[#allocation24_spill]] }
  0xe7   :  { %s2601_s3 = sld [smem:[#allocation6 + $0x73]]  ;;  %v195_v28 = vstv %s4173_s5 }
  0xe8   :  { %4174 = sst [smem:[#allocation27_spill]] %s2591_s27  ;;  %v196_v35 = vmul.f32 %v2597_v20, %v195_v28 }
  0xe9   :  { %s2605_s10 = sld [smem:[#allocation6 + $0x74]]  ;;  %v169_v30 = vstv %s4175_s23 }
  0xea   :  { %s2607_s11 = sld [smem:[#allocation6 + $0xe6]]  ;;  %v170_v37 = vmul.f32 %v2615_v29, %v169_v30  ;;  %v197_v43 = vadd.f32 %v196_v35, %v193_v34 }
  0xeb   :  { %4176 = sst [smem:[#allocation20_spill]] %s2595_s28 }
  0xec   :  { %s4181_s27 = sld [smem:[#allocation30_spill]]  ;;  %v184_v33 = vstv %s4177_s21  ;;  %v171_v47 = vadd.f32 %v170_v37, %v167_v36 }
  0xed   :  { %4178 = sst [smem:[#allocation24_spill]] %s2601_s3  ;;  %v185_v41 = vmul.f32 %v2615_v29, %v184_v33 }
  0xee   :  { %s4182_s28 = sld [smem:[#allocation31_spill]] }
  0xef   :  { %4179 = sst [smem:[#allocation80_spill]] %s2605_s10  ;;  %v186_v52 = vadd.f32 %v185_v41, %v182_v40  ;;  %v304_v41 = vstv %s2458_s25 }
  0xf0   :  { %4180 = sst [smem:[#allocation81_spill]] %s2607_s11 }
  0xf1   :  { %s2613_s6 = sld [smem:[#allocation6 + $0x75]] }
  0xf2   :  { %s4183_s13 = sld [smem:[#allocation28_spill]]  ;;  %v207_v38 = vstv %s4181_s27 }
  0xf3   :  { %s2620_s12 = sld [smem:[#allocation6 + $0x76]]  ;;  %v208_v44 = vmul.f32 %v2593_v19, %v207_v38 }
  0xf4   :  { %s2623_s1 = sld [smem:[#allocation6 + $0x77]]  ;;  %v210_v39 = vstv %s4182_s28 }
  0xf5   :  { %s4186_s24 = sld [smem:[#allocation32_spill]]  ;;  %v211_v45 = vmul.f32 %v2597_v20, %v210_v39 }
  0xf6   :  { %s2627_s5 = sld [smem:[#allocation6 + $0x78]] }
  0xf7   :  { %s4188_s23 = sld [smem:[#allocation34_spill]]  ;;  %v212_v54 = vadd.f32 %v211_v45, %v208_v44  ;;  %v336_v44 = vstv %s2474_s7  ;;  %v339_v45 = vstv %s2478_s15 }
  0xf8   :  { %s4189_s4 = sld [smem:[#allocation35_spill]]  ;;  %v199_v42 = vstv %s4183_s13 }
  0xf9   :  { %4184 = sst [smem:[#allocation30_spill]] %s2620_s12  ;;  %v200_v48 = vmul.f32 %v2615_v29, %v199_v42 }
  0xfa   :  { %4185 = sst [smem:[#allocation31_spill]] %s2623_s1 }
  0xfb   :  { %s2632_s11 = sld [smem:[#allocation6 + $0x79]]  ;;  %v214_v46 = vstv %s4186_s24  ;;  %v201_v59 = vadd.f32 %v200_v48, %v197_v43 }
  0xfc   :  { %4187 = sst [smem:[#allocation28_spill]] %s2627_s5  ;;  %v215_v55 = vmul.f32 %v2615_v29, %v214_v46 }
  0xfd   :  { %s4191_s10 = sld [smem:[#allocation21_spill]]  ;;  %v222_v49 = vstv %s4188_s23 }
  0xfe   :  { %s4192_s21 = sld [smem:[#allocation25_spill]]  ;;  %v225_v50 = vstv %s4189_s4  ;;  %v223_v56 = vmul.f32 %v2593_v19, %v222_v49  ;;  %v216_v1 = vadd.f32 %v215_v55, %v212_v54  ;;  %v308_v55 = vstv %s2460_s14 }
  0xff   :  { %s2636_s3 = sld [smem:[#allocation6 + $0x7a]]  ;;  %v226_v57 = vmul.f32 %v2597_v20, %v225_v50 }
 0x100   :  { %s2638_s1 = sld [smem:[#allocation6 + $0x7b]] }
 0x101   :  { %4190 = sst [smem:[#allocation32_spill]] %s2632_s11  ;;  %v227_v2 = vadd.f32 %v226_v57, %v223_v56 }
 0x102   :  { %s2643_s27 = sld [smem:[#allocation6 + $0x7c]] }
 0x103   :  { %s4196_s28 = sld [smem:[#allocation36_spill]]  ;;  %v173_v51 = vstv %s4191_s10 }
 0x104   :  { %s2648_s13 = sld [smem:[#allocation6 + $0x7d]]  ;;  %v188_v53 = vstv %s4192_s21  ;;  %v174_v58 = vadd.f32 %v173_v51, %v171_v47 }
 0x105   :  { %4193 = sst [smem:[#allocation34_spill]] %s2636_s3  ;;  %v189_v61 = vadd.f32 %v188_v53, %v186_v52 }
 0x106   :  { %4194 = sst [smem:[#allocation35_spill]] %s2638_s1  ;;  %2164 = vtanh.f32 %v174_v58 }
 0x107   :  { %s4198_s11 = sld [smem:[#allocation29_spill]]  ;;  %2166 = vtanh.f32 %v189_v61 }
 0x108   :  { %4195 = sst [smem:[#allocation21_spill]] %s2643_s27 }
 0x109   :  { %s4199_s3 = sld [smem:[#allocation38_spill]]  ;;  %v229_v60 = vstv %s4196_s28 }
 0x10a   :  { %4197 = sst [smem:[#allocation25_spill]] %s2648_s13  ;;  %v230_v3 = vmul.f32 %v2615_v29, %v229_v60 }
 0x10b   :  { %s4200_s1 = sld [smem:[#allocation39_spill]] }
 0x10c   :  { %s2651_s5 = sld [smem:[#allocation6 + $0xe7]]  ;;  %v231_v11 = vadd.f32 %v230_v3, %v227_v2  ;;  %v2697_v21 = vpop.eup %2164 }
 0x10d   :  { %s2654_s12 = sld [smem:[#allocation6 + $0x7e]]  ;;  %v203_v62 = vstv %s4198_s11  ;;  %v2703_v24 = vpop.eup %2166  ;;  %v337_v56 = vmul.f32 %v2697_v21, %v336_v44 }
 0x10e   :  { %s2659_s24 = sld [smem:[#allocation6 + $0x7f]]  ;;  %v204_v4 = vadd.f32 %v203_v62, %v201_v59  ;;  %v301_v39 = vmul.f32 %v2703_v24, %v300_v27 }
 0x10f   :  { %s2662_s10 = sld [smem:[#allocation6 + $0x80]]  ;;  %v237_v63 = vstv %s4199_s3 }
 0x110   :  { %s4204_s23 = sld [smem:[#allocation40_spill]]  ;;  %v238_v5 = vmul.f32 %v2593_v19, %v237_v63  ;;  %2168 = vtanh.f32 %v204_v4  ;;  %v347_v4 = vstv %s2484_s18 }
 0x111   :  { %s4205_s4 = sld [smem:[#allocation42_spill]]  ;;  %v240_v0 = vstv %s4200_s1 }
 0x112   :  { %4201 = sst [smem:[#allocation36_spill]] %s2651_s5  ;;  %v241_v6 = vmul.f32 %v2597_v20, %v240_v0 }
 0x113   :  { %s2667_s21 = sld [smem:[#allocation6 + $0x81]] }
 0x114   :  { %4202 = sst [smem:[#allocation29_spill]] %s2659_s24  ;;  %v242_v13 = vadd.f32 %v241_v6, %v238_v5 }
 0x115   :  { %4203 = sst [smem:[#allocation38_spill]] %s2662_s10 }
 0x116   :  { %s4207_s5 = sld [smem:[#allocation33_spill]]  ;;  %v244_v7 = vstv %s4204_s23  ;;  %v2724_v40 = vpop.eup %2168 }
 0x117   :  { %s2669_s13 = sld [smem:[#allocation6 + $0x82]]  ;;  %v255_v9 = vstv %s4205_s4  ;;  %v245_v14 = vmul.f32 %v2615_v29, %v244_v7  ;;  %v305_v53 = vmul.f32 %v2724_v40, %v304_v41 }
 0x118   :  { %s4209_s27 = sld [smem:[#allocation37_spill]]  ;;  %v256_v16 = vmul.f32 %v2597_v20, %v255_v9 }
 0x119   :  { %4206 = sst [smem:[#allocation39_spill]] %s2667_s21  ;;  %v246_v28 = vadd.f32 %v245_v14, %v242_v13 }
 0x11a   :  { %s2672_s28 = sld [smem:[#allocation6 + $0x83]]  ;;  %v257_v31 = vadd.f32 %v256_v16, %v253_v15  ;;  %v351_v15 = vstv %s2486_s2 }
 0x11b   :  { %s2676_s11 = sld [smem:[#allocation6 + $0x84]] }
 0x11c   :  { %s4211_s3 = sld [smem:[#allocation43_spill]]  ;;  %v218_v10 = vstv %s4207_s5 }
 0x11d   :  { %4208 = sst [smem:[#allocation40_spill]] %s2669_s13  ;;  %v219_v17 = vadd.f32 %v218_v10, %v216_v1  ;;  %v375_v10 = vstv %s2505_s29 }
 0x11e   :  { %s2681_s1 = sld [smem:[#allocation6 + $0x85]]  ;;  %v233_v12 = vstv %s4209_s27 }
 0x11f   :  { %s4213_s13 = sld [smem:[#allocation45_spill]]  ;;  %v234_v25 = vadd.f32 %v233_v12, %v231_v11  ;;  %2170 = vtanh.f32 %v219_v17  ;;  %v378_v11 = vstv %s2507_s8  ;;  %v316_v12 = vstv %s2464_s16 }
 0x120   :  { %4210 = sst [smem:[#allocation42_spill]] %s2672_s28  ;;  %v376_v17 = vmul.f32 %v2697_v21, %v375_v10 }
 0x121   :  { %s4214_s21 = sld [smem:[#allocation46_spill]]  ;;  %2172 = vtanh.f32 %v234_v25  ;;  %v382_v25 = vstv %s2510_s22 }
 0x122   :  { %s2684_s10 = sld [smem:[#allocation6 + $0x86]]  ;;  %v259_v18 = vstv %s4211_s3 }
 0x123   :  { %s2687_s28 = sld [smem:[#allocation6 + $0xe8]]  ;;  %v260_v32 = vmul.f32 %v2615_v29, %v259_v18  ;;  %v379_v18 = vmul.f32 %v2703_v24, %v378_v11 }
 0x124   :  { %4212 = sst [smem:[#allocation33_spill]] %s2681_s1 }
 0x125   :  { %s4217_s24 = sld [smem:[#allocation53_spill]]  ;;  %v267_v22 = vstv %s4213_s13  ;;  %v261_v43 = vadd.f32 %v260_v32, %v257_v31  ;;  %v2743_v54 = vpop.eup %2170  ;;  %v355_v31 = vstv %s2489_s0  ;;  %v380_v32 = vadd.f32 %v379_v18, %v376_v17 }
 0x126   :  { %s4218_s19 = sld [smem:[#allocation41_spill]]  ;;  %v268_v33 = vmul.f32 %v2593_v19, %v267_v22  ;;  %v309_v0 = vmul.f32 %v2743_v54, %v308_v55  ;;  %v348_v14 = vmul.f32 %v2743_v54, %v347_v4 }
 0x127   :  { %s2692_s23 = sld [smem:[#allocation6 + $0x87]]  ;;  %v270_v23 = vstv %s4214_s21  ;;  %v2753_v57 = vpop.eup %2172 }
 0x128   :  { %4215 = sst [smem:[#allocation37_spill]] %s2684_s10  ;;  %v271_v34 = vmul.f32 %v2597_v20, %v270_v23 }
 0x129   :  { %4216 = sst [smem:[#allocation43_spill]] %s2687_s28 }
 0x12a   :  { %s2695_s5 = sld [smem:[#allocation6 + $0x88]]  ;;  %v272_v46 = vadd.f32 %v271_v34, %v268_v33  ;;  %v383_v33 = vmul.f32 %v2724_v40, %v382_v25 }
 0x12b   :  { %s4219_s27 = sld [smem:[#allocation47_spill]]  ;;  %v297_v26 = vstv %s4217_s24 }
 0x12c   :  { %s2701_s4 = sld [smem:[#allocation6 + $0x89]]  ;;  %v248_v30 = vstv %s4218_s19  ;;  %v298_v38 = vmul.f32 %v2697_v21, %v297_v26 }
 0x12d   :  { %s4220_s28 = sld [smem:[#allocation49_spill]]  ;;  %v249_v42 = vadd.f32 %v248_v30, %v246_v28  ;;  %v352_v30 = vmul.f32 %v2753_v57, %v351_v15 }
 0x12e   :  { %s4221_s10 = sld [smem:[#allocation50_spill]]  ;;  %v302_v52 = vadd.f32 %v301_v39, %v298_v38 }
 0x12f   :  { %s2707_s1 = sld [smem:[#allocation6 + $0x8a]]  ;;  %2174 = vtanh.f32 %v249_v42  ;;  %v359_v42 = vstv %s2494_s20 }
 0x130   :  { %s2711_s13 = sld [smem:[#allocation6 + $0x8b]]  ;;  %v306_v63 = vadd.f32 %v305_v53, %v302_v52 }
 0x131   :  { %v274_v35 = vstv %s4219_s27  ;;  %s2716_s24 = sld [smem:[#allocation6 + $0x8c]] }
 0x132   :  { %s4222_s26 = sld [smem:[#allocation44_spill]]  ;;  %v275_v47 = vmul.f32 %v2615_v29, %v274_v35  ;;  %v310_v8 = vadd.f32 %v309_v0, %v306_v63 }
 0x133   :  { %v282_v36 = vstv %s4220_s28  ;;  %s2722_s21 = sld [smem:[#allocation6 + $0x8d]] }
 0x134   :  { %v285_v37 = vstv %s4221_s10  ;;  %s4223_s3 = sld [smem:[#allocation51_spill]]  ;;  %v283_v48 = vmul.f32 %v2593_v19, %v282_v36  ;;  %v340_v19 = vmul.f32 %v2703_v24, %v339_v45  ;;  %v276_v59 = vadd.f32 %v275_v47, %v272_v46 }
 0x135   :  { %s2727_s19 = sld [smem:[#allocation6 + $0x8e]]  ;;  %v286_v49 = vmul.f32 %v2597_v20, %v285_v37  ;;  %v343_v20 = vstv %s2482_s17  ;;  %v2772_v7 = vpop.eup %2174  ;;  %v386_v36 = vstv %s2512_s9  ;;  %v390_v47 = vstv %s2516_s30 }
 0x136   :  { %s2731_s10 = sld [smem:[#allocation6 + $0x8f]]  ;;  %v341_v2 = vadd.f32 %v340_v19, %v337_v56  ;;  %v344_v3 = vmul.f32 %v2724_v40, %v343_v20  ;;  %v317_v23 = vmul.f32 %v2772_v7, %v316_v12  ;;  %v356_v41 = vmul.f32 %v2772_v7, %v355_v31 }
 0x137   :  { %s2736_s28 = sld [smem:[#allocation6 + $0xe9]]  ;;  %v287_v60 = vadd.f32 %v286_v49, %v283_v48  ;;  %v387_v44 = vmul.f32 %v2743_v54, %v386_v36  ;;  %v391_v55 = vmul.f32 %v2753_v57, %v390_v47 }
 0x138   :  { %v263_v50 = vstv %s4222_s26  ;;  %s4225_s25 = sld [smem:[#allocation48_spill]]  ;;  %v345_v13 = vadd.f32 %v344_v3, %v341_v2 }
 0x139   :  { %s2741_s7 = sld [smem:[#allocation6 + $0x90]]  ;;  %v264_v58 = vadd.f32 %v263_v50, %v261_v43  ;;  %v384_v43 = vadd.f32 %v383_v33, %v380_v32 }
 0x13a   :  { %v289_v51 = vstv %s4223_s3  ;;  %s4226_s15 = sld [smem:[#allocation54_spill]]  ;;  %v349_v28 = vadd.f32 %v348_v14, %v345_v13 }
 0x13b   :  { %s2748_s27 = sld [smem:[#allocation6 + $0x91]]  ;;  %v290_v61 = vmul.f32 %v2615_v29, %v289_v51  ;;  %2176 = vtanh.f32 %v264_v58  ;;  %v388_v53 = vadd.f32 %v387_v44, %v384_v43 }
 0x13c   :  { %s2751_s26 = sld [smem:[#allocation6 + $0x92]]  ;;  %v353_v39 = vadd.f32 %v352_v30, %v349_v28 }
 0x13d   :  { %4224 = sst [smem:[#allocation45_spill]] %s2736_s28  ;;  %v291_v5 = vadd.f32 %v290_v61, %v287_v60  ;;  %v392_v61 = vadd.f32 %v391_v55, %v388_v53 }
 0x13e   :  { %s4228_s3 = sld [smem:[#allocation52_spill]]  ;;  %v278_v62 = vstv %s4225_s25  ;;  %v357_v50 = vadd.f32 %v356_v41, %v353_v39 }
 0x13f   :  { %s2756_s14 = sld [smem:[#allocation6 + $0x93]]  ;;  %v279_v29 = vadd.f32 %v278_v62, %v276_v59 }
 0x140   :  { %s2760_s28 = sld [smem:[#allocation6 + $0x94]]  ;;  %v312_v1 = vstv %s4226_s15 }
 0x141   :  { %s2764_s17 = sld [smem:[#allocation6 + $0x95]]  ;;  %v313_v9 = vmul.f32 %v2753_v57, %v312_v1  ;;  %2178 = vtanh.f32 %v279_v29  ;;  %v2794_v26 = vpop.eup %2176 }
 0x142   :  { %4227 = sst [smem:[#allocation46_spill]] %s2751_s26  ;;  %v360_v51 = vmul.f32 %v2794_v26, %v359_v42 }
 0x143   :  { %s2767_s26 = sld [smem:[#allocation6 + $0x96]]  ;;  %v314_v22 = vadd.f32 %v313_v9, %v310_v8 }
 0x144   :  { %v293_v6 = vstv %s4228_s3  ;;  %s2770_s25 = sld [smem:[#allocation6 + $0x97]]  ;;  %v361_v58 = vadd.f32 %v360_v51, %v357_v50  ;;  %v531_v50 = vstv %s2613_s6 }
 0x145   :  { %s2777_s15 = sld [smem:[#allocation6 + $0x98]]  ;;  %v294_v16 = vadd.f32 %v293_v6, %v291_v5  ;;  %v318_v34 = vadd.f32 %v317_v23, %v314_v22 }
 0x146   :  { %s4233_s18 = sld [smem:[#allocation55_spill]] }
 0x147   :  { %4229 = sst [smem:[#allocation53_spill]] %s2764_s17  ;;  %2180 = vtanh.f32 %v294_v16  ;;  %v2810_v37 = vpop.eup %2178 }
 0x148   :  { %s2784_s3 = sld [smem:[#allocation6 + $0x99]] }
 0x149   :  { %4230 = sst [smem:[#allocation41_spill]] %s2767_s26 }
 0x14a   :  { %4231 = sst [smem:[#allocation47_spill]] %s2770_s25 }
 0x14b   :  { %4232 = sst [smem:[#allocation49_spill]] %s2777_s15 }
 0x14c   :  { %s2781_s26 = sld [smem:[#allocation6 + $0xea]]  ;;  %v320_v27 = vstv %s4233_s18 }
 0x14d   :  { %s2788_s29 = sld [smem:[#allocation6 + $0x9a]]  ;;  %v321_v35 = vmul.f32 %v2794_v26, %v320_v27  ;;  %v2826_v48 = vpop.eup %2180 }
 0x14e   :  { %s2792_s16 = sld [smem:[#allocation6 + $0x9b]] }
 0x14f   :  { %s4237_s2 = sld [smem:[#allocation56_spill]]  ;;  %v322_v45 = vadd.f32 %v321_v35, %v318_v34 }
 0x150   :  { %s2798_s8 = sld [smem:[#allocation6 + $0x9c]] }
 0x151   :  { %s2804_s22 = sld [smem:[#allocation6 + $0x9e]] }
 0x152   :  { %4234 = sst [smem:[#allocation50_spill]] %s2781_s26 }
 0x153   :  { %4235 = sst [smem:[#allocation44_spill]] %s2788_s29 }
 0x154   :  { %4236 = sst [smem:[#allocation51_spill]] %s2792_s16 }
 0x155   :  { %s2801_s26 = sld [smem:[#allocation6 + $0x9d]]  ;;  %v324_v38 = vstv %s4237_s2 }
 0x156   :  { %4238 = sst [smem:[#allocation48_spill]] %s2798_s8  ;;  %v325_v46 = vmul.f32 %v2810_v37, %v324_v38 }
 0x157   :  { %4240 = sst [smem:[#allocation52_spill]] %s2804_s22 }
 0x158   :  { %s2808_s18 = sld [smem:[#allocation6 + $0x9f]]  ;;  %v326_v56 = vadd.f32 %v325_v46, %v322_v45 }
 0x159   :  { %s4242_s15 = sld [smem:[#allocation57_spill]] }
 0x15a   :  { %s4243_s0 = sld [smem:[#allocation59_spill]] }
 0x15b   :  { %4239 = sst [smem:[#allocation54_spill]] %s2801_s26 }
 0x15c   :  { %s2814_s26 = sld [smem:[#allocation6 + $0xa0]] }
 0x15d   :  { %s2817_s25 = sld [smem:[#allocation6 + $0xa1]] }
 0x15e   :  { %4241 = sst [smem:[#allocation55_spill]] %s2808_s18 }
 0x15f   :  { %s2820_s22 = sld [smem:[#allocation6 + $0xeb]]  ;;  %v328_v49 = vstv %s4242_s15 }
 0x160   :  { %s4247_s9 = sld [smem:[#allocation62_spill]]  ;;  %v363_v52 = vstv %s4243_s0  ;;  %v329_v19 = vmul.f32 %v2826_v48, %v328_v49 }
 0x161   :  { %s2824_s2 = sld [smem:[#allocation6 + $0xa2]]  ;;  %v364_v59 = vmul.f32 %v2810_v37, %v363_v52 }
 0x162   :  { %4244 = sst [smem:[#allocation56_spill]] %s2814_s26  ;;  %v330_v1 = vadd.f32 %v329_v19, %v326_v56 }
 0x163   :  { %4245 = sst [smem:[#allocation57_spill]] %s2817_s25  ;;  %v365_v3 = vadd.f32 %v364_v59, %v361_v58 }
 0x164   :  { %s4249_s18 = sld [smem:[#allocation60_spill]] }
 0x165   :  { %4246 = sst [smem:[#allocation59_spill]] %s2820_s22 }
 0x166   :  { %s2830_s20 = sld [smem:[#allocation6 + $0xa3]]  ;;  %v394_v20 = vstv %s4247_s9 }
 0x167   :  { %4248 = sst [smem:[#allocation62_spill]] %s2824_s2  ;;  %v395_v62 = vmul.f32 %v2772_v7, %v394_v20 }
 0x168   :  { %s4251_s25 = sld [smem:[#allocation11_spill]] }
 0x169   :  { %s2833_s26 = sld [smem:[#allocation6 + $0xa4]]  ;;  %v396_v11 = vadd.f32 %v395_v62, %v392_v61  ;;  %v570_v62 = vstv %s2654_s12 }
 0x16a   :  { %s4253_s22 = sld [smem:[#allocation13_spill]]  ;;  %v367_v60 = vstv %s4249_s18 }
 0x16b   :  { %s2836_s30 = sld [smem:[#allocation6 + $0xa5]]  ;;  %v368_v4 = vmul.f32 %v2826_v48, %v367_v60  ;;  %v532_v60 = vmul.f32 %v2697_v21, %v531_v50 }
 0x16c   :  { %4250 = sst [smem:[#allocation60_spill]] %s2830_s20 }
 0x16d   :  { %s4255_s8 = sld [smem:[#allocation63_spill]]  ;;  %v369_v23 = vadd.f32 %v368_v4, %v365_v3 }
 0x16e   :  { %s2840_s15 = sld [smem:[#allocation6 + $0xa6]]  ;;  %v414_v63 = vstv %s4251_s25 }
 0x16f   :  { %4252 = sst [smem:[#allocation11_spill]] %s2833_s26  ;;  %v415_v9 = vmul.f32 %v2697_v21, %v414_v63 }
 0x170   :  { %s4257_s16 = sld [smem:[#allocation71_spill]]  ;;  %v417_v0 = vstv %s4253_s22 }
 0x171   :  { %4254 = sst [smem:[#allocation13_spill]] %s2836_s30  ;;  %v418_v10 = vmul.f32 %v2703_v24, %v417_v0 }
 0x172   :  { %s4258_s0 = sld [smem:[#allocation72_spill]] }
 0x173   :  { %s2843_s17 = sld [smem:[#allocation6 + $0xa7]]  ;;  %v398_v2 = vstv %s4255_s8  ;;  %v419_v30 = vadd.f32 %v418_v10, %v415_v9  ;;  %v571_v10 = vmul.f32 %v2697_v21, %v570_v62 }
 0x174   :  { %4256 = sst [smem:[#allocation63_spill]] %s2840_s15  ;;  %v399_v12 = vmul.f32 %v2794_v26, %v398_v2 }
 0x175   :  { %s4260_s26 = sld [smem:[#allocation58_spill]] }
 0x176   :  { %s4261_s20 = sld [smem:[#allocation61_spill]]  ;;  %v453_v29 = vstv %s4257_s16  ;;  %v400_v33 = vadd.f32 %v399_v12, %v396_v11 }
 0x177   :  { %s2846_s2 = sld [smem:[#allocation6 + $0xa8]]  ;;  %v454_v15 = vmul.f32 %v2697_v21, %v453_v29 }
 0x178   :  { %s2851_s9 = sld [smem:[#allocation6 + $0xa9]]  ;;  %v456_v5 = vstv %s4258_s0 }
 0x179   :  { %4259 = sst [smem:[#allocation71_spill]] %s2843_s17  ;;  %v457_v16 = vmul.f32 %v2703_v24, %v456_v5 }
 0x17a   :  { %s4264_s15 = sld [smem:[#allocation64_spill]] }
 0x17b   :  { %s4265_s30 = sld [smem:[#allocation15_spill]]  ;;  %v332_v6 = vstv %s4260_s26  ;;  %v458_v39 = vadd.f32 %v457_v16, %v454_v15 }
 0x17c   :  { %s2854_s29 = sld [smem:[#allocation6 + $0xaa]]  ;;  %v371_v8 = vstv %s4261_s20  ;;  %v2878_v22 = vadd.f32 %v332_v6, %v330_v1 }
 0x17d   :  { %4262 = sst [smem:[#allocation72_spill]] %s2846_s2  ;;  %v2899_v43 = vadd.f32 %v371_v8, %v369_v23 }
 0x17e   :  { %4263 = sst [smem:[#allocation58_spill]] %s2851_s9  ;;  %2182 = vtanh.f32 %v2878_v22 }
 0x17f   :  { %s4267_s18 = sld [smem:[#allocation22_spill]]  ;;  %2184 = vtanh.f32 %v2899_v43 }
 0x180   :  { %s4268_s17 = sld [smem:[#allocation23_spill]]  ;;  %v402_v13 = vstv %s4264_s15 }
 0x181   :  { %s2859_s2 = sld [smem:[#allocation6 + $0xec]]  ;;  %v421_v14 = vstv %s4265_s30  ;;  %v403_v28 = vmul.f32 %v2810_v37, %v402_v13 }
 0x182   :  { %4266 = sst [smem:[#allocation61_spill]] %s2854_s29  ;;  %v422_v31 = vmul.f32 %v2724_v40, %v421_v14 }
 0x183   :  { %s4270_s25 = sld [smem:[#allocation65_spill]]  ;;  %v404_v52 = vadd.f32 %v403_v28, %v400_v33 }
 0x184   :  { %s4271_s22 = sld [smem:[#allocation17_spill]]  ;;  %v423_v47 = vadd.f32 %v422_v31, %v419_v30 }
 0x185   :  { %s2865_s8 = sld [smem:[#allocation6 + $0xab]]  ;;  %v492_v17 = vstv %s4267_s18 }
 0x186   :  { %s4272_s29 = sld [smem:[#allocation67_spill]]  ;;  %v495_v18 = vstv %s4268_s17  ;;  %v493_v35 = vmul.f32 %v2697_v21, %v492_v17 }
 0x187   :  { %4269 = sst [smem:[#allocation64_spill]] %s2859_s2  ;;  %v496_v36 = vmul.f32 %v2703_v24, %v495_v18 }
 0x188   :  { %s2870_s16 = sld [smem:[#allocation6 + $0xac]] }
 0x189   :  { %s4273_s26 = sld [smem:[#allocation68_spill]]  ;;  %v406_v25 = vstv %s4270_s25  ;;  %v497_v55 = vadd.f32 %v496_v36, %v493_v35 }
 0x18a   :  { %s2876_s20 = sld [smem:[#allocation6 + $0xad]]  ;;  %v460_v27 = vstv %s4271_s22  ;;  %v407_v38 = vmul.f32 %v2826_v48, %v406_v25 }
 0x18b   :  { %s4275_s0 = sld [smem:[#allocation78_spill]]  ;;  %v461_v41 = vmul.f32 %v2724_v40, %v460_v27 }
 0x18c   :  { %s2882_s15 = sld [smem:[#allocation6 + $0xae]]  ;;  %v425_v32 = vstv %s4272_s29  ;;  %v2946_v16 = vadd.f32 %v407_v38, %v404_v52 }
 0x18d   :  { %s4277_s30 = sld [smem:[#allocation66_spill]]  ;;  %v426_v45 = vmul.f32 %v2743_v54, %v425_v32  ;;  %v462_v19 = vadd.f32 %v461_v41, %v458_v39 }
 0x18e   :  { %s4278_s2 = sld [smem:[#allocation73_spill]] }
 0x18f   :  { %s2887_s18 = sld [smem:[#allocation6 + $0xaf]]  ;;  %v429_v34 = vstv %s4273_s26  ;;  %v427_v0 = vadd.f32 %v426_v45, %v423_v47 }
 0x190   :  { %4274 = sst [smem:[#allocation15_spill]] %s2876_s20  ;;  %v430_v49 = vmul.f32 %v2753_v57, %v429_v34 }
 0x191   :  { %s4280_s17 = sld [smem:[#allocation30_spill]]  ;;  %v499_v42 = vstv %s4275_s0 }
 0x192   :  { %4276 = sst [smem:[#allocation22_spill]] %s2882_s15  ;;  %v500_v56 = vmul.f32 %v2724_v40, %v499_v42  ;;  %v431_v17 = vadd.f32 %v430_v49, %v427_v0 }
 0x193   :  { %s2892_s25 = sld [smem:[#allocation6 + $0xb0]]  ;;  %v410_v44 = vstv %s4277_s30 }
 0x194   :  { %s4282_s22 = sld [smem:[#allocation16_spill]]  ;;  %v464_v46 = vstv %s4278_s2  ;;  %v501_v5 = vadd.f32 %v500_v56, %v497_v55  ;;  %v609_v55 = vstv %s2692_s23  ;;  %v612_v56 = vstv %s2695_s5 }
 0x195   :  { %4279 = sst [smem:[#allocation23_spill]] %s2887_s18  ;;  %v465_v20 = vmul.f32 %v2743_v54, %v464_v46 }
 0x196   :  { %s2897_s29 = sld [smem:[#allocation6 + $0xb1]] }
 0x197   :  { %s4284_s26 = sld [smem:[#allocation74_spill]]  ;;  %v534_v51 = vstv %s4280_s17  ;;  %v466_v12 = vadd.f32 %v465_v20, %v462_v19 }
 0x198   :  { %s4285_s9 = sld [smem:[#allocation79_spill]]  ;;  %v535_v61 = vmul.f32 %v2703_v24, %v534_v51 }
 0x199   :  { %4281 = sst [smem:[#allocation65_spill]] %s2892_s25 }
 0x19a   :  { %s2904_s18 = sld [smem:[#allocation6 + $0xb2]]  ;;  %v433_v53 = vstv %s4282_s22  ;;  %v536_v13 = vadd.f32 %v535_v61, %v532_v60 }
 0x19b   :  { %s4287_s25 = sld [smem:[#allocation29_spill]]  ;;  %v434_v1 = vmul.f32 %v2772_v7, %v433_v53 }
 0x19c   :  { %4283 = sst [smem:[#allocation17_spill]] %s2897_s29 }
 0x19d   :  { %s2909_s0 = sld [smem:[#allocation6 + $0xb3]]  ;;  %v468_v58 = vstv %s4284_s26  ;;  %v435_v41 = vadd.f32 %v434_v1, %v431_v17 }
 0x19e   :  { %s4289_s29 = sld [smem:[#allocation12_spill]]  ;;  %v503_v59 = vstv %s4285_s9  ;;  %v469_v29 = vmul.f32 %v2753_v57, %v468_v58 }
 0x19f   :  { %s4290_s15 = sld [smem:[#allocation31_spill]]  ;;  %v504_v6 = vmul.f32 %v2743_v54, %v503_v59 }
 0x1a0   :  { %4286 = sst [smem:[#allocation67_spill]] %s2904_s18  ;;  %v470_v35 = vadd.f32 %v469_v29, %v466_v12 }
 0x1a1   :  { %s2913_s20 = sld [smem:[#allocation6 + $0xed]]  ;;  %v573_v63 = vstv %s4287_s25  ;;  %v505_v28 = vadd.f32 %v504_v6, %v501_v5  ;;  %v616_v6 = vstv %s2701_s4 }
 0x1a2   :  { %s4292_s2 = sld [smem:[#allocation69_spill]]  ;;  %v574_v11 = vmul.f32 %v2703_v24, %v573_v63 }
 0x1a3   :  { %4288 = sst [smem:[#allocation68_spill]] %s2909_s0 }
 0x1a4   :  { %s2918_s6 = sld [smem:[#allocation6 + $0xb4]]  ;;  %v437_v2 = vstv %s4289_s29  ;;  %v575_v33 = vadd.f32 %v574_v11, %v571_v10 }
 0x1a5   :  { %s4293_s17 = sld [smem:[#allocation75_spill]]  ;;  %v538_v3 = vstv %s4290_s15  ;;  %v438_v18 = vmul.f32 %v2794_v26, %v437_v2  ;;  %v610_v2 = vmul.f32 %v2697_v21, %v609_v55 }
 0x1a6   :  { %s4294_s22 = sld [smem:[#allocation26_spill]]  ;;  %v539_v14 = vmul.f32 %v2724_v40, %v538_v3  ;;  %v613_v3 = vmul.f32 %v2703_v24, %v612_v56 }
 0x1a7   :  { %4291 = sst [smem:[#allocation78_spill]] %s2913_s20  ;;  %v439_v60 = vadd.f32 %v438_v18, %v435_v41 }
 0x1a8   :  { %s2924_s0 = sld [smem:[#allocation6 + $0xb5]]  ;;  %v441_v4 = vstv %s4292_s2  ;;  %v540_v36 = vadd.f32 %v539_v14, %v536_v13 }
 0x1a9   :  { %s4295_s20 = sld [smem:[#allocation38_spill]]  ;;  %v442_v25 = vmul.f32 %v2810_v37, %v441_v4 }
 0x1aa   :  { %s2929_s26 = sld [smem:[#allocation6 + $0xb6]] }
 0x1ab   :  { %s4297_s9 = sld [smem:[#allocation28_spill]]  ;;  %v472_v8 = vstv %s4293_s17  ;;  %v443_v12 = vadd.f32 %v442_v25, %v439_v60 }
 0x1ac   :  { %s2934_s18 = sld [smem:[#allocation6 + $0xb7]]  ;;  %v507_v9 = vstv %s4294_s22  ;;  %v473_v31 = vmul.f32 %v2772_v7, %v472_v8 }
 0x1ad   :  { %s4299_s12 = sld [smem:[#allocation76_spill]]  ;;  %v508_v30 = vmul.f32 %v2753_v57, %v507_v9 }
 0x1ae   :  { %s2940_s25 = sld [smem:[#allocation6 + $0xb8]]  ;;  %v474_v19 = vadd.f32 %v473_v31, %v470_v35  ;;  %v620_v31 = vstv %s2707_s1  ;;  %v593_v35 = vstv %s2676_s11 }
 0x1af   :  { %s4301_s15 = sld [smem:[#allocation27_spill]]  ;;  %v577_v15 = vstv %s4295_s20  ;;  %v509_v49 = vadd.f32 %v508_v30, %v505_v28 }
 0x1b0   :  { %4296 = sst [smem:[#allocation66_spill]] %s2929_s26  ;;  %v578_v34 = vmul.f32 %v2724_v40, %v577_v15 }
 0x1b1   :  { %s2944_s29 = sld [smem:[#allocation6 + $0xb9]]  ;;  %v542_v23 = vstv %s4297_s9 }
 0x1b2   :  { %4298 = sst [smem:[#allocation73_spill]] %s2934_s18  ;;  %v543_v38 = vmul.f32 %v2743_v54, %v542_v23  ;;  %v579_v52 = vadd.f32 %v578_v34, %v575_v33  ;;  %v614_v23 = vadd.f32 %v613_v3, %v610_v2  ;;  %v3059_v2 = vpop.eup %2182 }
 0x1b3   :  { %s4303_s2 = sld [smem:[#allocation39_spill]]  ;;  %v476_v27 = vstv %s4299_s12 }
 0x1b4   :  { %4300 = sst [smem:[#allocation30_spill]] %s2940_s25  ;;  %v477_v45 = vmul.f32 %v2794_v26, %v476_v27  ;;  %v544_v20 = vadd.f32 %v543_v38, %v540_v36  ;;  %v617_v27 = vmul.f32 %v2724_v40, %v616_v6  ;;  %v411_v36 = vadd.f32 %v410_v44, %v2946_v16  ;;  %v3067_v6 = vpop.eup %2184 }
 0x1b5   :  { %s2950_s17 = sld [smem:[#allocation6 + $0xba]]  ;;  %v511_v32 = vstv %s4301_s15  ;;  %v594_v44 = vmul.f32 %v2794_v26, %v593_v35  ;;  %v624_v16 = vstv %s2711_s13  ;;  %v659_v35 = vstv %s2756_s14 }
 0x1b6   :  { %s4305_s22 = sld [smem:[#allocation70_spill]]  ;;  %v512_v50 = vmul.f32 %v2772_v7, %v511_v32  ;;  %v478_v8 = vadd.f32 %v477_v45, %v474_v19  ;;  %2186 = vtanh.f32 %v411_v36  ;;  %v663_v36 = vstv %s2760_s28 }
 0x1b7   :  { %4302 = sst [smem:[#allocation16_spill]] %s2944_s29 }
 0x1b8   :  { %s4306_s25 = sld [smem:[#allocation32_spill]]  ;;  %v513_v0 = vadd.f32 %v512_v50, %v509_v49 }
 0x1b9   :  { %s2955_s20 = sld [smem:[#allocation6 + $0xbb]]  ;;  %v581_v39 = vstv %s4303_s2 }
 0x1ba   :  { %s4308_s29 = sld [smem:[#allocation77_spill]]  ;;  %v582_v53 = vmul.f32 %v2743_v54, %v581_v39 }
 0x1bb   :  { %4304 = sst [smem:[#allocation74_spill]] %s2950_s17 }
 0x1bc   :  { %s4309_s18 = sld [smem:[#allocation20_spill]]  ;;  %v445_v42 = vstv %s4305_s22  ;;  %v583_v29 = vadd.f32 %v582_v53, %v579_v52 }
 0x1bd   :  { %s2960_s9 = sld [smem:[#allocation6 + $0xbc]]  ;;  %v446_v13 = vmul.f32 %v2826_v48, %v445_v42 }
 0x1be   :  { %s2964_s12 = sld [smem:[#allocation6 + $0xee]]  ;;  %v546_v46 = vstv %s4306_s25 }
 0x1bf   :  { %4307 = sst [smem:[#allocation79_spill]] %s2955_s20  ;;  %v547_v58 = vmul.f32 %v2753_v57, %v546_v46  ;;  %v447_v38 = vadd.f32 %v446_v13, %v443_v12  ;;  %v618_v46 = vadd.f32 %v617_v27, %v614_v23  ;;  %v3074_v12 = vpop.eup %2186 }
 0x1c0   :  { %s4312_s15 = sld [smem:[#allocation40_spill]]  ;;  %v480_v47 = vstv %s4308_s29 }
 0x1c1   :  { %s2969_s20 = sld [smem:[#allocation6 + $0xbd]]  ;;  %v481_v61 = vmul.f32 %v2810_v37, %v480_v47  ;;  %v548_v9 = vadd.f32 %v547_v58, %v544_v20  ;;  %v621_v47 = vmul.f32 %v2743_v54, %v620_v31  ;;  %v625_v58 = vmul.f32 %v2753_v57, %v624_v16 }
 0x1c2   :  { %s4314_s17 = sld [smem:[#allocation34_spill]]  ;;  %v515_v51 = vstv %s4309_s18 }
 0x1c3   :  { %4310 = sst [smem:[#allocation29_spill]] %s2960_s9  ;;  %v516_v1 = vmul.f32 %v2794_v26, %v515_v51  ;;  %v482_v32 = vadd.f32 %v481_v61, %v478_v8  ;;  %v622_v20 = vadd.f32 %v621_v47, %v618_v46 }
 0x1c4   :  { %4311 = sst [smem:[#allocation12_spill]] %s2964_s12 }
 0x1c5   :  { %s4313_s9 = sld [smem:[#allocation18_spill]]  ;;  %v517_v17 = vadd.f32 %v516_v1, %v513_v0 }
 0x1c6   :  { %s2974_s26 = sld [smem:[#allocation6 + $0xbe]]  ;;  %v585_v59 = vstv %s4312_s15 }
 0x1c7   :  { %s2979_s2 = sld [smem:[#allocation6 + $0xbf]]  ;;  %v586_v5 = vmul.f32 %v2753_v57, %v585_v59 }
 0x1c8   :  { %s4315_s22 = sld [smem:[#allocation24_spill]]  ;;  %v550_v63 = vstv %s4314_s17 }
 0x1c9   :  { %s2983_s25 = sld [smem:[#allocation6 + $0xc0]]  ;;  %v551_v10 = vmul.f32 %v2772_v7, %v550_v63  ;;  %v587_v28 = vadd.f32 %v586_v5, %v583_v29  ;;  %v632_v5 = vstv %s2722_s21 }
 0x1ca   :  { %s4316_s18 = sld [smem:[#allocation42_spill]] }
 0x1cb   :  { %v484_v62 = vstv %s4313_s9  ;;  %s2988_s29 = sld [smem:[#allocation6 + $0xc1]]  ;;  %v552_v33 = vadd.f32 %v551_v10, %v548_v9  ;;  %v648_v10 = vstv %s2741_s7 }
 0x1cc   :  { %s4317_s23 = sld [smem:[#allocation35_spill]]  ;;  %v485_v14 = vmul.f32 %v2826_v48, %v484_v62  ;;  %v628_v62 = vstv %s2716_s24  ;;  %v649_v27 = vmul.f32 %v2697_v21, %v648_v10 }
 0x1cd   :  { %s2993_s5 = sld [smem:[#allocation6 + $0xc2]]  ;;  %v629_v29 = vmul.f32 %v2772_v7, %v628_v62 }
 0x1ce   :  { %v519_v4 = vstv %s4315_s22  ;;  %s2998_s9 = sld [smem:[#allocation6 + $0xc3]]  ;;  %v486_v50 = vadd.f32 %v485_v14, %v482_v32 }
 0x1cf   :  { %s4318_s17 = sld [smem:[#allocation80_spill]]  ;;  %v520_v18 = vmul.f32 %v2810_v37, %v519_v4  ;;  %v626_v4 = vadd.f32 %v625_v58, %v622_v20 }
 0x1d0   :  { %v589_v11 = vstv %s4316_s18  ;;  %s3002_s15 = sld [smem:[#allocation6 + $0xc4]] }
 0x1d1   :  { %s3007_s22 = sld [smem:[#allocation6 + $0xc5]]  ;;  %v590_v30 = vmul.f32 %v2772_v7, %v589_v11  ;;  %v521_v42 = vadd.f32 %v520_v18, %v517_v17  ;;  %v651_v11 = vstv %s2748_s27  ;;  %v636_v17 = vstv %s2727_s19 }
 0x1d2   :  { %v554_v15 = vstv %s4317_s23  ;;  %s4321_s4 = sld [smem:[#allocation14_spill]]  ;;  %v640_v18 = vstv %s2731_s10  ;;  %v630_v23 = vadd.f32 %v629_v29, %v626_v4  ;;  %v807_v4 = vstv %s2924_s0 }
 0x1d3   :  { %s4322_s12 = sld [smem:[#allocation21_spill]]  ;;  %v555_v34 = vmul.f32 %v2794_v26, %v554_v15  ;;  %v591_v49 = vadd.f32 %v590_v30, %v587_v28  ;;  %v633_v15 = vmul.f32 %v2794_v26, %v632_v5 }
 0x1d4   :  { %s3011_s18 = sld [smem:[#allocation6 + $0xef]] }
 0x1d5   :  { %v523_v25 = vstv %s4318_s17  ;;  %s3020_s23 = sld [smem:[#allocation6 + $0xc7]]  ;;  %v556_v51 = vadd.f32 %v555_v34, %v552_v33  ;;  %v595_v60 = vadd.f32 %v594_v44, %v591_v49  ;;  %v637_v34 = vmul.f32 %v2810_v37, %v636_v17 }
 0x1d6   :  { %4319 = sst [smem:[#allocation31_spill]] %s3002_s15  ;;  %v524_v45 = vmul.f32 %v2826_v48, %v523_v25  ;;  %v652_v25 = vmul.f32 %v2703_v24, %v651_v11  ;;  %v634_v46 = vadd.f32 %v633_v15, %v630_v23  ;;  %v808_v23 = vmul.f32 %v2703_v24, %v807_v4 }
 0x1d7   :  { %4320 = sst [smem:[#allocation69_spill]] %s3007_s22 }
 0x1d8   :  { %s3016_s15 = sld [smem:[#allocation6 + $0xc6]]  ;;  %v449_v39 = vstv %s4321_s4  ;;  %v525_v19 = vadd.f32 %v524_v45, %v521_v42  ;;  %v653_v47 = vadd.f32 %v652_v25, %v649_v27 }
 0x1d9   :  { %s4324_s17 = sld [smem:[#allocation33_spill]]  ;;  %v558_v41 = vstv %s4322_s12  ;;  %v450_v55 = vadd.f32 %v449_v39, %v447_v38  ;;  %v641_v38 = vmul.f32 %v2826_v48, %v640_v18 }
 0x1da   :  { %4323 = sst [smem:[#allocation75_spill]] %s3011_s18  ;;  %v559_v52 = vmul.f32 %v2810_v37, %v558_v41  ;;  %v687_v41 = vstv %s2784_s3 }
 0x1db   :  { %s3027_s18 = sld [smem:[#allocation6 + $0xc8]]  ;;  %2188 = vtanh.f32 %v450_v55 }
 0x1dc   :  { %s4326_s1 = sld [smem:[#allocation19_spill]]  ;;  %v560_v63 = vadd.f32 %v559_v52, %v556_v51  ;;  %v660_v51 = vmul.f32 %v2743_v54, %v659_v35  ;;  %v3118_v52 = vmul.f32 %v2753_v57, %v663_v36 }
 0x1dd   :  { %s4327_s22 = sld [smem:[#allocation25_spill]] }
 0x1de   :  { %s3031_s11 = sld [smem:[#allocation6 + $0xc9]] }
 0x1df   :  { %s3036_s30 = sld [smem:[#allocation6 + $0xca]]  ;;  %v597_v53 = vstv %s4324_s17 }
 0x1e0   :  { %s4329_s12 = sld [smem:[#allocation81_spill]]  ;;  %v598_v61 = vmul.f32 %v2810_v37, %v597_v53  ;;  %v688_v53 = vmul.f32 %v2697_v21, %v687_v41 }
 0x1e1   :  { %4325 = sst [smem:[#allocation26_spill]] %s3027_s18  ;;  %v3089_v30 = vpop.eup %2188 }
 0x1e2   :  { %s3040_s4 = sld [smem:[#allocation6 + $0xcb]]  ;;  %v488_v56 = vstv %s4326_s1  ;;  %v599_v8 = vadd.f32 %v598_v61, %v595_v60  ;;  %v638_v61 = vadd.f32 %v637_v34, %v634_v46 }
 0x1e3   :  { %v562_v22 = vstv %s4327_s22  ;;  %s3045_s18 = sld [smem:[#allocation6 + $0xcc]]  ;;  %v489_v43 = vadd.f32 %v488_v56, %v486_v50  ;;  %v765_v56 = vstv %s2865_s8 }
 0x1e4   :  { %4328 = sst [smem:[#allocation38_spill]] %s3031_s11  ;;  %v563_v0 = vmul.f32 %v2826_v48, %v562_v22  ;;  %v768_v22 = vstv %s2870_s16  ;;  %v3166_v27 = vadd.f32 %v641_v38, %v638_v61 }
 0x1e5   :  { %s4330_s11 = sld [smem:[#allocation37_spill]]  ;;  %2190 = vtanh.f32 %v489_v43 }
 0x1e6   :  { %s3048_s13 = sld [smem:[#allocation6 + $0xcd]]  ;;  %v527_v59 = vstv %s4329_s12  ;;  %v564_v13 = vadd.f32 %v563_v0, %v560_v63  ;;  %v766_v0 = vmul.f32 %v2697_v21, %v765_v56 }
 0x1e7   :  { %s3053_s17 = sld [smem:[#allocation6 + $0xce]]  ;;  %v528_v3 = vadd.f32 %v527_v59, %v525_v19 }
 0x1e8   :  { %s3057_s22 = sld [smem:[#allocation6 + $0xf0]] }
 0x1e9   :  { %s3061_s1 = sld [smem:[#allocation6 + $0xcf]]  ;;  %2192 = vtanh.f32 %v528_v3  ;;  %v804_v3 = vstv %s2918_s6 }
 0x1ea   :  { %s4334_s12 = sld [smem:[#allocation36_spill]]  ;;  %v805_v18 = vmul.f32 %v2697_v21, %v804_v3 }
 0x1eb   :  { %v601_v1 = vstv %s4330_s11  ;;  %s3065_s24 = sld [smem:[#allocation6 + $0xd0]]  ;;  %v3107_v45 = vpop.eup %2190 }
 0x1ec   :  { %4331 = sst [smem:[#allocation28_spill]] %s3048_s13  ;;  %v602_v9 = vmul.f32 %v2826_v48, %v601_v1  ;;  %v769_v1 = vmul.f32 %v2703_v24, %v768_v22 }
 0x1ed   :  { %4332 = sst [smem:[#allocation76_spill]] %s3053_s17 }
 0x1ee   :  { %4333 = sst [smem:[#allocation27_spill]] %s3057_s22  ;;  %v603_v31 = vadd.f32 %v602_v9, %v599_v8  ;;  %v770_v25 = vadd.f32 %v769_v1, %v766_v0 }
 0x1ef   :  { %s4335_s11 = sld [smem:[#allocation46_spill]]  ;;  %v3128_v19 = vpop.eup %2192 }
 0x1f0   :  { %s3072_s22 = sld [smem:[#allocation6 + $0xd1]]  ;;  %v566_v14 = vstv %s4334_s12 }
 0x1f1   :  { %s4336_s17 = sld [smem:[#allocation43_spill]]  ;;  %v3094_v33 = vadd.f32 %v566_v14, %v564_v13 }
 0x1f2   :  { %s3076_s13 = sld [smem:[#allocation6 + $0xd2]] }
 0x1f3   :  { %s3082_s21 = sld [smem:[#allocation6 + $0xd3]]  ;;  %2194 = vtanh.f32 %v3094_v33 }
 0x1f4   :  { %s4339_s7 = sld [smem:[#allocation44_spill]] }
 0x1f5   :  { %v655_v28 = vstv %s4335_s11  ;;  %s3087_s27 = sld [smem:[#allocation6 + $0xd4]] }
 0x1f6   :  { %s4341_s12 = sld [smem:[#allocation62_spill]]  ;;  %v656_v39 = vmul.f32 %v2724_v40, %v655_v28 }
 0x1f7   :  { %v605_v32 = vstv %s4336_s17  ;;  %s4342_s19 = sld [smem:[#allocation60_spill]] }
 0x1f8   :  { %4337 = sst [smem:[#allocation39_spill]] %s3076_s13  ;;  %v3113_v16 = vadd.f32 %v605_v32, %v603_v31  ;;  %v657_v62 = vadd.f32 %v656_v39, %v653_v47 }
 0x1f9   :  { %4338 = sst [smem:[#allocation70_spill]] %s3082_s21 }
 0x1fa   :  { %s3092_s10 = sld [smem:[#allocation6 + $0xd5]]  ;;  %v690_v42 = vstv %s4339_s7  ;;  %v661_v39 = vadd.f32 %v660_v51, %v657_v62  ;;  %v843_v62 = vstv %s2969_s20  ;;  %2196 = vtanh.f32 %v3113_v16 }
 0x1fb   :  { %4340 = sst [smem:[#allocation32_spill]] %s3087_s27  ;;  %v691_v55 = vmul.f32 %v2703_v24, %v690_v42 }
 0x1fc   :  { %s4344_s21 = sld [smem:[#allocation45_spill]]  ;;  %v726_v49 = vstv %s4341_s12 }
 0x1fd   :  { %s3099_s13 = sld [smem:[#allocation6 + $0xd6]]  ;;  %v729_v44 = vstv %s4342_s19  ;;  %v727_v59 = vmul.f32 %v2697_v21, %v726_v49  ;;  %v692_v5 = vadd.f32 %v691_v55, %v688_v53  ;;  %v809_v49 = vadd.f32 %v808_v23, %v805_v18 }
 0x1fe   :  { %s3105_s17 = sld [smem:[#allocation6 + $0xd7]]  ;;  %v730_v60 = vmul.f32 %v2703_v24, %v729_v44  ;;  %v850_v23 = vstv %s2979_s2 }
 0x1ff   :  { %s4347_s11 = sld [smem:[#allocation53_spill]] }
 0x200   :  { %4343 = sst [smem:[#allocation77_spill]] %s3092_s10  ;;  %v731_v13 = vadd.f32 %v730_v60, %v727_v59 }
 0x201   :  { %s4348_s10 = sld [smem:[#allocation51_spill]] }
 0x202   :  { %s3111_s28 = sld [smem:[#allocation6 + $0xf1]]  ;;  %v644_v50 = vstv %s4344_s21 }
 0x203   :  { %4345 = sst [smem:[#allocation20_spill]] %s3099_s13 }
 0x204   :  { %4346 = sst [smem:[#allocation40_spill]] %s3105_s17 }
 0x205   :  { %s4350_s14 = sld [smem:[#allocation41_spill]]  ;;  %v667_v20 = vstv %s4347_s11 }
 0x206   :  { %s4351_s3 = sld [smem:[#allocation11_spill]]  ;;  %v3147_v29 = vmul.f32 %v2772_v7, %v667_v20 }
 0x207   :  { %s3120_s7 = sld [smem:[#allocation6 + $0xd8]]  ;;  %v694_v58 = vstv %s4348_s10 }
 0x208   :  { %4349 = sst [smem:[#allocation18_spill]] %s3111_s28  ;;  %v695_v8 = vmul.f32 %v2724_v40, %v694_v58 }
 0x209   :  { %s3126_s12 = sld [smem:[#allocation6 + $0xd9]] }
 0x20a   :  { %s4352_s19 = sld [smem:[#allocation15_spill]]  ;;  %v696_v34 = vadd.f32 %v695_v8, %v692_v5 }
 0x20b   :  { %s3134_s28 = sld [smem:[#allocation6 + $0xda]]  ;;  %v671_v43 = vstv %s4350_s14 }
 0x20c   :  { %s4353_s17 = sld [smem:[#allocation48_spill]]  ;;  %v733_v63 = vstv %s4351_s3  ;;  %v3154_v10 = vmul.f32 %v2794_v26, %v671_v43  ;;  %v846_v43 = vstv %s2974_s26 }
 0x20d   :  { %s3138_s8 = sld [smem:[#allocation6 + $0xdb]]  ;;  %v734_v14 = vmul.f32 %v2724_v40, %v733_v63  ;;  %v665_v63 = vadd.f32 %v3118_v52, %v661_v39  ;;  %v844_v52 = vmul.f32 %v2697_v21, %v843_v62 }
 0x20e   :  { %s4355_s16 = sld [smem:[#allocation47_spill]] }
 0x20f   :  { %s4356_s11 = sld [smem:[#allocation13_spill]]  ;;  %v735_v38 = vadd.f32 %v734_v14, %v731_v13  ;;  %v847_v14 = vmul.f32 %v2703_v24, %v846_v43 }
 0x210   :  { %s3144_s10 = sld [smem:[#allocation6 + $0xdc]]  ;;  %v772_v9 = vstv %s4352_s19 }
 0x211   :  { %s4358_s14 = sld [smem:[#allocation66_spill]]  ;;  %v773_v28 = vmul.f32 %v2724_v40, %v772_v9 }
 0x212   :  { %s3151_s3 = sld [smem:[#allocation6 + $0xdd]]  ;;  %v698_v11 = vstv %s4353_s17 }
 0x213   :  { %4354 = sst [smem:[#allocation34_spill]] %s3138_s8  ;;  %v699_v35 = vmul.f32 %v2743_v54, %v698_v11  ;;  %v774_v53 = vadd.f32 %v773_v28, %v770_v25  ;;  %v669_v25 = vadd.f32 %v3147_v29, %v665_v63  ;;  %v851_v29 = vmul.f32 %v2724_v40, %v850_v23 }
 0x214   :  { %s4360_s13 = sld [smem:[#allocation49_spill]]  ;;  %v675_v15 = vstv %s4355_s16 }
 0x215   :  { %s4361_s0 = sld [smem:[#allocation22_spill]]  ;;  %v737_v17 = vstv %s4356_s11  ;;  %v3182_v46 = vmul.f32 %v2810_v37, %v675_v15  ;;  %v700_v22 = vadd.f32 %v699_v35, %v696_v34 }
 0x216   :  { %4357 = sst [smem:[#allocation24_spill]] %s3144_s10  ;;  %v738_v42 = vmul.f32 %v2743_v54, %v737_v17 }
 0x217   :  { %s3158_s6 = sld [smem:[#allocation6 + $0xde]]  ;;  %v811_v31 = vstv %s4358_s14 }
 0x218   :  { %4359 = sst [smem:[#allocation42_spill]] %s3151_s3  ;;  %v812_v44 = vmul.f32 %v2724_v40, %v811_v31  ;;  %v739_v60 = vadd.f32 %v738_v42, %v735_v38  ;;  %v848_v42 = vadd.f32 %v847_v14, %v844_v52 }
 0x219   :  { %s4363_s27 = sld [smem:[#allocation54_spill]] }
 0x21a   :  { %s3164_s19 = sld [smem:[#allocation6 + $0xdf]]  ;;  %v679_v32 = vstv %s4360_s13  ;;  %v813_v1 = vadd.f32 %v812_v44, %v809_v49 }
 0x21b   :  { %s4365_s3 = sld [smem:[#allocation63_spill]]  ;;  %v776_v36 = vstv %s4361_s0  ;;  %v3189_v51 = vmul.f32 %v2826_v48, %v679_v32 }
 0x21c   :  { %s3170_s17 = sld [smem:[#allocation6 + $0xe0]]  ;;  %v777_v55 = vmul.f32 %v2743_v54, %v776_v36 }
 0x21d   :  { %4362 = sst [smem:[#allocation35_spill]] %s3158_s6 }
 0x21e   :  { %s4367_s16 = sld [smem:[#allocation73_spill]]  ;;  %v778_v5 = vadd.f32 %v777_v55, %v774_v53  ;;  %v854_v53 = vstv %s2983_s25  ;;  %v673_v55 = vadd.f32 %v3154_v10, %v669_v25  ;;  %v852_v10 = vadd.f32 %v851_v29, %v848_v42 }
 0x21f   :  { %s3175_s11 = sld [smem:[#allocation6 + $0xf2]]  ;;  %v702_v41 = vstv %s4363_s27  ;;  %v855_v63 = vmul.f32 %v2743_v54, %v854_v53 }
 0x220   :  { %4364 = sst [smem:[#allocation80_spill]] %s3164_s19  ;;  %v703_v20 = vmul.f32 %v2753_v57, %v702_v41 }
 0x221   :  { %s4369_s19 = sld [smem:[#allocation52_spill]]  ;;  %v741_v47 = vstv %s4365_s3  ;;  %v856_v23 = vadd.f32 %v855_v63, %v852_v10 }
 0x222   :  { %4366 = sst [smem:[#allocation14_spill]] %s3170_s17  ;;  %v742_v61 = vmul.f32 %v2753_v57, %v741_v47  ;;  %v704_v15 = vadd.f32 %v703_v20, %v700_v22 }
 0x223   :  { %s4370_s6 = sld [smem:[#allocation23_spill]] }
 0x224   :  { %s3179_s10 = sld [smem:[#allocation6 + $0xf3]]  ;;  %v815_v56 = vstv %s4367_s16  ;;  %v743_v17 = vadd.f32 %v742_v61, %v739_v60 }
 0x225   :  { %4368 = sst [smem:[#allocation21_spill]] %s3175_s11  ;;  %v816_v3 = vmul.f32 %v2743_v54, %v815_v56 }
 0x226   :  { %s3186_s13 = sld [smem:[#allocation6 + $0xf4]] }
 0x227   :  { %s4371_s27 = sld [smem:[#allocation71_spill]]  ;;  %v706_v58 = vstv %s4369_s19  ;;  %v817_v31 = vadd.f32 %v816_v3, %v813_v1 }
 0x228   :  { %s3193_s14 = sld [smem:[#allocation6 + $0xf5]]  ;;  %v707_v4 = vmul.f32 %v2772_v7, %v706_v58 }
 0x229   :  { %s4372_s3 = sld [smem:[#allocation30_spill]]  ;;  %v780_v59 = vstv %s4370_s6 }
 0x22a   :  { %s3198_s0 = sld [smem:[#allocation6 + $0xf6]]  ;;  %v781_v8 = vmul.f32 %v2753_v57, %v780_v59  ;;  %v708_v47 = vadd.f32 %v707_v4, %v704_v15  ;;  %v858_v4 = vstv %s2988_s29 }
 0x22b   :  { %s4373_s11 = sld [smem:[#allocation55_spill]]  ;;  %v859_v25 = vmul.f32 %v2753_v57, %v858_v4 }
 0x22c   :  { %s4374_s17 = sld [smem:[#allocation65_spill]]  ;;  %v782_v35 = vadd.f32 %v781_v8, %v778_v5 }
 0x22d   :  { %s3203_s8 = sld [smem:[#allocation6 + $0xf7]]  ;;  %v745_v0 = vstv %s4371_s27 }
 0x22e   :  { %s3208_s19 = sld [smem:[#allocation6 + $0xf8]]  ;;  %v746_v18 = vmul.f32 %v2772_v7, %v745_v0 }
 0x22f   :  { %s4377_s6 = sld [smem:[#allocation72_spill]]  ;;  %v819_v9 = vstv %s4372_s3 }
 0x230   :  { %s3213_s20 = sld [smem:[#allocation6 + $0xf9]]  ;;  %v820_v32 = vmul.f32 %v2753_v57, %v819_v9  ;;  %v747_v49 = vadd.f32 %v746_v18, %v743_v17 }
 0x231   :  { %v710_v11 = vstv %s4373_s11  ;;  %s4378_s26 = sld [smem:[#allocation16_spill]] }
 0x232   :  { %v784_v13 = vstv %s4374_s17  ;;  %s3219_s16 = sld [smem:[#allocation6 + $0xfa]]  ;;  %v711_v34 = vmul.f32 %v2794_v26, %v710_v11  ;;  %v821_v22 = vadd.f32 %v820_v32, %v817_v31  ;;  %v862_v32 = vstv %s2993_s5 }
 0x233   :  { %4375 = sst [smem:[#allocation33_spill]] %s3203_s8  ;;  %v785_v36 = vmul.f32 %v2772_v7, %v784_v13  ;;  %v677_v13 = vadd.f32 %v3182_v46, %v673_v55  ;;  %v863_v53 = vmul.f32 %v2772_v7, %v862_v32 }
 0x234   :  { %4376 = sst [smem:[#allocation19_spill]] %s3208_s19  ;;  %v712_v0 = vadd.f32 %v711_v34, %v708_v47  ;;  %v645_v47 = vadd.f32 %v644_v50, %v3166_v27 }
 0x235   :  { %s4380_s27 = sld [smem:[#allocation56_spill]]  ;;  %v749_v28 = vstv %s4377_s6  ;;  %v786_v59 = vadd.f32 %v785_v36, %v782_v35  ;;  %v882_v36 = vstv %s3016_s15 }
 0x236   :  { %s4381_s19 = sld [smem:[#allocation17_spill]]  ;;  %v750_v44 = vmul.f32 %v2794_v26, %v749_v28  ;;  %2198 = vtanh.f32 %v645_v47  ;;  %v921_v47 = vstv %s3061_s1 }
 0x237   :  { %s3223_s8 = sld [smem:[#allocation6 + $0xfb]]  ;;  %v823_v39 = vstv %s4378_s26 }
 0x238   :  { %4379 = sst [smem:[#allocation25_spill]] %s3219_s16  ;;  %v824_v20 = vmul.f32 %v2772_v7, %v823_v39  ;;  %v751_v1 = vadd.f32 %v750_v44, %v747_v49  ;;  %v885_v39 = vstv %s3020_s23  ;;  %v860_v44 = vadd.f32 %v859_v25, %v856_v23 }
 0x239   :  { %s3228_s17 = sld [smem:[#allocation6 + $0xfc]] }
 0x23a   :  { %s4384_s11 = sld [smem:[#allocation58_spill]]  ;;  %v825_v9 = vadd.f32 %v824_v20, %v821_v22  ;;  %v886_v22 = vmul.f32 %v2703_v24, %v885_v39 }
 0x23b   :  { %s3233_s3 = sld [smem:[#allocation6 + $0xfd]]  ;;  %v714_v41 = vstv %s4380_s27 }
 0x23c   :  { %v788_v38 = vstv %s4381_s19  ;;  %s4385_s2 = sld [smem:[#allocation74_spill]]  ;;  %v715_v58 = vmul.f32 %v2810_v37, %v714_v41  ;;  %v681_v41 = vadd.f32 %v3189_v51, %v677_v13  ;;  %v866_v51 = vstv %s2998_s9 }
 0x23d   :  { %4382 = sst [smem:[#allocation81_spill]] %s3223_s8  ;;  %v789_v60 = vmul.f32 %v2794_v26, %v788_v38  ;;  %v867_v10 = vmul.f32 %v2794_v26, %v866_v51  ;;  %v999_v13 = vstv %s3179_s10 }
 0x23e   :  { %s3238_s6 = sld [smem:[#allocation6 + $0xfe]]  ;;  %v716_v28 = vadd.f32 %v715_v58, %v712_v0 }
 0x23f   :  { %4383 = sst [smem:[#allocation37_spill]] %s3228_s17  ;;  %v790_v52 = vadd.f32 %v789_v60, %v786_v59 }
 0x240   :  { %s4387_s8 = sld [smem:[#allocation57_spill]]  ;;  %v753_v56 = vstv %s4384_s11 }
 0x241   :  { %s4388_s17 = sld [smem:[#allocation67_spill]]  ;;  %v754_v3 = vmul.f32 %v2810_v37, %v753_v56  ;;  %v883_v56 = vmul.f32 %v2697_v21, %v882_v36 }
 0x242   :  { %s3242_s16 = sld [smem:[#allocation6 + $0xff]]  ;;  %v827_v61 = vstv %s4385_s2 }
 0x243   :  { %s3247_s19 = sld [smem:[#allocation6 + $0x100]]  ;;  %v828_v11 = vmul.f32 %v2794_v26, %v827_v61  ;;  %v755_v46 = vadd.f32 %v754_v3, %v751_v1  ;;  %v887_v33 = vadd.f32 %v886_v22, %v883_v56  ;;  %v960_v56 = vstv %s3120_s7 }
 0x244   :  { %4386 = sst [smem:[#allocation36_spill]] %s3238_s6  ;;  %v963_v22 = vstv %s3126_s12 }
 0x245   :  { %s4391_s26 = sld [smem:[#allocation50_spill]]  ;;  %v829_v34 = vadd.f32 %v828_v11, %v825_v9 }
 0x246   :  { %s4392_s27 = sld [smem:[#allocation61_spill]]  ;;  %v718_v62 = vstv %s4387_s8 }
 0x247   :  { %s3252_s25 = sld [smem:[#allocation6 + $0x101]]  ;;  %v792_v43 = vstv %s4388_s17  ;;  %v719_v17 = vmul.f32 %v2826_v48, %v718_v62 }
 0x248   :  { %4389 = sst [smem:[#allocation46_spill]] %s3242_s16  ;;  %v793_v14 = vmul.f32 %v2810_v37, %v792_v43  ;;  %v864_v43 = vadd.f32 %v863_v53, %v860_v44  ;;  %v905_v53 = vstv %s3045_s18 }
 0x249   :  { %4390 = sst [smem:[#allocation43_spill]] %s3247_s19  ;;  %v720_v55 = vadd.f32 %v719_v17, %v716_v28  ;;  %v897_v28 = vstv %s3036_s30 }
 0x24a   :  { %s4394_s11 = sld [smem:[#allocation79_spill]]  ;;  %v794_v38 = vadd.f32 %v793_v14, %v790_v52  ;;  %v868_v9 = vadd.f32 %v867_v10, %v864_v43  ;;  %v1002_v52 = vstv %s3186_s13  ;;  %v3332_v14 = vpop.eup %2194  ;;  %v906_v10 = vmul.f32 %v2794_v26, %v905_v53 }
 0x24b   :  { %s3257_s16 = sld [smem:[#allocation6 + $0x102]]  ;;  %v683_v5 = vstv %s4391_s26  ;;  %v3338_v23 = vpop.eup %2196  ;;  %v1003_v32 = vmul.f32 %v3067_v6, %v1002_v52 }
 0x24c   :  { %s4396_s19 = sld [smem:[#allocation68_spill]]  ;;  %v757_v8 = vstv %s4392_s27  ;;  %v684_v59 = vadd.f32 %v683_v5, %v681_v41  ;;  %v1006_v41 = vstv %s3193_s14 }
 0x24d   :  { %4393 = sst [smem:[#allocation44_spill]] %s3252_s25  ;;  %v758_v31 = vmul.f32 %v2826_v48, %v757_v8 }
 0x24e   :  { %s3261_s6 = sld [smem:[#allocation6 + $0x103]]  ;;  %2200 = vtanh.f32 %v684_v59  ;;  %v922_v59 = vmul.f32 %v2697_v21, %v921_v47 }
 0x24f   :  { %s3266_s8 = sld [smem:[#allocation6 + $0x104]]  ;;  %v759_v20 = vadd.f32 %v758_v31, %v755_v46  ;;  %v901_v46 = vstv %s3040_s4  ;;  %v1000_v31 = vmul.f32 %v3059_v2, %v999_v13 }
 0x250   :  { %v831_v15 = vstv %s4394_s11  ;;  %s3271_s17 = sld [smem:[#allocation6 + $0x195]]  ;;  %v902_v44 = vmul.f32 %v2772_v7, %v901_v46 }
 0x251   :  { %4395 = sst [smem:[#allocation62_spill]] %s3257_s16  ;;  %v832_v35 = vmul.f32 %v2810_v37, %v831_v15 }
 0x252   :  { %v796_v18 = vstv %s4396_s19  ;;  %s4400_s29 = sld [smem:[#allocation29_spill]] }
 0x253   :  { %s3276_s2 = sld [smem:[#allocation6 + $0x105]]  ;;  %v797_v42 = vmul.f32 %v2826_v48, %v796_v18  ;;  %v833_v58 = vadd.f32 %v832_v35, %v829_v34  ;;  %v3348_v34 = vpop.eup %2198 }
 0x254   :  { %4397 = sst [smem:[#allocation60_spill]] %s3261_s6 }
 0x255   :  { %4398 = sst [smem:[#allocation45_spill]] %s3266_s8  ;;  %v798_v61 = vadd.f32 %v797_v42, %v794_v38  ;;  %v3355_v38 = vpop.eup %2200 }
 0x256   :  { %4399 = sst [smem:[#allocation53_spill]] %s3271_s17 }
 0x257   :  { %s4401_s26 = sld [smem:[#allocation59_spill]] }
 0x258   :  { %s3280_s27 = sld [smem:[#allocation6 + $0x106]]  ;;  %v835_v29 = vstv %s4400_s29 }
 0x259   :  { %s3285_s19 = sld [smem:[#allocation6 + $0x107]]  ;;  %v836_v50 = vmul.f32 %v2826_v48, %v835_v29  ;;  %v898_v29 = vmul.f32 %v2753_v57, %v897_v28 }
 0x25a   :  { %s4402_s11 = sld [smem:[#allocation26_spill]] }
 0x25b   :  { %s3290_s17 = sld [smem:[#allocation6 + $0x108]]  ;;  %v837_v16 = vadd.f32 %v836_v50, %v833_v58  ;;  %v1007_v58 = vmul.f32 %v3074_v12, %v1006_v41 }
 0x25c   :  { %s4403_s5 = sld [smem:[#allocation64_spill]] }
 0x25d   :  { %v722_v49 = vstv %s4401_s26  ;;  %s3297_s15 = sld [smem:[#allocation6 + $0x109]] }
 0x25e   :  { %s4404_s23 = sld [smem:[#allocation78_spill]]  ;;  %v723_v63 = vadd.f32 %v722_v49, %v720_v55  ;;  %v924_v49 = vstv %s3065_s24 }
 0x25f   :  { %s3302_s29 = sld [smem:[#allocation6 + $0x10a]] }
 0x260   :  { %s4405_s8 = sld [smem:[#allocation31_spill]]  ;;  %v889_v27 = vstv %s4402_s11  ;;  %2202 = vtanh.f32 %v723_v63 }
 0x261   :  { %s3306_s21 = sld [smem:[#allocation6 + $0x10b]]  ;;  %v890_v1 = vmul.f32 %v2724_v40, %v889_v27 }
 0x262   :  { %v761_v60 = vstv %s4403_s5  ;;  %s4406_s26 = sld [smem:[#allocation38_spill]] }
 0x263   :  { %s3310_s9 = sld [smem:[#allocation6 + $0x10c]]  ;;  %v762_v3 = vadd.f32 %v761_v60, %v759_v20  ;;  %v891_v17 = vadd.f32 %v890_v1, %v887_v33  ;;  %v1004_v20 = vadd.f32 %v1003_v32, %v1000_v31  ;;  %v925_v60 = vmul.f32 %v2703_v24, %v924_v49 }
 0x264   :  { %v800_v62 = vstv %s4404_s23  ;;  %s4407_s6 = sld [smem:[#allocation12_spill]]  ;;  %v961_v33 = vmul.f32 %v2697_v21, %v960_v56  ;;  %v964_v1 = vmul.f32 %v2703_v24, %v963_v22  ;;  %v1081_v32 = vstv %s3285_s19 }
 0x265   :  { %s3315_s16 = sld [smem:[#allocation6 + $0x10d]]  ;;  %v801_v5 = vadd.f32 %v800_v62, %v798_v61  ;;  %2204 = vtanh.f32 %v762_v3  ;;  %v1010_v61 = vstv %s3198_s0  ;;  %v1074_v3 = vstv %s3276_s2 }
 0x266   :  { %v870_v0 = vstv %s4405_s8  ;;  %s3319_s11 = sld [smem:[#allocation6 + $0x10e]]  ;;  %v3367_v51 = vpop.eup %2202  ;;  %v926_v21 = vadd.f32 %v925_v60, %v922_v59  ;;  %v965_v46 = vadd.f32 %v964_v1, %v961_v33  ;;  %v1082_v53 = vmul.f32 %v3074_v12, %v1081_v32 }
 0x267   :  { %s4408_s5 = sld [smem:[#allocation69_spill]]  ;;  %v871_v11 = vmul.f32 %v2810_v37, %v870_v0  ;;  %2206 = vtanh.f32 %v801_v5  ;;  %v928_v0 = vstv %s3072_s22  ;;  %v967_v5 = vstv %s3134_s28 }
 0x268   :  { %v893_v4 = vstv %s4406_s26  ;;  %s3322_s23 = sld [smem:[#allocation6 + $0x10f]]  ;;  %v929_v24 = vmul.f32 %v2724_v40, %v928_v0  ;;  %v968_v31 = vmul.f32 %v2724_v40, %v967_v5  ;;  %v1022_v0 = vstv %s3213_s20 }
 0x269   :  { %s3325_s25 = sld [smem:[#allocation6 + $0x110]]  ;;  %v894_v18 = vmul.f32 %v2743_v54, %v893_v4  ;;  %v872_v35 = vadd.f32 %v871_v11, %v868_v9  ;;  %v1011_v9 = vmul.f32 %v3089_v30, %v1010_v61  ;;  %v1089_v5 = vstv %s3297_s15 }
 0x26a   :  { %v839_v8 = vstv %s4407_s6  ;;  %s3330_s8 = sld [smem:[#allocation6 + $0x111]] }
 0x26b   :  { %s4409_s26 = sld [smem:[#allocation75_spill]]  ;;  %v840_v25 = vadd.f32 %v839_v8, %v837_v16  ;;  %v895_v42 = vadd.f32 %v894_v18, %v891_v17  ;;  %v3374_v50 = vpop.eup %2204  ;;  %v1077_v16 = vstv %s3280_s27  ;;  %v1008_v8 = vadd.f32 %v1007_v58, %v1004_v20 }
 0x26c   :  { %s3336_s6 = sld [smem:[#allocation6 + $0x112]]  ;;  %v1075_v18 = vmul.f32 %v3059_v2, %v1074_v3  ;;  %v1085_v20 = vstv %s3290_s17 }
 0x26d   :  { %v874_v15 = vstv %s4408_s5  ;;  %s3341_s10 = sld [smem:[#allocation6 + $0x113]]  ;;  %2208 = vtanh.f32 %v840_v25  ;;  %v3381_v62 = vpop.eup %2206  ;;  %v899_v43 = vadd.f32 %v898_v29, %v895_v42  ;;  %v1078_v25 = vmul.f32 %v3067_v6, %v1077_v16 }
 0x26e   :  { %s3346_s13 = sld [smem:[#allocation6 + $0x114]]  ;;  %v875_v36 = vmul.f32 %v2826_v48, %v874_v15  ;;  %v930_v42 = vadd.f32 %v929_v24, %v926_v21  ;;  %v1086_v3 = vmul.f32 %v3089_v30, %v1085_v20 }
 0x26f   :  { %s4412_s5 = sld [smem:[#allocation28_spill]]  ;;  %v903_v15 = vadd.f32 %v902_v44, %v899_v43  ;;  %v1079_v44 = vadd.f32 %v1078_v25, %v1075_v18 }
 0x270   :  { %s3353_s30 = sld [smem:[#allocation6 + $0x115]]  ;;  %v876_v27 = vadd.f32 %v875_v36, %v872_v35 }
 0x271   :  { %v878_v39 = vstv %s4409_s26  ;;  %s3360_s4 = sld [smem:[#allocation6 + $0x116]]  ;;  %v907_v40 = vadd.f32 %v906_v10, %v903_v15  ;;  %v1083_v1 = vadd.f32 %v1082_v53, %v1079_v44 }
 0x272   :  { %s3365_s26 = sld [smem:[#allocation6 + $0x196]]  ;;  %v879_v13 = vadd.f32 %v878_v39, %v876_v27  ;;  %v1012_v39 = vadd.f32 %v1011_v9, %v1008_v8 }
 0x273   :  { %4410 = sst [smem:[#allocation51_spill]] %s3341_s10  ;;  %v3399_v11 = vpop.eup %2208 }
 0x274   :  { %4411 = sst [smem:[#allocation41_spill]] %s3346_s13  ;;  %2210 = vtanh.f32 %v879_v13  ;;  %v1023_v13 = vmul.f32 %v3332_v14, %v1022_v0 }
 0x275   :  { %v909_v55 = vstv %s4412_s5  ;;  %s3372_s1 = sld [smem:[#allocation6 + $0x117]] }
 0x276   :  { %4413 = sst [smem:[#allocation11_spill]] %s3353_s30  ;;  %v910_v63 = vmul.f32 %v2810_v37, %v909_v55  ;;  %v969_v55 = vadd.f32 %v968_v31, %v965_v46  ;;  %v1087_v46 = vadd.f32 %v1086_v3, %v1083_v1  ;;  %v1090_v31 = vmul.f32 %v3107_v45, %v1089_v5 }
 0x277   :  { %4414 = sst [smem:[#allocation15_spill]] %s3360_s4 }
 0x278   :  { %4415 = sst [smem:[#allocation48_spill]] %s3365_s26 }
 0x279   :  { %s4416_s18 = sld [smem:[#allocation76_spill]] }
 0x27a   :  { %s3379_s24 = sld [smem:[#allocation6 + $0x118]]  ;;  %v3449_v16 = vpop.eup %2210 }
 0x27b   :  { %s4417_s7 = sld [smem:[#allocation33_spill]]  ;;  %v1149_v59 = vstv %s3372_s1 }
 0x27c   :  { %s3386_s12 = sld [smem:[#allocation6 + $0x119]]  ;;  %v1150_v8 = vmul.f32 %v3059_v2, %v1149_v59 }
 0x27d   :  { %s4418_s14 = sld [smem:[#allocation39_spill]] }
 0x27e   :  { %s3392_s0 = sld [smem:[#allocation6 + $0x11a]] }
 0x27f   :  { %v913_v4 = vstv %s4416_s18  ;;  %s3397_s5 = sld [smem:[#allocation6 + $0x11b]] }
 0x280   :  { %s4419_s22 = sld [smem:[#allocation27_spill]]  ;;  %v3411_v28 = vmul.f32 %v2826_v48, %v913_v4  ;;  %v1152_v60 = vstv %s3379_s24 }
 0x281   :  { %s4420_s26 = sld [smem:[#allocation34_spill]]  ;;  %v1014_v52 = vstv %s4417_s7  ;;  %v1153_v9 = vmul.f32 %v3067_v6, %v1152_v60 }
 0x282   :  { %s3403_s2 = sld [smem:[#allocation6 + $0x11c]]  ;;  %v1015_v41 = vmul.f32 %v3107_v45, %v1014_v52  ;;  %v1156_v21 = vstv %s3386_s12 }
 0x283   :  { %v932_v17 = vstv %s4418_s14  ;;  %s4421_s28 = sld [smem:[#allocation19_spill]] }
 0x284   :  { %s3408_s27 = sld [smem:[#allocation6 + $0x11d]]  ;;  %v933_v29 = vmul.f32 %v2743_v54, %v932_v17  ;;  %v1016_v58 = vadd.f32 %v1015_v41, %v1012_v39  ;;  %v1154_v39 = vadd.f32 %v1153_v9, %v1150_v8  ;;  %v1157_v41 = vmul.f32 %v3074_v12, %v1156_v21 }
 0x285   :  { %s4422_s18 = sld [smem:[#allocation70_spill]]  ;;  %v1101_v9 = vstv %s3310_s9 }
 0x286   :  { %s3415_s7 = sld [smem:[#allocation6 + $0x11e]]  ;;  %v917_v35 = vstv %s4419_s22  ;;  %v934_v61 = vadd.f32 %v933_v29, %v930_v42 }
 0x287   :  { %v971_v36 = vstv %s4420_s26  ;;  %s4423_s14 = sld [smem:[#allocation24_spill]] }
 0x288   :  { %s3420_s4 = sld [smem:[#allocation6 + $0x11f]]  ;;  %v972_v56 = vmul.f32 %v2743_v54, %v971_v36  ;;  %v911_v54 = vadd.f32 %v910_v63, %v907_v40  ;;  %v1093_v36 = vstv %s3302_s29 }
 0x289   :  { %v1018_v47 = vstv %s4421_s28  ;;  %s3424_s30 = sld [smem:[#allocation6 + $0x120]]  ;;  %v1094_v20 = vmul.f32 %v3128_v19, %v1093_v36 }
 0x28a   :  { %s4424_s19 = sld [smem:[#allocation32_spill]]  ;;  %v1019_v27 = vmul.f32 %v3128_v19, %v1018_v47  ;;  %v3481_v40 = vadd.f32 %v3411_v28, %v911_v54 }
 0x28b   :  { %v936_v49 = vstv %s4422_s18  ;;  %s3428_s26 = sld [smem:[#allocation6 + $0x121]] }
 0x28c   :  { %s3433_s13 = sld [smem:[#allocation6 + $0x122]]  ;;  %v937_v43 = vmul.f32 %v2753_v57, %v936_v49  ;;  %v1020_v63 = vadd.f32 %v1019_v27, %v1016_v58  ;;  %v1097_v58 = vstv %s3306_s21  ;;  %v1158_v27 = vadd.f32 %v1157_v41, %v1154_v39 }
 0x28d   :  { %v975_v22 = vstv %s4423_s14  ;;  %s4425_s28 = sld [smem:[#allocation42_spill]]  ;;  %v1098_v3 = vmul.f32 %v3332_v14, %v1097_v58  ;;  %v1105_v39 = vstv %s3315_s16  ;;  %v918_v58 = vadd.f32 %v917_v35, %v3481_v40 }
 0x28e   :  { %s3438_s18 = sld [smem:[#allocation6 + $0x123]]  ;;  %v976_v33 = vmul.f32 %v2753_v57, %v975_v22  ;;  %v973_v57 = vadd.f32 %v972_v56, %v969_v55  ;;  %v938_v24 = vadd.f32 %v937_v43, %v934_v61  ;;  %v1024_v29 = vadd.f32 %v1023_v13, %v1020_v63 }
 0x28f   :  { %s3443_s10 = sld [smem:[#allocation6 + $0x124]]  ;;  %v1091_v22 = vadd.f32 %v1090_v31, %v1087_v46  ;;  %v1102_v31 = vmul.f32 %v3338_v23, %v1101_v9  ;;  %2212 = vtanh.f32 %v918_v58 }
 0x290   :  { %v940_v10 = vstv %s4424_s19  ;;  %s4427_s17 = sld [smem:[#allocation77_spill]]  ;;  %v977_v42 = vadd.f32 %v976_v33, %v973_v57 }
 0x291   :  { %s4428_s14 = sld [smem:[#allocation25_spill]]  ;;  %v941_v52 = vmul.f32 %v2772_v7, %v940_v10  ;;  %v1164_v10 = vstv %s3397_s5  ;;  %v1095_v1 = vadd.f32 %v1094_v20, %v1091_v22  ;;  %v1106_v20 = vmul.f32 %v3348_v34, %v1105_v39 }
 0x292   :  { %s3447_s1 = sld [smem:[#allocation6 + $0x125]]  ;;  %v1165_v63 = vmul.f32 %v3107_v45, %v1164_v10 }
 0x293   :  { %s4429_s24 = sld [smem:[#allocation20_spill]]  ;;  %v979_v4 = vstv %s4425_s28  ;;  %v942_v49 = vadd.f32 %v941_v52, %v938_v24  ;;  %v1168_v24 = vstv %s3403_s2  ;;  %v1099_v46 = vadd.f32 %v1098_v3, %v1095_v1 }
 0x294   :  { %s3455_s20 = sld [smem:[#allocation6 + $0x126]]  ;;  %v980_v25 = vmul.f32 %v2772_v7, %v979_v4  ;;  %v1160_v7 = vstv %s3392_s0 }
 0x295   :  { %4426 = sst [smem:[#allocation47_spill]] %s3443_s10  ;;  %v1161_v59 = vmul.f32 %v3089_v30, %v1160_v7  ;;  %v1103_v22 = vadd.f32 %v1102_v31, %v1099_v46  ;;  %v1117_v46 = vstv %s3325_s25 }
 0x296   :  { %s4431_s19 = sld [smem:[#allocation35_spill]]  ;;  %v944_v15 = vstv %s4427_s17  ;;  %v981_v60 = vadd.f32 %v980_v25, %v977_v42  ;;  %v1169_v42 = vmul.f32 %v3128_v19, %v1168_v24 }
 0x297   :  { %s3459_s10 = sld [smem:[#allocation6 + $0x127]]  ;;  %v1026_v17 = vstv %s4428_s14  ;;  %v945_v44 = vmul.f32 %v2794_v26, %v944_v15  ;;  %v1162_v57 = vadd.f32 %v1161_v59, %v1158_v27  ;;  %v1038_v15 = vstv %s3233_s3 }
 0x298   :  { %s3464_s15 = sld [smem:[#allocation6 + $0x129]]  ;;  %v1027_v47 = vmul.f32 %v3338_v23, %v1026_v17  ;;  %v1039_v7 = vmul.f32 %v3367_v51, %v1038_v15  ;;  %v1109_v27 = vstv %s3319_s11  ;;  %v1107_v1 = vadd.f32 %v1106_v20, %v1103_v22 }
 0x299   :  { %v948_v18 = vstv %s4429_s24  ;;  %s4433_s28 = sld [smem:[#allocation81_spill]]  ;;  %v946_v0 = vadd.f32 %v945_v44, %v942_v49  ;;  %v1166_v41 = vadd.f32 %v1165_v63, %v1162_v57  ;;  %v1172_v49 = vstv %s3408_s27 }
 0x29a   :  { %4430 = sst [smem:[#allocation13_spill]] %s3455_s20  ;;  %v949_v55 = vmul.f32 %v2810_v37, %v948_v18  ;;  %v1028_v61 = vadd.f32 %v1027_v47, %v1024_v29  ;;  %v1110_v3 = vmul.f32 %v3355_v38, %v1109_v27  ;;  %v1121_v22 = vstv %s3330_s8 }
 0x29b   :  { %s3469_s20 = sld [smem:[#allocation6 + $0x12a]]  ;;  %v1170_v59 = vadd.f32 %v1169_v42, %v1166_v41  ;;  %v1184_v41 = vstv %s3424_s30 }
 0x29c   :  { %v983_v32 = vstv %s4431_s19  ;;  %s4434_s12 = sld [smem:[#allocation80_spill]]  ;;  %v950_v25 = vadd.f32 %v949_v55, %v946_v0  ;;  %v1176_v0 = vstv %s3415_s7  ;;  %v1111_v15 = vadd.f32 %v1110_v3, %v1107_v1 }
 0x29d   :  { %4432 = sst [smem:[#allocation66_spill]] %s3459_s10  ;;  %v984_v28 = vmul.f32 %v2794_v26, %v983_v32  ;;  %v1177_v9 = vmul.f32 %v3338_v23, %v1176_v0 }
 0x29e   :  { %s3474_s17 = sld [smem:[#allocation6 + $0x128]]  ;;  %v1224_v4 = vstv %s3464_s15 }
 0x29f   :  { %s3478_s14 = sld [smem:[#allocation6 + $0x197]]  ;;  %v1030_v53 = vstv %s4433_s28  ;;  %v1225_v17 = vmul.f32 %v3059_v2, %v1224_v4 }
 0x2a0   :  { %s3485_s29 = sld [smem:[#allocation6 + $0x12b]]  ;;  %v1031_v43 = vmul.f32 %v3348_v34, %v1030_v53 }
 0x2a1   :  { %s4437_s24 = sld [smem:[#allocation40_spill]]  ;;  %v1227_v5 = vstv %s3469_s20 }
 0x2a2   :  { %v987_v56 = vstv %s4434_s12  ;;  %s4438_s19 = sld [smem:[#allocation37_spill]]  ;;  %v1032_v13 = vadd.f32 %v1031_v43, %v1028_v61  ;;  %v1228_v18 = vmul.f32 %v3067_v6, %v1227_v5  ;;  %v1113_v5 = vstv %s3322_s23 }
 0x2a3   :  { %s3490_s0 = sld [smem:[#allocation6 + $0x12c]]  ;;  %v988_v26 = vmul.f32 %v2810_v37, %v987_v56  ;;  %v985_v37 = vadd.f32 %v984_v28, %v981_v60  ;;  %v1173_v60 = vmul.f32 %v3332_v14, %v1172_v49 }
 0x2a4   :  { %4435 = sst [smem:[#allocation49_spill]] %s3474_s17  ;;  %v1229_v55 = vadd.f32 %v1228_v18, %v1225_v17  ;;  %v1114_v17 = vmul.f32 %v3367_v51, %v1113_v5 }
 0x2a5   :  { %4436 = sst [smem:[#allocation22_spill]] %s3478_s14  ;;  %v989_v29 = vadd.f32 %v988_v26, %v985_v37 }
 0x2a6   :  { %s3495_s28 = sld [smem:[#allocation6 + $0x12d]]  ;;  %v1231_v32 = vstv %s3485_s29 }
 0x2a7   :  { %s4439_s14 = sld [smem:[#allocation14_spill]]  ;;  %v952_v54 = vstv %s4437_s24 }
 0x2a8   :  { %s3499_s12 = sld [smem:[#allocation6 + $0x12e]]  ;;  %v1034_v33 = vstv %s4438_s19  ;;  %v953_v52 = vmul.f32 %v2826_v48, %v952_v54 }
 0x2a9   :  { %s3504_s21 = sld [smem:[#allocation6 + $0x12f]]  ;;  %v1035_v21 = vmul.f32 %v3355_v38, %v1034_v33  ;;  %v1235_v28 = vstv %s3490_s0 }
 0x2aa   :  { %s3509_s17 = sld [smem:[#allocation6 + $0x130]]  ;;  %v954_v56 = vadd.f32 %v953_v52, %v950_v25  ;;  %v1236_v35 = vmul.f32 %v3089_v30, %v1235_v28  ;;  %v1185_v28 = vmul.f32 %v3355_v38, %v1184_v41 }
 0x2ab   :  { %s3514_s5 = sld [smem:[#allocation6 + $0x131]]  ;;  %v1036_v47 = vadd.f32 %v1035_v21, %v1032_v13  ;;  %v1180_v13 = vstv %s3420_s4 }
 0x2ac   :  { %s3518_s24 = sld [smem:[#allocation6 + $0x132]]  ;;  %v1239_v4 = vstv %s3495_s28 }
 0x2ad   :  { %v991_v8 = vstv %s4439_s14  ;;  %s3524_s9 = sld [smem:[#allocation6 + $0x133]]  ;;  %v1040_v43 = vadd.f32 %v1039_v7, %v1036_v47  ;;  %v1240_v52 = vmul.f32 %v3107_v45, %v1239_v4  ;;  %v1125_v4 = vstv %s3336_s6 }
 0x2ae   :  { %s4440_s20 = sld [smem:[#allocation18_spill]]  ;;  %v992_v36 = vmul.f32 %v2826_v48, %v991_v8  ;;  %v1232_v48 = vmul.f32 %v3074_v12, %v1231_v32  ;;  %v1174_v8 = vadd.f32 %v1173_v60, %v1170_v59  ;;  %v1243_v18 = vstv %s3499_s12 }
 0x2af   :  { %s4441_s15 = sld [smem:[#allocation36_spill]]  ;;  %v1181_v32 = vmul.f32 %v3348_v34, %v1180_v13  ;;  %v1188_v59 = vstv %s3428_s26 }
 0x2b0   :  { %s3528_s2 = sld [smem:[#allocation6 + $0x134]]  ;;  %v993_v61 = vadd.f32 %v992_v36, %v989_v29  ;;  %v1233_v33 = vadd.f32 %v1232_v48, %v1229_v55  ;;  %v1178_v31 = vadd.f32 %v1177_v9, %v1174_v8  ;;  %v1244_v29 = vmul.f32 %v3128_v19, %v1243_v18  ;;  %v3603_v48 = vpop.eup %2212 }
 0x2b1   :  { %s3533_s3 = sld [smem:[#allocation6 + $0x135]]  ;;  %v1247_v55 = vstv %s3504_s21  ;;  %v1251_v1 = vstv %s3509_s17  ;;  %v1189_v8 = vmul.f32 %v3367_v51, %v1188_v59  ;;  %v1126_v18 = vmul.f32 %v3399_v11, %v1125_v4 }
 0x2b2   :  { %s3537_s14 = sld [smem:[#allocation6 + $0x136]]  ;;  %v1237_v24 = vadd.f32 %v1236_v35, %v1233_v33  ;;  %v1182_v20 = vadd.f32 %v1181_v32, %v1178_v31  ;;  %v1248_v0 = vmul.f32 %v3332_v14, %v1247_v55  ;;  %v1259_v41 = vstv %s3518_s24 }
 0x2b3   :  { %s3542_s16 = sld [smem:[#allocation6 + $0x137]] }
 0x2b4   :  { %v956_v44 = vstv %s4440_s20  ;;  %s4442_s29 = sld [smem:[#allocation21_spill]]  ;;  %v1241_v42 = vadd.f32 %v1240_v52, %v1237_v24  ;;  %v1186_v5 = vadd.f32 %v1185_v28, %v1182_v20  ;;  %v1252_v24 = vmul.f32 %v3338_v23, %v1251_v1 }
 0x2b5   :  { %v1042_v53 = vstv %s4441_s15  ;;  %s4443_s19 = sld [smem:[#allocation46_spill]]  ;;  %v957_v40 = vadd.f32 %v956_v44, %v954_v56  ;;  %v1115_v44 = vadd.f32 %v1114_v17, %v1111_v15 }
 0x2b6   :  { %s3546_s10 = sld [smem:[#allocation6 + $0x138]]  ;;  %v1043_v10 = vmul.f32 %v3374_v50, %v1042_v53  ;;  %v1118_v53 = vmul.f32 %v3374_v50, %v1117_v46  ;;  %v1190_v31 = vadd.f32 %v1189_v8, %v1186_v5  ;;  %v1263_v5 = vstv %s3524_s9 }
 0x2b7   :  { %s3553_s27 = sld [smem:[#allocation6 + $0x139]]  ;;  %2214 = vtanh.f32 %v957_v40  ;;  %v1122_v40 = vmul.f32 %v3381_v62, %v1121_v22 }
 0x2b8   :  { %s3557_s20 = sld [smem:[#allocation6 + $0x13b]]  ;;  %v1044_v63 = vadd.f32 %v1043_v10, %v1040_v43  ;;  %v1245_v10 = vadd.f32 %v1244_v29, %v1241_v42  ;;  %v1119_v35 = vadd.f32 %v1118_v53, %v1115_v44 }
 0x2b9   :  { %s3562_s11 = sld [smem:[#allocation6 + $0x13c]] }
 0x2ba   :  { %v995_v54 = vstv %s4442_s29  ;;  %s4444_s22 = sld [smem:[#allocation43_spill]]  ;;  %v1123_v17 = vadd.f32 %v1122_v40, %v1119_v35 }
 0x2bb   :  { %v1046_v26 = vstv %s4443_s19  ;;  %s3566_s0 = sld [smem:[#allocation6 + $0x13a]]  ;;  %v996_v57 = vadd.f32 %v995_v54, %v993_v61 }
 0x2bc   :  { %s3570_s7 = sld [smem:[#allocation6 + $0x198]]  ;;  %v1047_v37 = vmul.f32 %v3381_v62, %v1046_v26  ;;  %v1127_v53 = vadd.f32 %v1126_v18, %v1123_v17  ;;  %v1264_v17 = vmul.f32 %v3367_v51, %v1263_v5  ;;  %v1275_v5 = vstv %s3537_s14 }
 0x2bd   :  { %s4446_s15 = sld [smem:[#allocation44_spill]]  ;;  %2216 = vtanh.f32 %v996_v57  ;;  %v3610_v58 = vpop.eup %2214  ;;  %v1192_v57 = vstv %s3433_s13 }
 0x2be   :  { %s3574_s29 = sld [smem:[#allocation6 + $0x13d]]  ;;  %v1048_v36 = vadd.f32 %v1047_v37, %v1044_v63  ;;  %v1299_v47 = vstv %s3557_s20  ;;  %v1193_v32 = vmul.f32 %v3374_v50, %v1192_v57 }
 0x2bf   :  { %s3578_s23 = sld [smem:[#allocation6 + $0x13e]]  ;;  %v1302_v7 = vstv %s3562_s11  ;;  %v1300_v60 = vmul.f32 %v3059_v2, %v1299_v47 }
 0x2c0   :  { %v1050_v21 = vstv %s4444_s22  ;;  %s3582_s28 = sld [smem:[#allocation6 + $0x13f]]  ;;  %v1303_v61 = vmul.f32 %v3067_v6, %v1302_v7  ;;  %v1194_v20 = vadd.f32 %v1193_v32, %v1190_v31  ;;  %v1267_v32 = vstv %s3528_s2 }
 0x2c1   :  { %s3587_s4 = sld [smem:[#allocation6 + $0x140]]  ;;  %v1051_v39 = vmul.f32 %v3399_v11, %v1050_v21  ;;  %v1249_v21 = vadd.f32 %v1248_v0, %v1245_v10 }
 0x2c2   :  { %4445 = sst [smem:[#allocation54_spill]] %s3570_s7  ;;  %v1304_v63 = vadd.f32 %v1303_v61, %v1300_v60 }
 0x2c3   :  { %v1054_v25 = vstv %s4446_s15  ;;  %s4447_s19 = sld [smem:[#allocation62_spill]]  ;;  %v1052_v43 = vadd.f32 %v1051_v39, %v1048_v36  ;;  %v3622_v26 = vpop.eup %2216  ;;  %v1196_v36 = vstv %s3438_s18  ;;  %v1253_v7 = vadd.f32 %v1252_v24, %v1249_v21 }
 0x2c4   :  { %s3591_s22 = sld [smem:[#allocation6 + $0x141]]  ;;  %v1055_v49 = vmul.f32 %v3449_v16, %v1054_v25  ;;  %v1306_v54 = vstv %s3574_s29  ;;  %v1255_v25 = vstv %s3514_s5  ;;  %v1197_v22 = vmul.f32 %v3381_v62, %v1196_v36 }
 0x2c5   :  { %s4448_s12 = sld [smem:[#allocation60_spill]]  ;;  %v1307_v37 = vmul.f32 %v3074_v12, %v1306_v54  ;;  %v1310_v52 = vstv %s3578_s23 }
 0x2c6   :  { %s3596_s25 = sld [smem:[#allocation6 + $0x142]]  ;;  %v1056_v13 = vadd.f32 %v1055_v49, %v1052_v43  ;;  %v1311_v29 = vmul.f32 %v3089_v30, %v1310_v52  ;;  %v1256_v49 = vmul.f32 %v3348_v34, %v1255_v25  ;;  %v1314_v44 = vstv %s3582_s28 }
 0x2c7   :  { %s3601_s15 = sld [smem:[#allocation6 + $0x143]]  ;;  %v1308_v42 = vadd.f32 %v1307_v37, %v1304_v63  ;;  %v1315_v61 = vmul.f32 %v3107_v45, %v1314_v44  ;;  %v1318_v54 = vstv %s3587_s4  ;;  %v1204_v37 = vstv %s3447_s1 }
 0x2c8   :  { %s3608_s30 = sld [smem:[#allocation6 + $0x144]]  ;;  %v1257_v0 = vadd.f32 %v1256_v49, %v1253_v7  ;;  %v1198_v24 = vadd.f32 %v1197_v22, %v1194_v20 }
 0x2c9   :  { %v1058_v56 = vstv %s4447_s19  ;;  %s3616_s21 = sld [smem:[#allocation6 + $0x145]]  ;;  %v1312_v60 = vadd.f32 %v1311_v29, %v1308_v42 }
 0x2ca   :  { %s4449_s20 = sld [smem:[#allocation45_spill]]  ;;  %v1059_v33 = vmul.f32 %v3603_v48, %v1058_v56  ;;  %v1322_v18 = vstv %s3591_s22 }
 0x2cb   :  { %v1062_v27 = vstv %s4448_s12  ;;  %s3620_s8 = sld [smem:[#allocation6 + $0x146]] }
 0x2cc   :  { %s3627_s26 = sld [smem:[#allocation6 + $0x147]]  ;;  %v1063_v3 = vmul.f32 %v3610_v58, %v1062_v27  ;;  %v1060_v47 = vadd.f32 %v1059_v33, %v1056_v13  ;;  %v1260_v27 = vmul.f32 %v3355_v38, %v1259_v41  ;;  %v1316_v13 = vadd.f32 %v1315_v61, %v1312_v60 }
 0x2cd   :  { %s4450_s11 = sld [smem:[#allocation53_spill]]  ;;  %v1205_v41 = vmul.f32 %v3449_v16, %v1204_v37 }
 0x2ce   :  { %s3632_s29 = sld [smem:[#allocation6 + $0x148]]  ;;  %v1064_v40 = vadd.f32 %v1063_v3, %v1060_v47  ;;  %v1319_v3 = vmul.f32 %v3128_v19, %v1318_v54  ;;  %v1261_v52 = vadd.f32 %v1260_v27, %v1257_v0  ;;  %v1271_v27 = vstv %s3533_s3 }
 0x2cf   :  { %s4451_s19 = sld [smem:[#allocation51_spill]] }
 0x2d0   :  { %v1066_v9 = vstv %s4449_s20  ;;  %s3637_s17 = sld [smem:[#allocation6 + $0x149]]  ;;  %v1320_v7 = vadd.f32 %v1319_v3, %v1316_v13 }
 0x2d1   :  { %s3641_s6 = sld [smem:[#allocation6 + $0x14d]]  ;;  %v1067_v39 = vmul.f32 %v3622_v26, %v1066_v9 }
 0x2d2   :  { %s3646_s13 = sld [smem:[#allocation6 + $0x14e]] }
 0x2d3   :  { %v1070_v15 = vstv %s4450_s11  ;;  %s4452_s12 = sld [smem:[#allocation41_spill]]  ;;  %v1068_v25 = vadd.f32 %v1067_v39, %v1064_v40  ;;  %v1323_v39 = vmul.f32 %v3332_v14, %v1322_v18  ;;  %v1330_v40 = vstv %s3601_s15 }
 0x2d4   :  { %s3651_s20 = sld [smem:[#allocation6 + $0x14f]]  ;;  %v1331_v3 = vmul.f32 %v3348_v34, %v1330_v40  ;;  %v1276_v18 = vmul.f32 %v3399_v11, %v1275_v5 }
 0x2d5   :  { %v1129_v46 = vstv %s4451_s19  ;;  %s4453_s23 = sld [smem:[#allocation47_spill]]  ;;  %v1071_v22 = vadd.f32 %v1070_v15, %v1068_v25  ;;  %v1324_v15 = vadd.f32 %v1323_v39, %v1320_v7 }
 0x2d6   :  { %s3656_s7 = sld [smem:[#allocation6 + $0x150]]  ;;  %v1130_v55 = vmul.f32 %v3449_v16, %v1129_v46 }
 0x2d7   :  { %s3660_s5 = sld [smem:[#allocation6 + $0x14a]]  ;;  %v1374_v59 = vstv %s3641_s6  ;;  %2218 = vtanh.f32 %v1071_v22 }
 0x2d8   :  { %s3665_s18 = sld [smem:[#allocation6 + $0x14b]]  ;;  %v1375_v43 = vmul.f32 %v3059_v2, %v1374_v59  ;;  %v1377_v10 = vstv %s3646_s13  ;;  %v1131_v1 = vadd.f32 %v1130_v55, %v1127_v53  ;;  %v1265_v53 = vadd.f32 %v1264_v17, %v1261_v52 }
 0x2d9   :  { %v1133_v56 = vstv %s4452_s12  ;;  %s3669_s24 = sld [smem:[#allocation6 + $0x14c]]  ;;  %v1378_v33 = vmul.f32 %v3067_v6, %v1377_v10  ;;  %v1268_v55 = vmul.f32 %v3374_v50, %v1267_v32 }
 0x2da   :  { %s4454_s28 = sld [smem:[#allocation11_spill]]  ;;  %v1381_v35 = vstv %s3651_s20  ;;  %v1134_v4 = vmul.f32 %v3603_v48, %v1133_v56  ;;  %v1326_v56 = vstv %s3596_s25 }
 0x2db   :  { %v1200_v28 = vstv %s4453_s23  ;;  %s3675_s19 = sld [smem:[#allocation6 + $0x151]]  ;;  %v1379_v57 = vadd.f32 %v1378_v33, %v1375_v43  ;;  %v1382_v63 = vmul.f32 %v3074_v12, %v1381_v35  ;;  %v1327_v10 = vmul.f32 %v3338_v23, %v1326_v56 }
 0x2dc   :  { %s3678_s12 = sld [smem:[#allocation6 + $0x199]]  ;;  %v1201_v9 = vmul.f32 %v3399_v11, %v1200_v28  ;;  %v1385_v21 = vstv %s3656_s7  ;;  %v1135_v46 = vadd.f32 %v1134_v4, %v1131_v1  ;;  %v1269_v33 = vadd.f32 %v1268_v55, %v1265_v53 }
 0x2dd   :  { %s3684_s6 = sld [smem:[#allocation6 + $0x152]]  ;;  %v1383_v42 = vadd.f32 %v1382_v63, %v1379_v57  ;;  %v1386_v29 = vmul.f32 %v3089_v30, %v1385_v21  ;;  %v1272_v35 = vmul.f32 %v3381_v62, %v1271_v27  ;;  %v1328_v13 = vadd.f32 %v1327_v10, %v1324_v15 }
 0x2de   :  { %s3689_s4 = sld [smem:[#allocation6 + $0x153]]  ;;  %v1202_v44 = vadd.f32 %v1201_v9, %v1198_v24  ;;  %v1334_v9 = vstv %s3608_s30  ;;  %v1283_v55 = vstv %s3546_s10 }
 0x2df   :  { %s4455_s13 = sld [smem:[#allocation15_spill]]  ;;  %v1387_v60 = vadd.f32 %v1386_v29, %v1383_v42  ;;  %v1273_v17 = vadd.f32 %v1272_v35, %v1269_v33  ;;  %v1332_v7 = vadd.f32 %v1331_v3, %v1328_v13  ;;  %v1284_v5 = vmul.f32 %v3603_v48, %v1283_v55 }
 0x2e0   :  { %v1137_v8 = vstv %s4454_s28  ;;  %s3694_s20 = sld [smem:[#allocation6 + $0x154]]  ;;  %v1206_v54 = vadd.f32 %v1205_v41, %v1202_v44 }
 0x2e1   :  { %s4456_s9 = sld [smem:[#allocation13_spill]]  ;;  %v1138_v31 = vmul.f32 %v3610_v58, %v1137_v8  ;;  %v1389_v49 = vstv %s3675_s19  ;;  %v1279_v8 = vstv %s3542_s16  ;;  %v1277_v53 = vadd.f32 %v1276_v18, %v1273_v17 }
 0x2e2   :  { %s3698_s23 = sld [smem:[#allocation6 + $0x155]]  ;;  %v1390_v61 = vmul.f32 %v3107_v45, %v1389_v49  ;;  %v1280_v25 = vmul.f32 %v3449_v16, %v1279_v8 }
 0x2e3   :  { %s3702_s1 = sld [smem:[#allocation6 + $0x156]]  ;;  %v1139_v20 = vadd.f32 %v1138_v31, %v1135_v46  ;;  %v1393_v0 = vstv %s3684_s6  ;;  %v1335_v46 = vmul.f32 %v3355_v38, %v1334_v9  ;;  %v1338_v31 = vstv %s3616_s21 }
 0x2e4   :  { %s3707_s7 = sld [smem:[#allocation6 + $0x157]]  ;;  %v1391_v57 = vadd.f32 %v1390_v61, %v1387_v60  ;;  %v1394_v63 = vmul.f32 %v3128_v19, %v1393_v0  ;;  %v1397_v21 = vstv %s3689_s4  ;;  %v1342_v60 = vstv %s3620_s8 }
 0x2e5   :  { %v1141_v36 = vstv %s4455_s13  ;;  %s4457_s22 = sld [smem:[#allocation66_spill]]  ;;  %v1398_v41 = vmul.f32 %v3332_v14, %v1397_v21  ;;  %v1336_v10 = vadd.f32 %v1335_v46, %v1332_v7  ;;  %v1281_v9 = vadd.f32 %v1280_v25, %v1277_v53 }
 0x2e6   :  { %s3712_s28 = sld [smem:[#allocation6 + $0x158]]  ;;  %v1142_v28 = vmul.f32 %v3622_v26, %v1141_v36  ;;  %v1395_v36 = vadd.f32 %v1394_v63, %v1391_v57  ;;  %v1401_v39 = vstv %s3694_s20  ;;  %v1287_v57 = vstv %s3553_s27 }
 0x2e7   :  { %v1208_v47 = vstv %s4456_s9  ;;  %s3716_s2 = sld [smem:[#allocation6 + $0x159]] }
 0x2e8   :  { %s3722_s13 = sld [smem:[#allocation6 + $0x15a]]  ;;  %v1209_v59 = vmul.f32 %v3603_v48, %v1208_v47  ;;  %v3737_v1 = vadd.f32 %v1142_v28, %v1139_v20  ;;  %v3768_v47 = vpop.eup %2218  ;;  %v1339_v20 = vmul.f32 %v3367_v51, %v1338_v31  ;;  %v1399_v61 = vadd.f32 %v1398_v41, %v1395_v36 }
 0x2e9   :  { %s4458_s19 = sld [smem:[#allocation48_spill]]  ;;  %v1405_v0 = vstv %s3698_s23  ;;  %v1409_v17 = vstv %s3702_s1  ;;  %v1346_v36 = vstv %s3627_s26  ;;  %v1288_v41 = vmul.f32 %v3610_v58, %v1287_v57 }
 0x2ea   :  { %s3726_s9 = sld [smem:[#allocation6 + $0x15b]]  ;;  %v1210_v24 = vadd.f32 %v1209_v59, %v1206_v54  ;;  %v1406_v21 = vmul.f32 %v3348_v34, %v1405_v0  ;;  %v1347_v53 = vmul.f32 %v3381_v62, %v1346_v36  ;;  %v1413_v55 = vstv %s3707_s7 }
 0x2eb   :  { %v1212_v43 = vstv %s4457_s22  ;;  %s3731_s25 = sld [smem:[#allocation6 + $0x15f]] }
 0x2ec   :  { %s3735_s3 = sld [smem:[#allocation6 + $0x160]]  ;;  %v1213_v37 = vmul.f32 %v3610_v58, %v1212_v43  ;;  %v1402_v43 = vmul.f32 %v3338_v23, %v1401_v39  ;;  %v1285_v39 = vadd.f32 %v1284_v5, %v1281_v9  ;;  %v1358_v5 = vstv %s3660_s5 }
 0x2ed   :  { %s4459_s11 = sld [smem:[#allocation49_spill]]  ;;  %v1421_v9 = vstv %s3716_s2 }
 0x2ee   :  { %s3741_s22 = sld [smem:[#allocation6 + $0x161]]  ;;  %v1214_v35 = vadd.f32 %v1213_v37, %v1210_v24  ;;  %v1343_v37 = vmul.f32 %v3374_v50, %v1342_v60  ;;  %v1403_v3 = vadd.f32 %v1402_v43, %v1399_v61  ;;  %v1422_v36 = vmul.f32 %v3381_v62, %v1421_v9 }
 0x2ef   :  { %v1145_v4 = vstv %s4458_s19  ;;  %s3746_s6 = sld [smem:[#allocation6 + $0x162]] }
 0x2f0   :  { %s3751_s15 = sld [smem:[#allocation6 + $0x163]]  ;;  %v1146_v46 = vadd.f32 %v1145_v4, %v3737_v1  ;;  %v1407_v1 = vadd.f32 %v1406_v21, %v1403_v3  ;;  %v1410_v4 = vmul.f32 %v3355_v38, %v1409_v17 }
 0x2f1   :  { %s3755_s14 = sld [smem:[#allocation6 + $0x164]]  ;;  %v1449_v32 = vstv %s3731_s25 }
 0x2f2   :  { %s3761_s16 = sld [smem:[#allocation6 + $0x165]]  ;;  %v1450_v42 = vmul.f32 %v3059_v2, %v1449_v32  ;;  %v1452_v29 = vstv %s3735_s3  ;;  %2220 = vtanh.f32 %v1146_v46  ;;  %v1359_v46 = vmul.f32 %v3603_v48, %v1358_v5 }
 0x2f3   :  { %v1216_v52 = vstv %s4459_s11  ;;  %s3766_s30 = sld [smem:[#allocation6 + $0x166]]  ;;  %v1453_v49 = vmul.f32 %v3067_v6, %v1452_v29 }
 0x2f4   :  { %s3771_s4 = sld [smem:[#allocation6 + $0x15c]]  ;;  %v1456_v44 = vstv %s3741_s22  ;;  %v1217_v40 = vmul.f32 %v3622_v26, %v1216_v52  ;;  %v1340_v52 = vadd.f32 %v1339_v20, %v1336_v10  ;;  %v1350_v20 = vstv %s3632_s29 }
 0x2f5   :  { %s3776_s21 = sld [smem:[#allocation6 + $0x15d]]  ;;  %v1457_v56 = vmul.f32 %v3074_v12, %v1456_v44  ;;  %v1460_v22 = vstv %s3746_s6  ;;  %v1454_v28 = vadd.f32 %v1453_v49, %v1450_v42  ;;  %v1291_v42 = vstv %s3566_s0 }
 0x2f6   :  { %s3781_s25 = sld [smem:[#allocation6 + $0x15e]]  ;;  %v1461_v27 = vmul.f32 %v3089_v30, %v1460_v22  ;;  %v1464_v59 = vstv %s3751_s15  ;;  %v1218_v31 = vadd.f32 %v1217_v40, %v1214_v35  ;;  %v1344_v44 = vadd.f32 %v1343_v37, %v1340_v52 }
 0x2f7   :  { %v1468_v15 = vstv %s3755_s14  ;;  %s3788_s10 = sld [smem:[#allocation6 + $0x167]]  ;;  %v1458_v54 = vadd.f32 %v1457_v56, %v1454_v28  ;;  %v1465_v33 = vmul.f32 %v3107_v45, %v1464_v59  ;;  %v1292_v22 = vmul.f32 %v3622_v26, %v1291_v42 }
 0x2f8   :  { %s3791_s20 = sld [smem:[#allocation6 + $0x19a]]  ;;  %v1472_v8 = vstv %s3761_s16  ;;  %v1469_v13 = vmul.f32 %v3128_v19, %v1468_v15  ;;  %v1354_v28 = vstv %s3637_s17  ;;  %v1417_v59 = vstv %s3712_s28  ;;  %v3863_v21 = vpop.eup %2220 }
 0x2f9   :  { %s3797_s8 = sld [smem:[#allocation6 + $0x168]]  ;;  %v1462_v63 = vadd.f32 %v1461_v27, %v1458_v54  ;;  %v1476_v24 = vstv %s3766_s30  ;;  %v1473_v25 = vmul.f32 %v3332_v14, %v1472_v8  ;;  %v1411_v15 = vadd.f32 %v1410_v4, %v1407_v1 }
 0x2fa   :  { %s4460_s3 = sld [smem:[#allocation22_spill]]  ;;  %v1477_v7 = vmul.f32 %v3338_v23, %v1476_v24  ;;  %v1414_v10 = vmul.f32 %v3367_v51, %v1413_v55  ;;  %v1289_v54 = vadd.f32 %v1288_v41, %v1285_v39  ;;  %v1351_v35 = vmul.f32 %v3399_v11, %v1350_v20 }
 0x2fb   :  { %s3801_s23 = sld [smem:[#allocation6 + $0x169]]  ;;  %v1466_v18 = vadd.f32 %v1465_v33, %v1462_v63  ;;  %v1348_v33 = vadd.f32 %v1347_v53, %v1344_v44  ;;  %v1355_v40 = vmul.f32 %v3449_v16, %v1354_v28  ;;  %v1418_v8 = vmul.f32 %v3374_v50, %v1417_v59 }
 0x2fc   :  { %s3806_s11 = sld [smem:[#allocation6 + $0x16a]]  ;;  %v1415_v24 = vadd.f32 %v1414_v10, %v1411_v15  ;;  %v1362_v28 = vstv %s3665_s18 }
 0x2fd   :  { %s3810_s27 = sld [smem:[#allocation6 + $0x16b]]  ;;  %v1470_v29 = vadd.f32 %v1469_v13, %v1466_v18  ;;  %v1480_v49 = vstv %s3788_s10 }
 0x2fe   :  { %s3817_s22 = sld [smem:[#allocation6 + $0x16c]]  ;;  %v1481_v61 = vmul.f32 %v3348_v34, %v1480_v49  ;;  %v1419_v49 = vadd.f32 %v1418_v8, %v1415_v24 }
 0x2ff   :  { %s3822_s1 = sld [smem:[#allocation6 + $0x16d]]  ;;  %v1474_v56 = vadd.f32 %v1473_v25, %v1470_v29  ;;  %v1484_v0 = vstv %s3797_s8  ;;  %v1352_v25 = vadd.f32 %v1351_v35, %v1348_v33 }
 0x300   :  { %v1220_v32 = vstv %s4460_s3  ;;  %s4461_s6 = sld [smem:[#allocation54_spill]]  ;;  %v1485_v13 = vmul.f32 %v3355_v38, %v1484_v0  ;;  %v1429_v0 = vstv %s3726_s9  ;;  %v1423_v35 = vadd.f32 %v1422_v36, %v1419_v49 }
 0x301   :  { %s3826_s26 = sld [smem:[#allocation6 + $0x171]]  ;;  %v1478_v60 = vadd.f32 %v1477_v7, %v1474_v56  ;;  %v3842_v43 = vadd.f32 %v1220_v32, %v1218_v31  ;;  %v1488_v52 = vstv %s3801_s23  ;;  %v1425_v7 = vstv %s3722_s13 }
 0x302   :  { %s3830_s0 = sld [smem:[#allocation6 + $0x172]]  ;;  %v1489_v1 = vmul.f32 %v3367_v51, %v1488_v52  ;;  %v1492_v44 = vstv %s3806_s11  ;;  %v1293_v56 = vadd.f32 %v1292_v22, %v1289_v54  ;;  %v1356_v20 = vadd.f32 %v1355_v40, %v1352_v25 }
 0x303   :  { %s3835_s19 = sld [smem:[#allocation6 + $0x173]]  ;;  %v1482_v63 = vadd.f32 %v1481_v61, %v1478_v60  ;;  %v1366_v60 = vstv %s3669_s24  ;;  %v1426_v61 = vmul.f32 %v3399_v11, %v1425_v7  ;;  %v1493_v22 = vmul.f32 %v3374_v50, %v1492_v44 }
 0x304   :  { %s3840_s7 = sld [smem:[#allocation6 + $0x174]]  ;;  %v1496_v40 = vstv %s3810_s27  ;;  %v1360_v9 = vadd.f32 %v1359_v46, %v1356_v20  ;;  %v1370_v7 = vstv %s3678_s12  ;;  %2222 = vtanh.f32 %v3842_v43 }
 0x305   :  { %s3846_s29 = sld [smem:[#allocation6 + $0x175]]  ;;  %v1486_v39 = vadd.f32 %v1485_v13, %v1482_v63  ;;  %v3909_v63 = vmul.f32 %v3622_v26, %v1366_v60  ;;  %v1497_v25 = vmul.f32 %v3381_v62, %v1496_v40 }
 0x306   :  { %v1295_v27 = vstv %s4461_s6  ;;  %s3850_s17 = sld [smem:[#allocation6 + $0x176]] }
 0x307   :  { %v1524_v57 = vstv %s3826_s26  ;;  %s3856_s28 = sld [smem:[#allocation6 + $0x177]]  ;;  %v1490_v33 = vadd.f32 %v1489_v1, %v1486_v39 }
 0x308   :  { %v1525_v37 = vmul.f32 %v3059_v2, %v1524_v57  ;;  %v1527_v3 = vstv %s3830_s0  ;;  %s3861_s15 = sld [smem:[#allocation6 + $0x178]]  ;;  %v1363_v57 = vmul.f32 %v3610_v58, %v1362_v28  ;;  %v1441_v28 = vstv %s3781_s25 }
 0x309   :  { %s3866_s5 = sld [smem:[#allocation6 + $0x16e]]  ;;  %v1528_v17 = vmul.f32 %v3067_v6, %v1527_v3  ;;  %v1531_v18 = vstv %s3835_s19  ;;  %v1433_v3 = vstv %s3771_s4 }
 0x30a   :  { %v1532_v31 = vmul.f32 %v3074_v12, %v1531_v18  ;;  %v1535_v32 = vstv %s3840_s7  ;;  %s3873_s2 = sld [smem:[#allocation6 + $0x179]]  ;;  %v1494_v18 = vadd.f32 %v1493_v22, %v1490_v33  ;;  %v1434_v1 = vmul.f32 %v3603_v48, %v1433_v3 }
 0x30b   :  { %s3876_s14 = sld [smem:[#allocation6 + $0x16f]]  ;;  %v1529_v41 = vadd.f32 %v1528_v17, %v1525_v37  ;;  %v1536_v42 = vmul.f32 %v3089_v30, %v1535_v32  ;;  %v1539_v29 = vstv %s3846_s29  ;;  %v1430_v37 = vmul.f32 %v3449_v16, %v1429_v0 }
 0x30c   :  { %v1543_v4 = vstv %s3850_s17  ;;  %s3883_s16 = sld [smem:[#allocation6 + $0x17a]]  ;;  %v1540_v55 = vmul.f32 %v3107_v45, %v1539_v29  ;;  %v1437_v17 = vstv %s3776_s21  ;;  %v1500_v32 = vstv %s3817_s22 }
 0x30d   :  { %s3886_s30 = sld [smem:[#allocation6 + $0x170]]  ;;  %v1533_v53 = vadd.f32 %v1532_v31, %v1529_v41  ;;  %v1547_v59 = vstv %s3856_s28  ;;  %v1544_v10 = vmul.f32 %v3128_v19, %v1543_v4  ;;  %v1427_v31 = vadd.f32 %v1426_v61, %v1423_v35 }
 0x30e   :  { %s3891_s13 = sld [smem:[#allocation6 + $0x17b]]  ;;  %v1551_v54 = vstv %s3861_s15  ;;  %v1548_v8 = vmul.f32 %v3332_v14, %v1547_v59  ;;  %v1364_v29 = vadd.f32 %v1363_v57, %v1360_v9  ;;  %v1504_v4 = vstv %s3822_s1 }
 0x30f   :  { %v1537_v15 = vadd.f32 %v1536_v42, %v1533_v53  ;;  %s3896_s10 = sld [smem:[#allocation6 + $0x17c]]  ;;  %v1552_v52 = vmul.f32 %v3338_v23, %v1551_v54  ;;  %v3930_v42 = vadd.f32 %v1295_v27, %v1293_v56  ;;  %v1438_v27 = vmul.f32 %v3610_v58, %v1437_v17 }
 0x310   :  { %s3901_s8 = sld [smem:[#allocation6 + $0x17d]]  ;;  %v1555_v13 = vstv %s3873_s2  ;;  %v1498_v53 = vadd.f32 %v1497_v25, %v1494_v18  ;;  %v1431_v20 = vadd.f32 %v1430_v37, %v1427_v31  ;;  %v1505_v61 = vmul.f32 %v3449_v16, %v1504_v4 }
 0x311   :  { %v1541_v5 = vadd.f32 %v1540_v55, %v1537_v15  ;;  %s3905_s18 = sld [smem:[#allocation6 + $0x17e]]  ;;  %v1556_v41 = vmul.f32 %v3348_v34, %v1555_v13  ;;  %v1501_v55 = vmul.f32 %v3399_v11, %v1500_v32  ;;  %v1508_v15 = vstv %s3866_s5 }
 0x312   :  { %s3912_s24 = sld [smem:[#allocation6 + $0x17f]]  ;;  %v1559_v46 = vstv %s3883_s16  ;;  %v1509_v31 = vmul.f32 %v3603_v48, %v1508_v15  ;;  %2224 = vtanh.f32 %v3930_v42 }
 0x313   :  { %v1545_v24 = vadd.f32 %v1544_v10, %v1541_v5  ;;  %s3917_s9 = sld [smem:[#allocation6 + $0x180]]  ;;  %v1560_v44 = vmul.f32 %v3355_v38, %v1559_v46  ;;  %v1502_v40 = vadd.f32 %v1501_v55, %v1498_v53 }
 0x314   :  { %s3922_s3 = sld [smem:[#allocation6 + $0x183]]  ;;  %v1563_v39 = vstv %s3891_s13 }
 0x315   :  { %v1549_v36 = vadd.f32 %v1548_v8, %v1545_v24  ;;  %s3926_s4 = sld [smem:[#allocation6 + $0x184]]  ;;  %v1567_v56 = vstv %s3896_s10  ;;  %v1564_v60 = vmul.f32 %v3367_v51, %v1563_v39 }
 0x316   :  { %s3934_s21 = sld [smem:[#allocation6 + $0x185]]  ;;  %v1571_v10 = vstv %s3901_s8  ;;  %v1568_v22 = vmul.f32 %v3374_v50, %v1567_v56 }
 0x317   :  { %v1553_v49 = vadd.f32 %v1552_v52, %v1549_v36  ;;  %s3939_s23 = sld [smem:[#allocation6 + $0x186]]  ;;  %v1575_v5 = vstv %s3905_s18  ;;  %v1572_v13 = vmul.f32 %v3381_v62, %v1571_v10 }
 0x318   :  { %s3944_s11 = sld [smem:[#allocation6 + $0x187]]  ;;  %v1579_v25 = vstv %s3912_s24 }
 0x319   :  { %v1557_v59 = vadd.f32 %v1556_v41, %v1553_v49  ;;  %s3948_s27 = sld [smem:[#allocation6 + $0x188]]  ;;  %v1512_v41 = vstv %s3876_s14  ;;  %v1580_v4 = vmul.f32 %v3449_v16, %v1579_v25  ;;  %v1583_v49 = vstv %s3917_s9 }
 0x31a   :  { %v1599_v0 = vstv %s3922_s3  ;;  %s3954_s22 = sld [smem:[#allocation6 + $0x189]] }
 0x31b   :  { %v1561_v33 = vadd.f32 %v1560_v44, %v1557_v59  ;;  %v1600_v54 = vmul.f32 %v3059_v2, %v1599_v0  ;;  %v1602_v35 = vstv %s3926_s4  ;;  %s3959_s25 = sld [smem:[#allocation6 + $0x18a]]  ;;  %v1435_v2 = vadd.f32 %v1434_v1, %v1431_v20 }
 0x31c   :  { %s3961_s1 = sld [smem:[#allocation6 + $0x19b]]  ;;  %v1603_v8 = vmul.f32 %v3067_v6, %v1602_v35  ;;  %v1606_v9 = vstv %s3934_s21  ;;  %v1576_v6 = vmul.f32 %v3399_v11, %v1575_v5  ;;  %v1513_v20 = vmul.f32 %v3610_v58, %v1512_v41  ;;  %s2306_s21 = smov [#allocation7]  }
 0x31d   :  { %v1565_v57 = vadd.f32 %v1564_v60, %v1561_v33  ;;  %v1607_v37 = vmul.f32 %v3074_v12, %v1606_v9  ;;  %v1610_v3 = vstv %s3939_s23  ;;  %s3969_s6 = sld [smem:[#allocation6 + $0x18b]]  ;;  %v1506_v12 = vadd.f32 %v1505_v61, %v1502_v40  ;;  %s1717_s23 = sshll.u32 %s2306_s21, 4  ;;  %s1718_s23 = int_to_ptr.vmem [resolvable:$true] %s1717_s23 }
 0x31e   :  { %s3971_s26 = sld [smem:[#allocation6 + $0x181]]  ;;  %v1604_v24 = vadd.f32 %v1603_v8, %v1600_v54  ;;  %v1611_v52 = vmul.f32 %v3089_v30, %v1610_v3  ;;  %v1614_v17 = vstv %s3944_s11  ;;  %v1368_v30 = vadd.f32 %v3909_v63, %v1364_v29 }
 0x31f   :  { %v1569_v18 = vadd.f32 %v1568_v22, %v1565_v57  ;;  %v1618_v46 = vstv %s3948_s27  ;;  %s3978_s0 = sld [smem:[#allocation6 + $0x18c]]  ;;  %v1615_v36 = vmul.f32 %v3107_v45, %v1614_v17  ;;  %v1439_v55 = vadd.f32 %v1438_v27, %v1435_v2 }
 0x320   :  { %s3981_s19 = sld [smem:[#allocation6 + $0x182]]  ;;  %v1608_v32 = vadd.f32 %v1607_v37, %v1604_v24  ;;  %v1622_v1 = vstv %s3954_s22  ;;  %v1619_v53 = vmul.f32 %v3128_v19, %v1618_v46  ;;  %v1442_v45 = vmul.f32 %v3622_v26, %v1441_v28  ;;  %v2223_v37 = vpop.eup %2222 }
 0x321   :  { %v1573_v39 = vadd.f32 %v1572_v13, %v1569_v18  ;;  %s3987_s7 = sld [smem:[#allocation6 + $0x18d]]  ;;  %v1626_v29 = vstv %s3959_s25  ;;  %v1510_v56 = vadd.f32 %v1509_v31, %v1506_v12  ;;  %v1623_v60 = vmul.f32 %v3332_v14, %v1622_v1 }
 0x322   :  { %v1612_v44 = vadd.f32 %v1611_v52, %v1608_v32  ;;  %s3992_s29 = sld [smem:[#allocation6 + $0x18e]]  ;;  %v1516_v19 = vstv %s3886_s30  ;;  %v1584_v27 = vmul.f32 %v3603_v48, %v1583_v49  ;;  %v1627_v0 = vmul.f32 %v3338_v23, %v1626_v29 }
 0x323   :  { %v1577_v63 = vadd.f32 %v1576_v6, %v1573_v39  ;;  %s3995_s17 = sld [smem:[#allocation6 + $0x19c]]  ;;  %v1630_v28 = vstv %s3969_s6  ;;  %v1371_v14 = vadd.f32 %v1370_v7, %v1368_v30  ;;  %v1443_v43 = vadd.f32 %v1442_v45, %v1439_v55 }
 0x324   :  { %v1616_v59 = vadd.f32 %v1615_v36, %v1612_v44  ;;  %s4000_s28 = sld [smem:[#allocation6 + $0x18f]]  ;;  %v1587_v15 = vstv %s3971_s26  ;;  %v1514_v22 = vadd.f32 %v1513_v20, %v1510_v56  ;;  %v1517_v54 = vmul.f32 %v3622_v26, %v1516_v19 }
 0x325   :  { %s4006_s15 = sld [smem:[#allocation6 + $0x190]]  ;;  %v1581_v61 = vadd.f32 %v1580_v4, %v1577_v63  ;;  %v1634_v33 = vstv %s3978_s0  ;;  %v1631_v40 = vmul.f32 %v3348_v34, %v1630_v28  ;;  %v1445_v23 = vstv %s3791_s20 }
 0x326   :  { %v1620_v10 = vadd.f32 %v1619_v53, %v1616_v59  ;;  %s4010_s5 = sld [smem:[#allocation6 + $0x191]]  ;;  %v1588_v5 = vmul.f32 %v3610_v58, %v1587_v15  ;;  %v1591_v8 = vstv %s3981_s19  ;;  %v1635_v57 = vmul.f32 %v3355_v38, %v1634_v33  ;;  %v2225_v38 = vpop.eup %2224 }
 0x327   :  { %s4016_s2 = sld [smem:[#allocation6 + $0x19e]]  ;;  %v1638_v42 = vstv %s3987_s7  ;;  %v1585_v7 = vadd.f32 %v1584_v27, %v1581_v61  ;;  %2226 = vtanh.f32 %v1371_v14  ;;  %v1446_v34 = vadd.f32 %v1445_v23, %v1443_v43 }
 0x328   :  { %v1624_v35 = vadd.f32 %v1623_v60, %v1620_v10  ;;  %s4020_s14 = sld [smem:[#allocation6 + $0x19f]]  ;;  %v1642_v13 = vstv %s3992_s29  ;;  %v1518_v3 = vadd.f32 %v1517_v54, %v1514_v22  ;;  %v1639_v24 = vmul.f32 %v3367_v51, %v1638_v42 }
 0x329   :  { %s4026_s12 = sld [smem:[#allocation6 + $0x1a0]]  ;;  %v1592_v52 = vmul.f32 %v3622_v26, %v1591_v8  ;;  %v1643_v17 = vmul.f32 %v3374_v50, %v1642_v13  ;;  %v1589_v25 = vadd.f32 %v1588_v5, %v1585_v7  ;;  %v1520_v51 = vstv %s3961_s1 }
 0x32a   :  { %v1628_v9 = vadd.f32 %v1627_v0, %v1624_v35  ;;  %s4030_s16 = sld [smem:[#allocation6 + $0x1a1]]  ;;  %v1646_v18 = vstv %s4000_s28  ;;  %2228 = vtanh.f32 %v1446_v34  ;;  %v1521_v44 = vadd.f32 %v1520_v51, %v1518_v3 }
 0x32b   :  { %s4032_s30 = sld [smem:[#allocation6 + $0x192]]  ;;  %v1650_v32 = vstv %s4006_s15  ;;  %v1647_v41 = vmul.f32 %v3381_v62, %v1646_v18  ;;  %v1593_v53 = vadd.f32 %v1592_v52, %v1589_v25  ;;  %v1595_v45 = vstv %s3995_s17 }
 0x32c   :  { %v1632_v2 = vadd.f32 %v1631_v40, %v1628_v9  ;;  %s4035_s20 = sld [smem:[#allocation6 + $0x1a2]]  ;;  %2230 = vtanh.f32 %v1521_v44 }
 0x32d   :  { %s4040_s13 = sld [smem:[#allocation6 + $0x193]]  ;;  %v1674_v6 = vstv %s4016_s2  ;;  %v2227_v4 = vpop.eup %2226  ;;  %v1596_v19 = vadd.f32 %v1595_v45, %v1593_v53 }
 0x32e   :  { %v1636_v46 = vadd.f32 %v1635_v57, %v1632_v2  ;;  %v1675_v12 = vmul.f32 %v3768_v47, %v1674_v6  ;;  %v1677_v31 = vstv %s4020_s14  ;;  %s4047_s10 = sld [smem:[#allocation6 + $0x194]]  ;;  %v1654_v47 = vstv %s4010_s5 }
 0x32f   :  { %v1678_v36 = vmul.f32 %v3863_v21, %v1677_v31  ;;  %v1681_v50 = vstv %s4026_s12  ;;  %s4053_s8 = sld [smem:[#allocation6 + $0x1a3]]  ;;  %v1651_v21 = vmul.f32 %v3399_v11, %v1650_v32  ;;  %v1655_v20 = vmul.f32 %v3449_v16, %v1654_v47 }
 0x330   :  { %v1640_v30 = vadd.f32 %v1639_v24, %v1636_v46  ;;  %v1682_v39 = vmul.f32 %v2223_v37, %v1681_v50  ;;  %v1685_v1 = vstv %s4030_s16  ;;  %s2149_s18 = sld [smem:[#allocation6 + $0x1a4]]  ;;  %v2229_v61 = vpop.eup %2228  ;;  %2232 = vtanh.f32 %v1596_v19 }
 0x331   :  { %v1679_v49 = vadd.f32 %v1678_v36, %v1675_v12  ;;  %v1658_v63 = vstv %s4032_s30  ;;  %v1686_v62 = vmul.f32 %v2225_v38, %v1685_v1  ;;  %s2142_s24 = sld [smem:[#allocation6 + $0x19d]] }
 0x332   :  { %v1644_v55 = vadd.f32 %v1643_v17, %v1640_v30  ;;  %v1689_v59 = vstv %s4035_s20  ;;  %v1659_v28 = vmul.f32 %v3603_v48, %v1658_v63  ;;  %s2150_s9 = sld [smem:[#allocation6 + $0x1a5]]  ;;  %v2231_v35 = vpop.eup %2230 }
 0x333   :  { %v1683_v29 = vadd.f32 %v1682_v39, %v1679_v49  ;;  %v1662_v60 = vstv %s4040_s13  ;;  %v1690_v10 = vmul.f32 %v2227_v4, %v1689_v59  ;;  %s2151_s3 = sld [smem:[#allocation6 + $0x1a6]] }
 0x334   :  { %v1648_v56 = vadd.f32 %v1647_v41, %v1644_v55  ;;  %v1666_v11 = vstv %s4047_s10  ;;  %v1663_v14 = vmul.f32 %v3610_v58, %v1662_v60  ;;  %s2152_s4 = sld [smem:[#allocation6 + $0x1a7]] }
 0x335   :  { %v1687_v15 = vadd.f32 %v1686_v62, %v1683_v29  ;;  %v1693_v43 = vstv %s4053_s8  ;;  %v1667_v33 = vmul.f32 %v3622_v26, %v1666_v11  ;;  %s4462_s22 = sld [smem:[#allocation82_spill]] }
 0x336   :  { %v1652_v27 = vadd.f32 %v1651_v21, %v1648_v56  ;;  %v1694_v54 = vmul.f32 %v2229_v61, %v1693_v43  ;;  %v1697_v23 = vstv %s2149_s18  ;;  %v2233_v7 = vpop.eup %2232 }
 0x337   :  { %v1691_v22 = vadd.f32 %v1690_v10, %v1687_v15  ;;  %v1670_v5 = vstv %s2142_s24  ;;  %v1698_v42 = vmul.f32 %v2231_v35, %v1697_v23 }
 0x338   :  { %v1656_v0 = vadd.f32 %v1655_v20, %v1652_v27  ;;  %v1701_v57 = vstv %s2150_s9 }
 0x339   :  { %v1695_v8 = vadd.f32 %v1694_v54, %v1691_v22  ;;  %v1702_v13 = vmul.f32 %v2233_v7, %v1701_v57  ;;  %v1705_v37 = vstv %s2151_s3 }
 0x33a   :  { %v1660_v16 = vadd.f32 %v1659_v28, %v1656_v0  ;;  %v1709_v2 = vstv %s2152_s4 }
 0x33b   :  { %v1699_v58 = vadd.f32 %v1698_v42, %v1695_v8  ;;  %s1719_s25 = sshll.u32 %s4462_s22, 4  ;;  %s1720_s25 = int_to_ptr.hbm [resolvable:$true] %s1719_s25 }
 0x33c   :  { %v1664_v40 = vadd.f32 %v1663_v14, %v1660_v16 }
 0x33d   :  { %v1703_v34 = vadd.f32 %v1702_v13, %v1699_v58 }
 0x33e   :  { %v1668_v48 = vadd.f32 %v1667_v33, %v1664_v40 }
 0x340   :  { %v1671_v9 = vadd.f32 %v1670_v5, %v1668_v48 }
 0x342   :  { %2234 = vtanh.f32 %v1671_v9 }
 0x348   :  { %v2235_v26 = vpop.eup %2234 }
 0x349   :  { %v1706_v3 = vmul.f32 %v2235_v26, %v1705_v37 }
 0x34b   :  { %v1707_v24 = vadd.f32 %v1706_v3, %v1703_v34 }
 0x34d   :  { %v1710_v38 = vadd.f32 %v1709_v2, %v1707_v24 }
 0x34f   :  { %1711 = vst [vmem:[#allocation7] sm:$0xff] %v1710_v38 }
 0x350   :  { %1722 = dma.vmem_to_hbm [thread:$0]  %s1718_s23, 128, %s1720_s25, [#allocation4]  }
 0x351   :  { %2300 = dma.done.wait [#allocation4], 128  }
 0x352   :  { %2301 = vsyncadd [#allocation4], 4294967168 }
 0x353   :  { %1727 = vsyncpa [#allocation3], 1 }
 0x354   :  { %1728 = vsyncpa [#allocation4], 1 }
 0x355   :  { %1729 = vsyncpa [#allocation5], 1 }

</bundles_post_ra>
